<compile_context>
chip_gen: v6e
topology: v6e:2x2x1
jax: 0.10.0
libtpu: 0.0.40
codegen_flags: <defaults>
</compile_context>

<pallas_src>
import functools

import jax
import jax.numpy as jnp
import numpy as np
from jax.experimental import pallas as pl
from jax.experimental.pallas import tpu as pltpu


def _round_up(x, m):
    return ((x + m - 1) // m) * m


def _agg_kernel(edge_ref, hh_ref, w1_ref, b1_ref, w2_ref, b2_ref, h_ref,
                *, residual, num_msgs, hidden_nf):
    H = hidden_nf

    # --- edge feature aggregation: sum over the mailbox axis ------------------
    # edge_ref block is (TN, M*H) lane-dense; sum M aligned 128-multiple slices
    # (VPU adds, free filler under the MXU work; accumulate in f32).
    edge = edge_ref[...]
    ef32 = edge[:, 0:H].astype(jnp.float32)
    for m in range(1, num_msgs):
        ef32 = ef32 + edge[:, m * H:(m + 1) * H].astype(jnp.float32)

    # --- node MLP: Linear -> SiLU -> Linear ------------------------------------
    hh = hh_ref[...]                                              # (TN, In)
    agg = jnp.concatenate([hh, ef32.astype(hh.dtype)], axis=-1)   # (TN, In+H)
    z = jnp.dot(agg, w1_ref[...],
                preferred_element_type=jnp.float32) + b1_ref[...]     # (TN, H) f32
    z = z * jax.nn.sigmoid(z)                                     # SiLU in f32
    h = jnp.dot(z.astype(w2_ref.dtype), w2_ref[...],
                preferred_element_type=jnp.float32) + b2_ref[...]     # (TN, Out) f32
    if residual:
        h = hh.astype(jnp.float32) + h
    h_ref[...] = h.astype(h_ref.dtype)


def aggregation_layer(trans_mb, edge_mb, x, hh, w1, b1, w2, b2,
                      *, residual=True, node_tile=512,
                      compute_dtype=jnp.float32):
    """trans_mb: (N, M, 3)  edge_mb: (N, M, H)  x: (N, 3)  hh: (N, In)
       w1: (In + H, H)  b1: (H,)  w2: (H, Out)  b2: (Out,)
       Returns (coord (N, 3) f32, h (N, Out) f32)."""
    N, M, _C = trans_mb.shape
    H = edge_mb.shape[-1]
    In = hh.shape[-1]
    Out = w2.shape[-1]
    if residual:
        # The module silently requires this (h += data['hh']); make it explicit.
        assert In == Out, "residual path requires input_nf == output_nf"

    # --- coordinate path: plain JAX --------------------------------------------
    # A (tile, M, 3) block pads lanes 3->128 (~42x waste) and a 3-wide output
    # forces masked stores, so keep this tiny elementwise path outside Pallas.
    coord = x + jnp.mean(trans_mb, axis=1)

    # --- lane-dense operands ----------------------------------------------------
    edge_flat = jnp.asarray(edge_mb, compute_dtype).reshape(N, M * H)
    hh_in = jnp.asarray(hh, compute_dtype)
    w1_c = jnp.asarray(w1, compute_dtype)
    w2_c = jnp.asarray(w2, compute_dtype)
    b1_2d = jnp.asarray(b1, jnp.float32).reshape(1, H)
    b2_2d = jnp.asarray(b2, jnp.float32).reshape(1, Out)

    # --- tiling: uneven grid, no HBM padding copy -------------------------------
    # Clamp the tile so tiny graphs don't allocate oversized blocks; keep it a
    # multiple of 128 (sublane/packing + MXU friendly for f32 and bf16).
    node_tile = max(128, min(node_tile, _round_up(max(N, 1), 128)))
    grid_n = pl.cdiv(N, node_tile)

    kernel = functools.partial(_agg_kernel, residual=residual,
                               num_msgs=M, hidden_nf=H)

    # VMEM budget: double-buffered input/output blocks + weights + headroom,
    # clamped to stay safe on v5e (16 MiB default scoped) and v7x (64 MiB phys).
    itemsize = jnp.dtype(compute_dtype).itemsize
    per_step = node_tile * (M * H + In) * itemsize + node_tile * Out * 4
    weights = ((In + H) * H + H * Out) * itemsize + (H + Out) * 4
    vmem_bytes = int(min(max(2 * per_step + 2 * weights + (4 << 20), 16 << 20),
                         64 << 20))

    h = pl.pallas_call(
        kernel,
        out_shape=jax.ShapeDtypeStruct((N, Out), jnp.float32),
        grid_spec=pltpu.PrefetchScalarGridSpec(
            num_scalar_prefetch=0,
            grid=(grid_n,),
            in_specs=[
                pl.BlockSpec((node_tile, M * H), lambda i: (i, 0)),
                pl.BlockSpec((node_tile, In), lambda i: (i, 0)),
                pl.BlockSpec((In + H, H), lambda i: (0, 0)),
                pl.BlockSpec((1, H), lambda i: (0, 0)),
                pl.BlockSpec((H, Out), lambda i: (0, 0)),
                pl.BlockSpec((1, Out), lambda i: (0, 0)),
            ],
            out_specs=pl.BlockSpec((node_tile, Out), lambda i: (i, 0)),
        ),
        compiler_params=pltpu.CompilerParams(
            dimension_semantics=("parallel",),
            vmem_limit_bytes=vmem_bytes),
    )(edge_flat, hh_in, w1_c, b1_2d, w2_c, b2_2d)

    return coord, h


def _reference(trans_mb, edge_mb, x, hh, w1, b1, w2, b2, residual):
    coord = x + jnp.mean(trans_mb, axis=1)
    ef = jnp.sum(edge_mb, axis=1)
    agg = jnp.concatenate([hh, ef], axis=1)
    z = jax.nn.silu(agg @ w1 + b1)
    h = z @ w2 + b2
    if residual:
        h = hh + h
    return coord, h


if __name__ == "__main__":
    # Shapes consistent with the module: E_GCL uses input_nf = hidden_nf =
    # output_nf = 128, residual=True; the knn graph (k=11, exclude_self) gives a
    # fixed mailbox of M=11 messages per node. N is deliberately NOT a multiple
    # of node_tile to exercise the uneven-grid remainder handling; grid of 2 so
    # both v7x TensorCores get work.
    N, M, C = 1000, 11, 3
    input_nf, hidden_nf, output_nf = 128, 128, 128
    residual = True

    key = jax.random.PRNGKey(0)
    k = jax.random.split(key, 8)
    trans_mb = jax.random.normal(k[0], (N, M, C), jnp.float32)
    edge_mb = jax.random.normal(k[1], (N, M, hidden_nf), jnp.float32)
    x = jax.random.normal(k[2], (N, C), jnp.float32)
    hh = jax.random.normal(k[3], (N, input_nf), jnp.float32)

    # Deterministic parameter init (stored as (in, out), i.e. torch weight.T).
    w1 = 0.1 * jax.random.normal(k[4], (input_nf + hidden_nf, hidden_nf), jnp.float32)
    b1 = 0.1 * jax.random.normal(k[5], (hidden_nf,), jnp.float32)
    w2 = 0.1 * jax.random.normal(k[6], (hidden_nf, output_nf), jnp.float32)
    b2 = 0.1 * jax.random.normal(k[7], (output_nf,), jnp.float32)

    # f32 path (exact semantics of the PyTorch module).
    coord, h = aggregation_layer(trans_mb, edge_mb, x, hh, w1, b1, w2, b2,
                                 residual=residual, node_tile=512)
    jax.block_until_ready((coord, h))

    coord_ref, h_ref = _reference(trans_mb, edge_mb, x, hh, w1, b1, w2, b2, residual)
    np.testing.assert_allclose(np.asarray(coord), np.asarray(coord_ref),
                               rtol=1e-5, atol=1e-5)
    np.testing.assert_allclose(np.asarray(h), np.asarray(h_ref),
                               rtol=1e-4, atol=1e-4)

    # bf16 streaming path (halves HBM bytes of the dominant mailbox stream);
    # loose tolerance against the f32 reference is expected for bf16 inputs.
    coord_bf, h_bf = aggregation_layer(trans_mb, edge_mb, x, hh, w1, b1, w2, b2,
                                       residual=residual, node_tile=512,
                                       compute_dtype=jnp.bfloat16)
    jax.block_until_ready((coord_bf, h_bf))
    np.testing.assert_allclose(np.asarray(h_bf), np.asarray(h_ref),
                               rtol=1e-1, atol=1.5e-1)

    print("KERNEL_OK")
</pallas_src>

<mosaic_0001>
module attributes {stable_mosaic.version = 11 : i64} {
  func.func @_agg_kernel(%arg0: i32, %arg1: memref<512x1408xf32, #tpu.memory_space<vmem>>, %arg2: memref<512x128xf32, #tpu.memory_space<vmem>>, %arg3: memref<256x128xf32, #tpu.memory_space<vmem>>, %arg4: memref<1x128xf32, #tpu.memory_space<vmem>>, %arg5: memref<128x128xf32, #tpu.memory_space<vmem>>, %arg6: memref<1x128xf32, #tpu.memory_space<vmem>>, %arg7: memref<512x128xf32, #tpu.memory_space<vmem>>) attributes {dimension_semantics = [#tpu.dimension_semantics<parallel>], iteration_bounds = array<i64: 2>, scalar_prefetch = 0 : i64, scratch_operands = 0 : i64, tpu.core_type = #tpu.core_type<tc>, window_params = [{transform_indices = @transform_0, window_bounds = array<i64: 512, 1408>}, {transform_indices = @transform_1, window_bounds = array<i64: 512, 128>}, {pipeline_mode = #tpu.pipeline_mode<synchronous>, transform_indices = @transform_2, window_bounds = array<i64: 256, 128>}, {pipeline_mode = #tpu.pipeline_mode<synchronous>, transform_indices = @transform_3, window_bounds = array<i64: 1, 128>}, {pipeline_mode = #tpu.pipeline_mode<synchronous>, transform_indices = @transform_4, window_bounds = array<i64: 128, 128>}, {pipeline_mode = #tpu.pipeline_mode<synchronous>, transform_indices = @transform_5, window_bounds = array<i64: 1, 128>}, {transform_indices = @transform_6, window_bounds = array<i64: 512, 128>}]} {
    %c0 = arith.constant 0 : index
    %c0_0 = arith.constant 0 : index
    %0 = vector.load %arg1[%c0, %c0_0] : memref<512x1408xf32, #tpu.memory_space<vmem>>, vector<512x1408xf32>
    %1 = vector.extract_strided_slice %0 {offsets = [0, 0], sizes = [512, 128], strides = [1, 1]} : vector<512x1408xf32> to vector<512x128xf32>
    %2 = vector.extract_strided_slice %0 {offsets = [0, 128], sizes = [512, 128], strides = [1, 1]} : vector<512x1408xf32> to vector<512x128xf32>
    %3 = arith.addf %1, %2 : vector<512x128xf32>
    %4 = vector.extract_strided_slice %0 {offsets = [0, 256], sizes = [512, 128], strides = [1, 1]} : vector<512x1408xf32> to vector<512x128xf32>
    %5 = arith.addf %3, %4 : vector<512x128xf32>
    %6 = vector.extract_strided_slice %0 {offsets = [0, 384], sizes = [512, 128], strides = [1, 1]} : vector<512x1408xf32> to vector<512x128xf32>
    %7 = arith.addf %5, %6 : vector<512x128xf32>
    %8 = vector.extract_strided_slice %0 {offsets = [0, 512], sizes = [512, 128], strides = [1, 1]} : vector<512x1408xf32> to vector<512x128xf32>
    %9 = arith.addf %7, %8 : vector<512x128xf32>
    %10 = vector.extract_strided_slice %0 {offsets = [0, 640], sizes = [512, 128], strides = [1, 1]} : vector<512x1408xf32> to vector<512x128xf32>
    %11 = arith.addf %9, %10 : vector<512x128xf32>
    %12 = vector.extract_strided_slice %0 {offsets = [0, 768], sizes = [512, 128], strides = [1, 1]} : vector<512x1408xf32> to vector<512x128xf32>
    %13 = arith.addf %11, %12 : vector<512x128xf32>
    %14 = vector.extract_strided_slice %0 {offsets = [0, 896], sizes = [512, 128], strides = [1, 1]} : vector<512x1408xf32> to vector<512x128xf32>
    %15 = arith.addf %13, %14 : vector<512x128xf32>
    %16 = vector.extract_strided_slice %0 {offsets = [0, 1024], sizes = [512, 128], strides = [1, 1]} : vector<512x1408xf32> to vector<512x128xf32>
    %17 = arith.addf %15, %16 : vector<512x128xf32>
    %18 = vector.extract_strided_slice %0 {offsets = [0, 1152], sizes = [512, 128], strides = [1, 1]} : vector<512x1408xf32> to vector<512x128xf32>
    %19 = arith.addf %17, %18 : vector<512x128xf32>
    %20 = vector.extract_strided_slice %0 {offsets = [0, 1280], sizes = [512, 128], strides = [1, 1]} : vector<512x1408xf32> to vector<512x128xf32>
    %21 = arith.addf %19, %20 : vector<512x128xf32>
    %c0_1 = arith.constant 0 : index
    %c0_2 = arith.constant 0 : index
    %22 = vector.load %arg2[%c0_1, %c0_2] : memref<512x128xf32, #tpu.memory_space<vmem>>, vector<512x128xf32>
    %23 = tpu.concatenate %22, %21 in 1 : vector<512x128xf32>, vector<512x128xf32> -> vector<512x256xf32>
    %c0_3 = arith.constant 0 : index
    %c0_4 = arith.constant 0 : index
    %24 = vector.load %arg3[%c0_3, %c0_4] : memref<256x128xf32, #tpu.memory_space<vmem>>, vector<256x128xf32>
    %cst = arith.constant dense<0.000000e+00> : vector<512x128xf32>
    %25 = tpu.matmul %23, %24, %cst {dimension_numbers = #tpu.dot_dimension_numbers<[1], [0], [0], [1], [0, 0, 1, 1], [], []>} : vector<512x256xf32>, vector<256x128xf32>, vector<512x128xf32> -> vector<512x128xf32>
    %c0_5 = arith.constant 0 : index
    %c0_6 = arith.constant 0 : index
    %26 = vector.load %arg4[%c0_5, %c0_6] : memref<1x128xf32, #tpu.memory_space<vmem>>, vector<1x128xf32>
    %27 = vector.broadcast %26 : vector<1x128xf32> to vector<512x128xf32>
    %28 = arith.addf %25, %27 : vector<512x128xf32>
    %29 = arith.negf %28 : vector<512x128xf32>
    %30 = math.exp %29 : vector<512x128xf32>
    %cst_7 = arith.constant 1.000000e+00 : f32
    %31 = vector.broadcast %cst_7 : f32 to vector<512x128xf32>
    %32 = arith.addf %31, %30 : vector<512x128xf32>
    %33 = arith.divf %31, %32 : vector<512x128xf32>
    %34 = arith.mulf %28, %33 : vector<512x128xf32>
    %c0_8 = arith.constant 0 : index
    %c0_9 = arith.constant 0 : index
    %35 = vector.load %arg5[%c0_8, %c0_9] : memref<128x128xf32, #tpu.memory_space<vmem>>, vector<128x128xf32>
    %cst_10 = arith.constant dense<0.000000e+00> : vector<512x128xf32>
    %36 = tpu.matmul %34, %35, %cst_10 {dimension_numbers = #tpu.dot_dimension_numbers<[1], [0], [0], [1], [0, 0, 1, 1], [], []>} : vector<512x128xf32>, vector<128x128xf32>, vector<512x128xf32> -> vector<512x128xf32>
    %c0_11 = arith.constant 0 : index
    %c0_12 = arith.constant 0 : index
    %37 = vector.load %arg6[%c0_11, %c0_12] : memref<1x128xf32, #tpu.memory_space<vmem>>, vector<1x128xf32>
    %38 = vector.broadcast %37 : vector<1x128xf32> to vector<512x128xf32>
    %39 = arith.addf %36, %38 : vector<512x128xf32>
    %40 = arith.addf %22, %39 : vector<512x128xf32>
    %c0_13 = arith.constant 0 : index
    %c0_14 = arith.constant 0 : index
    %41 = vector.load %arg7[%c0_13, %c0_14] : memref<512x128xf32, #tpu.memory_space<vmem>>, vector<512x128xf32>
    tpu.vector_store %arg7[%c0_13, %c0_14], %40 {strides = array<i32>} : memref<512x128xf32, #tpu.memory_space<vmem>>, vector<512x128xf32>,
    return
  }
  func.func @transform_0(%arg0: i32) -> (i32, i32) {
    %c0_i32 = arith.constant 0 : i32
    %c0_i32_0 = arith.constant 0 : i32
    return %arg0, %c0_i32 : i32, i32
  }
  func.func @transform_1(%arg0: i32) -> (i32, i32) {
    %c0_i32 = arith.constant 0 : i32
    %c0_i32_0 = arith.constant 0 : i32
    return %arg0, %c0_i32 : i32, i32
  }
  func.func @transform_2(%arg0: i32) -> (i32, i32) {
    %c0_i32 = arith.constant 0 : i32
    %c0_i32_0 = arith.constant 0 : i32
    %c0_i32_1 = arith.constant 0 : i32
    return %c0_i32, %c0_i32_0 : i32, i32
  }
  func.func @transform_3(%arg0: i32) -> (i32, i32) {
    %c0_i32 = arith.constant 0 : i32
    %c0_i32_0 = arith.constant 0 : i32
    %c0_i32_1 = arith.constant 0 : i32
    return %c0_i32, %c0_i32_0 : i32, i32
  }
  func.func @transform_4(%arg0: i32) -> (i32, i32) {
    %c0_i32 = arith.constant 0 : i32
    %c0_i32_0 = arith.constant 0 : i32
    %c0_i32_1 = arith.constant 0 : i32
    return %c0_i32, %c0_i32_0 : i32, i32
  }
  func.func @transform_5(%arg0: i32) -> (i32, i32) {
    %c0_i32 = arith.constant 0 : i32
    %c0_i32_0 = arith.constant 0 : i32
    %c0_i32_1 = arith.constant 0 : i32
    return %c0_i32, %c0_i32_0 : i32, i32
  }
  func.func @transform_6(%arg0: i32) -> (i32, i32) {
    %c0_i32 = arith.constant 0 : i32
    %c0_i32_0 = arith.constant 0 : i32
    return %arg0, %c0_i32 : i32, i32
  }
}

</mosaic_0001>

<bundles_post_ra>
// kernel: tpu_custom_call.1
= control target key start
LH: loop header
LB: loop body
LE: loop exit
PB: predicated region body
PF: predicated region fallthrough
CT: control target
= control target key end

     0   :  { %s6179_s0 = inlined_call_operand.hbm [shape: f32[1000,1408], index: 0, kind: input, shape index: {}]   ;;  %s6180_s1 = inlined_call_operand.hbm [shape: f32[1000,128], index: 1, kind: input, shape index: {}]   ;;  %s6181_s2 = inlined_call_operand.hbm [shape: f32[256,128], index: 2, kind: input, shape index: {}]   ;;  %s6182_s3 = inlined_call_operand.hbm [shape: f32[1,128], index: 3, kind: input, shape index: {}]   ;;  %s6183_s4 = inlined_call_operand.hbm [shape: f32[128,128], index: 4, kind: input, shape index: {}]   ;;  %s6184_s5 = inlined_call_operand.hbm [shape: f32[1,128], index: 5, kind: input, shape index: {}]   ;;  %s6185_s6 = inlined_call_operand.hbm [shape: f32[1000,128], index: 6, kind: output, shape index: {}]  }
   0x1   :  { %6189 = sst [smem:[#allocation20_spill]] %s6179_s0 }
   0x2   :  { %6190 = sst [smem:[#allocation21_spill]] %s6181_s2 }
   0x3   :  { %11 = vsyncpa [#allocation3], 0 }
   0x4   :  { %13 = vsyncpa [#allocation3 + $0x1], 0 }
   0x5   :  { %14 = vsyncpa [#allocation6], 0 }
   0x6   :  { %16 = vsyncpa [#allocation6 + $0x1], 0 }
   0x7   :  { %17 = vsyncpa [#allocation9], 0 }
   0x8   :  { %18 = vsyncpa [#allocation12], 0 }
   0x9   :  { %19 = vsyncpa [#allocation4], 0 }
   0xa   :  { %21 = vsyncpa [#allocation4 + $0x1], 0  ;;  %s4444_s21 = smov 0   ;;  %s4446_s22 = smov 0  }
   0xb   :  { %s4448_s23 = smov 0   ;;  %s4450_s24 = smov 0  }
   0xc LB: > { %s4465_s25 = sadd.s32 4294967295, %s4391_s24   ;;  %s3364_s26 = sadd.s32 4294967294, %s4391_s24   ;;  %s4391_s24 = sphi %s4450_s24, %s6214_s24   ;;  %s4387_s23 = sphi %s4448_s23, %s6213_s23   ;;  %s4383_s22 = sphi %s4446_s22, %s6212_s22   ;;  %s4379_s21 = sphi %s4444_s21, %s6211_s21  }
   0xd   : > { %s4469_s27 = sadd.s32 1, %s4391_s24   ;;  %s34_s28 = sadd.s32 1, %s4387_s23 }
   0xe   : > { %s31_s29 = ssub.s32 %s4391_s24, %s4469_s27  ;;  %p41_p0 = scmp.ne.s32.totalorder %s4387_s23, %s4383_s22 }
   0xf   : > { %p32_p1 = scmp.eq.s32.totalorder %s31_s29, 0  ;;  %p42_p2 = scmp.eq.s32.totalorder %s4391_s24, 0 }
  0x10   : > { %p47_p3 = scmp.ne.s32.totalorder %s4383_s22, %s4379_s21  ;;  %p6186_p4 = scmp.eq.s32.totalorder %s4465_s25, 0 }
  0x11   : > { %s4481_s30 = scalar_select %p32_p1, %s4387_s23, %s34_s28  }
  0x12   : > { %p4483_p5 = por %p42_p2, %p41_p0  ;;  %p4489_p6 = por %p6186_p4, %p47_p3 }
  0x13   : > { %p181_p7 = scmp.eq.s32.totalorder %s4465_s25, 1  ;;  %p187_p8 = scmp.eq.s32.totalorder %s3364_s26, 1 }
  0x14   : > { %s6191_s7 = scalar_select %p4483_p5, 1, 0 }
  0x15   : > { %s6192_s8 = scalar_select %p4489_p6, 1, 0 }
  0x16   : > { %p3365_p9 = scmp.ge.s32.totalorder %s4391_s24, 1  ;;  %p194_p10 = scmp.lt.s32.totalorder %s4391_s24, 3 }
  0x17   : > { %p4496_p11 = por %p181_p7, %p41_p0  ;;  %p4500_p12 = por %p187_p8, %p47_p3 }
  0x18   : > { %p4504_p13 = pnand %p3365_p9, %p194_p10  ;;  %s4393_s12 = smov [#allocation8]  }
  0x19   : > { %s6193_s9 = scalar_select %p4496_p11, 1, 0 }
  0x1a   : > { %s6194_s10 = scalar_select %p4500_p12, 1, 0 }
  0x1b   : > { %s6195_s11 = scalar_select %p4504_p13, 1, 0 }
  0x1c   : > { %p3763_p1 = pneg %p4504_p13  ;;  %s220_s13 = sshll.u32 %s4393_s12, 4  ;;  %s221_s13 = int_to_ptr.vmem [resolvable:$true] %s220_s13 }
  0x1d   : > { %s4394_s14 = smov [#allocation7]   ;;  %s4166_s17 = scalar_lea.vmem %s221_s13, 16 }
  0x1e   : > { %s206_s15 = sshll.u32 %s4394_s14, 4  ;;  %p4512_p0 = pnand %p3763_p1, %p6186_p4  ;;  %s207_s15 = int_to_ptr.vmem [resolvable:$true] %s206_s15 }
  0x1f   : > { %p4167_p3 = scmp.ne.s32.totalorder %s221_s13, %s4166_s17  ;;  %s4173_s18 = scalar_lea.vmem %s221_s13, 32 }
  0x20   : > { %p4157_p2 = pneg %p4512_p0  ;;  %p4174_p9 = scmp.lt.s32.totalorder %s221_s13, %s221_s13 }
  0x21   : > { %p4175_p10 = scmp.lt.s32.totalorder %s4173_s18, %s4166_s17 }
  0x22   : > { %p4169_p7 = pnand %p4167_p3, %p4157_p2 }
  0x23   : > { %p4176_p12 = por %p4175_p10, %p4174_p9 }
  0x24   : > { %p4170_p8 = pneg %p4169_p7 }
  0x26   : > { %p4177_p11 = pnand %p4176_p12, %p4170_p8 }
  0x28   : > { %4180 = shalt.err (!%p4177_p11)
}
  0x29   : > { %3769 = dma.hbm_to_vmem [thread:$0]  (!%p4512_p0), %s6182_s3, 16, %s221_s13, [#allocation9]  }
  0x2a   : > { %s4192_s26 = scalar_lea.vmem %s207_s15, 4096  ;;  %p4200_p7 = scmp.lt.s32.totalorder %s207_s15, %s207_s15 }
  0x2b   : > { %p4193_p1 = scmp.ne.s32.totalorder %s207_s15, %s4192_s26  ;;  %p4201_p6 = scmp.lt.s32.totalorder %s4192_s26, %s4192_s26 }
  0x2d   : > { %p4195_p4 = pnand %p4193_p1, %p4157_p2  ;;  %p4202_p13 = por %p4201_p6, %p4200_p7 }
  0x2f   : > { %p4196_p3 = pneg %p4195_p4 }
  0x31   : > { %p4203_p5 = pnand %p4202_p13, %p4196_p3 }
  0x33   : > { %4206 = shalt.err (!%p4203_p5)
}
  0x34   : > { %s4395_s28 = smov 128   ;;  %s4396_s29 = smov 8  }
  0x35   : > { %s6197_s2 = sld [smem:[#allocation21_spill]]  ;;  %s4397_s13 = smov [#allocation10]  }
  0x36   : > { %s230_s17 = sshll.u32 %s4397_s13, 4  ;;  %s4398_s18 = smov [#allocation11]   ;;  %s231_s17 = int_to_ptr.vmem [resolvable:$true] %s230_s17 }
  0x37   : > { %s244_s19 = sshll.u32 %s4398_s18, 4  ;;  %s4218_s20 = scalar_lea.vmem %s231_s17, 2048  ;;  %s245_s19 = int_to_ptr.vmem [resolvable:$true] %s244_s19 }
  0x38   : > { %p4219_p4 = scmp.ne.s32.totalorder %s231_s17, %s4218_s20  ;;  %p4226_p11 = scmp.lt.s32.totalorder %s231_s17, %s231_s17 }
  0x39   : > { %p4227_p12 = scmp.lt.s32.totalorder %s4218_s20, %s4218_s20 }
  0x3a   : > { %p4221_p6 = pnand %p4219_p4, %p4157_p2 }
  0x3b   : > { %3766 = dma.hbm_to_vmem [thread:$0]  (!%p4512_p0), %s6197_s2, 4096, %s207_s15, [#allocation6], %s4395_s28, %s4395_s28, %s4396_s29  }
  0x3c   : > { %p4222_p5 = pneg %p4221_p6  ;;  %p4228_p13 = por %p4227_p12, %p4226_p11 }
  0x3e   : > { %p4229_p8 = pnand %p4228_p13, %p4222_p5 }
  0x40   : > { %4232 = shalt.err (!%p4229_p8)
}
  0x41   : > { %3772 = dma.hbm_to_vmem [thread:$0]  (!%p4512_p0), %s6183_s4, 2048, %s231_s17, [#allocation9], %s4395_s28, %s4395_s28, %s4396_s29  }
  0x42   : > { %s4244_s12 = scalar_lea.vmem %s245_s19, 16  ;;  %s4251_s14 = scalar_lea.vmem %s245_s19, 32 }
  0x43   : > { %p4245_p9 = scmp.ne.s32.totalorder %s245_s19, %s4244_s12  ;;  %p4252_p3 = scmp.lt.s32.totalorder %s245_s19, %s245_s19 }
  0x44   : > { %p4253_p7 = scmp.lt.s32.totalorder %s4251_s14, %s4244_s12 }
  0x45   : > { %p4247_p10 = pnand %p4245_p9, %p4157_p2 }
  0x46   : > { %p4254_p4 = por %p4253_p7, %p4252_p3 }
  0x47   : > { %p4248_p1 = pneg %p4247_p10 }
  0x49   : > { %p4255_p6 = pnand %p4254_p4, %p4248_p1 }
  0x4b   : > { %4258 = shalt.err (!%p4255_p6)
}
  0x4c   : > { %3775 = dma.hbm_to_vmem [thread:$0]  (!%p4512_p0), %s6184_s5, 16, %s245_s19, [#allocation12]  }
  0x4d   : > { %p3370_p5 = scmp.ge.s32.totalorder %s4391_s24, 2 }
  0x4e   : > { %p6198_p2 = scmp.ne.s32.totalorder (!%p3370_p5), %s6191_s7, 0 }
  0x4f   : > { %251 = sbr.rel (%p3370_p5) target bundleno = 157 (0x9d), region = 32 }
  0x54   : > { %254 = sbr.rel (!%p6198_p2) target bundleno = 123 (0x7b), region = 36  ;;  %s255_s28 = sand.u32 (%p6198_p2), 1, %s4387_s23  }
  0x55   : > { %s3371_s29 = sshll.u32 (%p6198_p2), %s4391_s24, 6  ;;  %s3741_s17 = smul.u32 (%p6198_p2), 5632, %s255_s28 }
  0x56   : > { %s261_s20 = ssub.s32 (%p6198_p2), 125, %s3371_s29  ;;  %s4560_s26 = scalar_lea.sflag (%p6198_p2), [#allocation3], %s255_s28 }
  0x57   : > { %p262_p11 = scmp.lt.s32.totalorder (%p6198_p2), %s261_s20, 64  ;;  %s259_s15 = scalar_lea.vmem (%p6198_p2), [#allocation2], %s3741_s17 }
  0x59   : > { %s6216_s20 = smov (!%p262_p11, %s261_s20), 64 }
  0x5a   : > { %s4557_s16 = smul.u32 1408, %s6216_s20 }
  0x5c   : > { %s267_s19 = ssub.s32 90112, %s4557_s16 }
  0x5d   : > { %268 = vsyncadd %s4560_s26, %s267_s19  ;;  %p3374_p0 = scmp.ne.s32.totalorder %s4557_s16, 0  ;;  %s3742_s12 = smul.u32 90112, %s4391_s24 }
  0x5e   : > { %s274_s14 = sshll.u32 %s259_s15, 4  ;;  %s6199_s0 = sld [smem:[#allocation20_spill]]  ;;  %s4570_s14 = int_to_ptr.vmem [resolvable:$true] %s274_s14 }
  0x64   : > { %s4568_s29 = scalar_lea.hbm %s6199_s0, %s3742_s12  ;;  %s4263_s19 = scalar_lea.hbm %s6199_s0, 176000 }
  0x65   : > { %s4259_s28 = scalar_lea.hbm %s4568_s29, %s4557_s16  ;;  %p4264_p9 = scmp.lt.s32.totalorder %s4568_s29, %s6199_s0 }
  0x66   : > { %p4260_p12 = scmp.ne.s32.totalorder %s4568_s29, %s4259_s28  ;;  %p4265_p10 = scmp.lt.s32.totalorder %s4263_s19, %s4259_s28 }
  0x68   : > { %p4261_p13 = pnand %p4260_p12, %p3374_p0  ;;  %p4266_p1 = por %p4265_p10, %p4264_p9 }
  0x6a   : > { %p4262_p8 = pneg %p4261_p13 }
  0x6c   : > { %p4267_p3 = pnand %p4266_p1, %p4262_p8 }
  0x6e   : > { %4270 = shalt.err (!%p4267_p3)
}
  0x6f   : > { %s4271_s12 = scalar_lea.vmem %s4570_s14, %s4557_s16  ;;  %s4399_s13 = smov [#allocation2]  }
  0x70   : > { %p4272_p7 = scmp.ne.s32.totalorder %s4570_s14, %s4271_s12  ;;  %s4275_s18 = sshll.u32 %s4399_s13, 4  ;;  %s4276_s18 = int_to_ptr.vmem [resolvable:$false] %s4275_s18 }
  0x71   : > { %s4277_s17 = scalar_lea.vmem %s4276_s18, 180224  ;;  %p4278_p2 = scmp.lt.s32.totalorder %s4570_s14, %s4276_s18 }
  0x72   : > { %p4273_p4 = pnand %p4272_p7, %p3374_p0  ;;  %p4279_p11 = scmp.lt.s32.totalorder %s4277_s17, %s4271_s12 }
  0x74   : > { %p4274_p6 = pneg %p4273_p4  ;;  %p4280_p12 = por %p4279_p11, %p4278_p2 }
  0x76   : > { %p4281_p13 = pnand %p4280_p12, %p4274_p6 }
  0x78   : > { %4284 = shalt.err (!%p4281_p13)
}
  0x79   : > { %s4400_s2 = smov 1408   ;;  %s4401_s28 = smov 88  }
  0x7a   : > { %280 = dma.hbm_to_vmem [thread:$0]  (%p3374_p0), %s4568_s29, %s4557_s16, %s4570_s14, %s4560_s26, %s4400_s2, %s4400_s2, %s4401_s28  }
  0x7b PF: > { %p6200_p8 = scmp.ne.s32.totalorder %s6191_s7, 0 }
  0x7c   : > { %s284_s20 = sand.u32 (%p6200_p8), 1, %s4391_s24   ;;  %s286_s19 = sand.u32 (%p6200_p8), 1, %s4387_s23  }
  0x7d   : > { %283 = sbr.rel (!%p6200_p8) target bundleno = 157 (0x9d), region = 40  ;;  %s3378_s15 = sshll.u32 (%p6200_p8), %s286_s19, 9 }
  0x7e   : > { %s3379_s12 = sshll.u32 (%p6200_p8), %s4391_s24, 6  ;;  %s4604_s0 = scalar_lea.sflag (%p6200_p8), [#allocation6], %s284_s20 }
  0x7f   : > { %s290_s13 = ssub.s32 (%p6200_p8), 125, %s3379_s12  ;;  %s288_s16 = scalar_lea.vmem (%p6200_p8), [#allocation5], %s3378_s15 }
  0x80   : > { %p291_p9 = scmp.lt.s32.totalorder (%p6200_p8), %s290_s13, 64 }
  0x82   : > { %s6218_s13 = smov (!%p291_p9, %s290_s13), 64 }
  0x83   : > { %s4601_s18 = sshll.u32 %s6218_s13, 7 }
  0x84   : > { %s295_s17 = ssub.s32 8192, %s4601_s18 }
  0x85   : > { %296 = vsyncadd %s4604_s0, %s295_s17  ;;  %p3381_p0 = scmp.ne.s32.totalorder %s4601_s18, 0  ;;  %s3467_s7 = sshll.u32 %s4391_s24, 13 }
  0x86   : > { %s4612_s29 = scalar_lea.hbm %s6180_s1, %s3467_s7  ;;  %s301_s2 = sshll.u32 %s288_s16, 4  ;;  %s4614_s2 = int_to_ptr.vmem [resolvable:$true] %s301_s2 }
  0x87   : > { %s4285_s28 = scalar_lea.hbm %s4612_s29, %s4601_s18  ;;  %s4289_s15 = scalar_lea.hbm %s6180_s1, 16000 }
  0x88   : > { %p4286_p10 = scmp.ne.s32.totalorder %s4612_s29, %s4285_s28  ;;  %p4290_p7 = scmp.lt.s32.totalorder %s4612_s29, %s6180_s1 }
  0x89   : > { %p4291_p4 = scmp.lt.s32.totalorder %s4289_s15, %s4285_s28 }
  0x8a   : > { %p4287_p1 = pnand %p4286_p10, %p3381_p0 }
  0x8b   : > { %p4292_p6 = por %p4291_p4, %p4290_p7 }
  0x8c   : > { %p4288_p3 = pneg %p4287_p1 }
  0x8e   : > { %p4293_p2 = pnand %p4292_p6, %p4288_p3 }
  0x90   : > { %4296 = shalt.err (!%p4293_p2)
}
  0x91   : > { %s4297_s17 = scalar_lea.vmem %s4614_s2, %s4601_s18  ;;  %s4402_s16 = smov [#allocation5]  }
  0x92   : > { %p4298_p11 = scmp.ne.s32.totalorder %s4614_s2, %s4297_s17  ;;  %s4301_s7 = sshll.u32 %s4402_s16, 4  ;;  %s4302_s7 = int_to_ptr.vmem [resolvable:$false] %s4301_s7 }
  0x93   : > { %s4303_s26 = scalar_lea.vmem %s4302_s7, 16384  ;;  %p4304_p8 = scmp.lt.s32.totalorder %s4614_s2, %s4302_s7 }
  0x94   : > { %p4299_p12 = pnand %p4298_p11, %p3381_p0  ;;  %p4305_p9 = scmp.lt.s32.totalorder %s4303_s26, %s4297_s17 }
  0x96   : > { %p4300_p13 = pneg %p4299_p12  ;;  %p4306_p10 = por %p4305_p9, %p4304_p8 }
  0x98   : > { %p4307_p1 = pnand %p4306_p10, %p4300_p13 }
  0x9a   : > { %4310 = shalt.err (!%p4307_p1)
}
  0x9b   : > { %s4403_s14 = smov 128   ;;  %s4404_s28 = smov 8  }
  0x9c   : > { %307 = dma.hbm_to_vmem [thread:$0]  (%p3381_p0), %s4612_s29, %s4601_s18, %s4614_s2, %s4604_s0, %s4403_s14, %s4403_s14, %s4404_s28  }
  0x9d PF: > { %p6201_p3 = scmp.ne.s32.totalorder %s6195_s11, 0 }
  0x9e   : > { %s4643_s20 = sand.u32 (!%p6201_p3), 1, %s4383_s22   ;;  %p6202_p7 = scmp.ne.s32.totalorder (!%p6201_p3), %s6192_s8, 0 }
  0x9f   : > { %313 = sbr.rel (%p6201_p3) target bundleno = 949 (0x3b5), region = 44  ;;  %s316_s15 = scalar_lea.sflag (!%p6201_p3), [#allocation3], %s4643_s20 }
  0xa0   : > { %s3743_s19 = smul.u32 (!%p6201_p3), 5632, %s4643_s20 }
  0xa2   : > { %s4647_s12 = scalar_lea.vmem (!%p6201_p3), [#allocation2], %s3743_s19 }
  0xa4   : > { %4354 = dma.done.wait (%p6202_p7), %s316_s15, 90112  }
  0xa5   : > { %4356 = vsyncadd (%p6202_p7), %s316_s15, 4294877184  ;;  %s324_s0 = sand.u32 1, %s4465_s25   ;;  %s3386_s11 = sshll.u32 %s4643_s20, 9 }
  0xa6   : > { %s325_s18 = scalar_lea.sflag [#allocation6], %s324_s0  ;;  %s4657_s29 = scalar_lea.vmem [#allocation5], %s3386_s11 }
  0xa7   : > { %4358 = dma.done.wait (%p6202_p7), %s325_s18, 8192  }
  0xa8   : > { %4360 = vsyncadd (%p6202_p7), %s325_s18, 4294959104  ;;  %p6203_p0 = scmp.eq.s32.totalorder %s4465_s25, 0 }
  0xaa   : > { %4362 = dma.done.wait (%p6203_p0), [#allocation6], 4096   ;;  %p6204_p4 = pmov %p6203_p0 }
  0xab   : > { %p6205_p6 = pmov %p6203_p0 }
  0xac   : > { %4364 = vsyncadd (%p6204_p4), [#allocation6], 4294963200 }
  0xad   : > { %4366 = dma.done.wait (%p6205_p6), [#allocation9], 2064   ;;  %p6206_p2 = pmov %p6203_p0 }
  0xae   : > { %p6207_p11 = pmov %p6203_p0 }
  0xaf   : > { %4368 = vsyncadd (%p6206_p2), [#allocation9], 4294965232 }
  0xb0   : > { %4370 = dma.done.wait (%p6207_p11), [#allocation12], 16   ;;  %p6208_p12 = pmov %p6203_p0 }
  0xb1   : > { %v4405_v0 = vmov 0.0   ;;  %v1817_v1 = vld [vmem:[#allocation7 + $0x78] sm:$0xff]  ;;  %v1816_v2 = vld [vmem:[#allocation7 + $0x70] sm:$0xff]  ;;  %v1815_v3 = vld [vmem:[#allocation7 + $0x68] sm:$0xff]  ;;  %s5909_s8 = scalar_lea.vmem [#allocation13], %s3386_s11  ;;  %s3211_s2 = scalar_lea.sflag [#allocation4], %s4643_s20 }
  0xb2   : > { %4372 = vsyncadd (%p6208_p12), [#allocation12], 4294967280  ;;  %1841 = vmatprep.subr.mxu0 %v4405_v0  ;;  %3677 = vmatprep.subr.mxu1 %v4405_v0  ;;  %v1814_v4 = vld [vmem:[#allocation7 + $0x60] sm:$0xff]  ;;  %v1813_v5 = vld [vmem:[#allocation7 + $0x58] sm:$0xff]  ;;  %p6209_p13 = scmp.ne.s32.totalorder %s6193_s9, 0 }
  0xb3   : > { %1842 = vmatpush1.msra.mxu0 %v1817_v1  ;;  %3709 = vmatpush1.msra.mxu1 %v1817_v1  ;;  %v1812_v6 = vld [vmem:[#allocation7 + $0x50] sm:$0xff]  ;;  %v1811_v7 = vld [vmem:[#allocation7 + $0x48] sm:$0xff]  ;;  %v394_v8 = vld [vmem:[%s4647_s12] sm:$0xff]  ;;  %s3459_s13 = sshll.u32 (%p6209_p13), %s4465_s25, 6 }
  0xb4   : > { %1843 = vmatprep.subr.mxu0 %v4405_v0  ;;  %3678 = vmatprep.subr.mxu1 %v4405_v0  ;;  %v395_v9 = vld [vmem:[%s4647_s12 + $0x8] sm:$0xff]  ;;  %v396_v10 = vld [vmem:[%s4647_s12 + $0x10] sm:$0xff]  ;;  %v1810_v11 = vld [vmem:[#allocation7 + $0x40] sm:$0xff]  ;;  %s3219_s17 = ssub.s32 (%p6209_p13), 125, %s3459_s13 }
  0xb5   : > { %1844 = vmatpush1.msra.mxu0 %v1816_v2  ;;  %3710 = vmatpush1.msra.mxu1 %v1816_v2  ;;  %v1098_v12 = vadd.f32 %v395_v9, %v394_v8  ;;  %v397_v13 = vld [vmem:[%s4647_s12 + $0x18] sm:$0xff]  ;;  %v398_v16 = vld [vmem:[%s4647_s12 + $0x20] sm:$0xff]  ;;  %v1808_v17 = vld [vmem:[#allocation7 + $0x30] sm:$0xff]  ;;  %p3220_p8 = scmp.lt.s32.totalorder (%p6209_p13), %s3219_s17, 64 }
  0xb6   : > { %1845 = vmatprep.subr.mxu0 %v4405_v0  ;;  %3679 = vmatprep.subr.mxu1 %v4405_v0  ;;  %v1809_v14 = vld [vmem:[#allocation7 + $0x38] sm:$0xff]  ;;  %v399_v19 = vld [vmem:[%s4647_s12 + $0x28] sm:$0xff]  ;;  %v400_v22 = vld [vmem:[%s4647_s12 + $0x30] sm:$0xff] }
  0xb7   : > { %1846 = vmatpush1.msra.mxu0 %v1815_v3  ;;  %3711 = vmatpush1.msra.mxu1 %v1815_v3  ;;  %v1162_v15 = vadd.f32 %v1098_v12, %v396_v10  ;;  %v1807_v20 = vld [vmem:[#allocation7 + $0x28] sm:$0xff]  ;;  %v1806_v23 = vld [vmem:[#allocation7 + $0x20] sm:$0xff]  ;;  %v401_v25 = vld [vmem:[%s4647_s12 + $0x38] sm:$0xff] }
  0xb8   : > { %1847 = vmatprep.subr.mxu0 %v4405_v0  ;;  %3680 = vmatprep.subr.mxu1 %v4405_v0  ;;  %v405_v26 = vld [vmem:[%s4647_s12 + $0x58] sm:$0xff]  ;;  %v406_v27 = vld [vmem:[%s4647_s12 + $0x60] sm:$0xff]  ;;  %v1804_v31 = vld [vmem:[#allocation7 + $0x10] sm:$0xff] }
  0xb9   : > { %1848 = vmatpush1.msra.mxu0 %v1814_v4  ;;  %3712 = vmatpush1.msra.mxu1 %v1814_v4  ;;  %v1226_v18 = vadd.f32 %v1162_v15, %v397_v13  ;;  %v1805_v28 = vld [vmem:[#allocation7 + $0x18] sm:$0xff]  ;;  %v402_v30 = vld [vmem:[%s4647_s12 + $0x40] sm:$0xff]  ;;  %v1099_v33 = vadd.f32 %v406_v27, %v405_v26  ;;  %v403_v34 = vld [vmem:[%s4647_s12 + $0x48] sm:$0xff] }
  0xba   : > { %1849 = vmatprep.subr.mxu0 %v4405_v0  ;;  %3681 = vmatprep.subr.mxu1 %v4405_v0  ;;  %v407_v35 = vld [vmem:[%s4647_s12 + $0x68] sm:$0xff]  ;;  %v416_v38 = vld [vmem:[%s4647_s12 + $0xb0] sm:$0xff]  ;;  %v417_v39 = vld [vmem:[%s4647_s12 + $0xb8] sm:$0xff] }
  0xbb   : > { %1850 = vmatpush1.msra.mxu0 %v1813_v5  ;;  %3713 = vmatpush1.msra.mxu1 %v1813_v5  ;;  %v1290_v21 = vadd.f32 %v1226_v18, %v398_v16  ;;  %v1803_v36 = vld [vmem:[#allocation7 + $0x8] sm:$0xff]  ;;  %v404_v40 = vld [vmem:[%s4647_s12 + $0x50] sm:$0xff]  ;;  %v1802_v41 = vld [vmem:[#allocation7] sm:$0xff]  ;;  %v1163_v43 = vadd.f32 %v1099_v33, %v407_v35  ;;  %v1100_v46 = vadd.f32 %v417_v39, %v416_v38 }
  0xbc   : > { %1851 = vmatprep.subr.mxu0 %v4405_v0  ;;  %3682 = vmatprep.subr.mxu1 %v4405_v0  ;;  %v1833_v44 = vld [vmem:[#allocation7 + $0xf8] sm:$0xff]  ;;  %v408_v45 = vld [vmem:[%s4647_s12 + $0x70] sm:$0xff]  ;;  %v418_v48 = vld [vmem:[%s4647_s12 + $0xc0] sm:$0xff] }
  0xbd   : > { %1852 = vmatpush1.msra.mxu0 %v1812_v6  ;;  %3714 = vmatpush1.msra.mxu1 %v1812_v6  ;;  %v1354_v24 = vadd.f32 %v1290_v21, %v399_v19  ;;  %v427_v49 = vld [vmem:[%s4647_s12 + $0x108] sm:$0xff]  ;;  %v428_v50 = vld [vmem:[%s4647_s12 + $0x110] sm:$0xff]  ;;  %v1227_v52 = vadd.f32 %v1163_v43, %v408_v45  ;;  %v409_v53 = vld [vmem:[%s4647_s12 + $0x78] sm:$0xff]  ;;  %v1164_v54 = vadd.f32 %v1100_v46, %v418_v48 }
  0xbe   : > { %1853 = vmatprep.subr.mxu0 %v4405_v0  ;;  %3683 = vmatprep.subr.mxu1 %v4405_v0  ;;  %v1832_v51 = vld [vmem:[#allocation7 + $0xf0] sm:$0xff]  ;;  %v1101_v55 = vadd.f32 %v428_v50, %v427_v49  ;;  %v438_v56 = vld [vmem:[%s4647_s12 + $0x160] sm:$0xff]  ;;  %v439_v57 = vld [vmem:[%s4647_s12 + $0x168] sm:$0xff] }
  0xbf   : > { %1854 = vmatpush1.msra.mxu0 %v1811_v7  ;;  %3715 = vmatpush1.msra.mxu1 %v1811_v7  ;;  %v1418_v29 = vadd.f32 %v1354_v24, %v400_v22  ;;  %v1831_v58 = vld [vmem:[#allocation7 + $0xe8] sm:$0xff]  ;;  %v429_v60 = vld [vmem:[%s4647_s12 + $0x118] sm:$0xff]  ;;  %v1830_v61 = vld [vmem:[#allocation7 + $0xe0] sm:$0xff]  ;;  %v1291_v63 = vadd.f32 %v1227_v52, %v409_v53  ;;  %v1102_v1 = vadd.f32 %v439_v57, %v438_v56 }
  0xc0   : > { %1855 = vmatprep.subr.mxu0 %v4405_v0  ;;  %3684 = vmatprep.subr.mxu1 %v4405_v0  ;;  %v419_v59 = vld [vmem:[%s4647_s12 + $0xc8] sm:$0xff]  ;;  %v1829_v62 = vld [vmem:[#allocation7 + $0xd8] sm:$0xff]  ;;  %v410_v2 = vld [vmem:[%s4647_s12 + $0x80] sm:$0xff]  ;;  %v1165_v5 = vadd.f32 %v1101_v55, %v429_v60 }
  0xc1   : > { %1856 = vmatpush1.msra.mxu0 %v1810_v11  ;;  %3716 = vmatpush1.msra.mxu1 %v1810_v11  ;;  %v1482_v32 = vadd.f32 %v1418_v29, %v401_v25  ;;  %v420_v3 = vld [vmem:[%s4647_s12 + $0xd0] sm:$0xff]  ;;  %v1228_v4 = vadd.f32 %v1164_v54, %v419_v59  ;;  %v430_v7 = vld [vmem:[%s4647_s12 + $0x120] sm:$0xff]  ;;  %v449_v8 = vld [vmem:[%s4647_s12 + $0x1b8] sm:$0xff]  ;;  %v1355_v11 = vadd.f32 %v1291_v63, %v410_v2 }
  0xc2   : > { %1857 = vmatprep.subr.mxu0 %v4405_v0  ;;  %3685 = vmatprep.subr.mxu1 %v4405_v0  ;;  %v440_v6 = vld [vmem:[%s4647_s12 + $0x170] sm:$0xff]  ;;  %v450_v9 = vld [vmem:[%s4647_s12 + $0x1c0] sm:$0xff]  ;;  %v4747_v15 = vld [vmem:[#allocation7 + $0xc8] sm:$0xff]  ;;  %v1229_v18 = vadd.f32 %v1165_v5, %v430_v7 }
  0xc3   : > { %1858 = vmatpush1.msra.mxu0 %v1809_v14  ;;  %3717 = vmatpush1.msra.mxu1 %v1809_v14  ;;  %v1546_v37 = vadd.f32 %v1482_v32, %v402_v30  ;;  %v1828_v10 = vld [vmem:[#allocation7 + $0xd0] sm:$0xff]  ;;  %v1166_v12 = vadd.f32 %v1102_v1, %v440_v6  ;;  %v461_v14 = vld [vmem:[%s4647_s12 + $0x218] sm:$0xff]  ;;  %v411_v16 = vld [vmem:[%s4647_s12 + $0x88] sm:$0xff] }
  0xc4   : > { %1859 = vmatprep.subr.mxu0 %v4405_v0  ;;  %3686 = vmatprep.subr.mxu1 %v4405_v0  ;;  %v460_v13 = vld [vmem:[%s4647_s12 + $0x210] sm:$0xff]  ;;  %v441_v19 = vld [vmem:[%s4647_s12 + $0x178] sm:$0xff]  ;;  %v431_v22 = vld [vmem:[%s4647_s12 + $0x128] sm:$0xff]  ;;  %v1419_v26 = vadd.f32 %v1355_v11, %v411_v16 }
  0xc5   : > { %1860 = vmatpush1.msra.mxu0 %v1808_v17  ;;  %3718 = vmatpush1.msra.mxu1 %v1808_v17  ;;  %v1610_v42 = vadd.f32 %v1546_v37, %v403_v34  ;;  %v1292_v17 = vadd.f32 %v1228_v4, %v420_v3  ;;  %v421_v21 = vld [vmem:[%s4647_s12 + $0xd8] sm:$0xff]  ;;  %v4756_v24 = vld [vmem:[#allocation7 + $0xc0] sm:$0xff]  ;;  %v1104_v25 = vadd.f32 %v461_v14, %v460_v13  ;;  %v471_v29 = vld [vmem:[%s4647_s12 + $0x268] sm:$0xff] }
  0xc6   : > { %1861 = vmatprep.subr.mxu0 %v4405_v0  ;;  %3687 = vmatprep.subr.mxu1 %v4405_v0  ;;  %v1230_v27 = vadd.f32 %v1166_v12, %v441_v19  ;;  %v472_v30 = vld [vmem:[%s4647_s12 + $0x270] sm:$0xff]  ;;  %v1293_v34 = vadd.f32 %v1229_v18, %v431_v22  ;;  %v442_v35 = vld [vmem:[%s4647_s12 + $0x180] sm:$0xff]  ;;  %v473_v46 = vld [vmem:[%s4647_s12 + $0x278] sm:$0xff] }
  0xc7   : > { %1862 = vmatpush1.msra.mxu0 %v1807_v20  ;;  %3719 = vmatpush1.msra.mxu1 %v1807_v20  ;;  %v1674_v47 = vadd.f32 %v1610_v42, %v404_v40  ;;  %v1103_v20 = vadd.f32 %v450_v9, %v449_v8  ;;  %v412_v32 = vld [vmem:[%s4647_s12 + $0x90] sm:$0xff]  ;;  %v1356_v33 = vadd.f32 %v1292_v17, %v421_v21  ;;  %v422_v37 = vld [vmem:[%s4647_s12 + $0xe0] sm:$0xff]  ;;  %v483_v48 = vld [vmem:[%s4647_s12 + $0x2c8] sm:$0xff] }
  0xc8   : > { %1863 = vmatprep.subr.mxu0 %v4405_v0  ;;  %3688 = vmatprep.subr.mxu1 %v4405_v0  ;;  %v432_v38 = vld [vmem:[%s4647_s12 + $0x130] sm:$0xff]  ;;  %v1105_v43 = vadd.f32 %v472_v30, %v471_v29  ;;  %v1294_v45 = vadd.f32 %v1230_v27, %v442_v35  ;;  %v4783_v49 = vld [vmem:[#allocation7 + $0xa8] sm:$0xff]  ;;  %v413_v50 = vld [vmem:[%s4647_s12 + $0x98] sm:$0xff] }
  0xc9   : > { %1864 = vmatpush1.msra.mxu0 %v1806_v23  ;;  %3720 = vmatpush1.msra.mxu1 %v1806_v23  ;;  %v451_v23 = vld [vmem:[%s4647_s12 + $0x1c8] sm:$0xff]  ;;  %v452_v39 = vld [vmem:[%s4647_s12 + $0x1d0] sm:$0xff]  ;;  %v1357_v52 = vadd.f32 %v1293_v34, %v432_v38  ;;  %v433_v56 = vld [vmem:[%s4647_s12 + $0x138] sm:$0xff] }
  0xca   : > { %1865 = vmatprep.subr.mxu0 %v4405_v0  ;;  %3689 = vmatprep.subr.mxu1 %v4405_v0  ;;  %v4774_v40 = vld [vmem:[#allocation7 + $0xb0] sm:$0xff]  ;;  %v443_v53 = vld [vmem:[%s4647_s12 + $0x188] sm:$0xff]  ;;  %v453_v57 = vld [vmem:[%s4647_s12 + $0x1d8] sm:$0xff] }
  0xcb   : > { %1866 = vmatpush1.msra.mxu0 %v1805_v28  ;;  %3721 = vmatpush1.msra.mxu1 %v1805_v28  ;;  %v462_v28 = vld [vmem:[%s4647_s12 + $0x220] sm:$0xff]  ;;  %v423_v55 = vld [vmem:[%s4647_s12 + $0xe8] sm:$0xff]  ;;  %v4797_v63 = vld [vmem:[#allocation7 + $0x98] sm:$0xff]  ;;  %v1358_v2 = vadd.f32 %v1294_v45, %v443_v53  ;;  %v1421_v7 = vadd.f32 %v1357_v52, %v433_v56 }
  0xcc   : > { %1867 = vmatprep.subr.mxu0 %v4405_v0  ;;  %3690 = vmatprep.subr.mxu1 %v4405_v0  ;;  %v1168_v42 = vadd.f32 %v1104_v25, %v462_v28  ;;  %v414_v59 = vld [vmem:[%s4647_s12 + $0xa0] sm:$0xff]  ;;  %v464_v3 = vld [vmem:[%s4647_s12 + $0x230] sm:$0xff]  ;;  %v415_v17 = vld [vmem:[%s4647_s12 + $0xa8] sm:$0xff] }
  0xcd   : > { %1868 = vmatpush1.msra.mxu0 %v1804_v31  ;;  %3722 = vmatpush1.msra.mxu1 %v1804_v31  ;;  %v4764_v31 = vld [vmem:[#allocation7 + $0xb8] sm:$0xff]  ;;  %v474_v4 = vld [vmem:[%s4647_s12 + $0x280] sm:$0xff]  ;;  %v484_v5 = vld [vmem:[%s4647_s12 + $0x2d0] sm:$0xff] }
  0xce   : > { %1869 = vmatprep.subr.mxu0 %v4405_v0  ;;  %1905 = vmatprep.mubr.f32.mxu0 %v1674_v47  ;;  %v482_v47 = vld [vmem:[%s4647_s12 + $0x2c0] sm:$0xff]  ;;  %v444_v8 = vld [vmem:[%s4647_s12 + $0x190] sm:$0xff]  ;;  %v445_v18 = vld [vmem:[%s4647_s12 + $0x198] sm:$0xff] }
  0xcf   : > { %1870 = vmatpush1.msra.mxu0 %v1803_v36  ;;  %3691 = vmatprep.subr.mxu1 %v4405_v0  ;;  %v494_v11 = vld [vmem:[%s4647_s12 + $0x320] sm:$0xff]  ;;  %v424_v12 = vld [vmem:[%s4647_s12 + $0xf0] sm:$0xff]  ;;  %v465_v25 = vld [vmem:[%s4647_s12 + $0x238] sm:$0xff] }
  0xd0   : > { %1871 = vmatprep.subr.mxu0 %v4405_v0  ;;  %3723 = vmatpush1.msra.mxu1 %v1803_v36  ;;  %v1167_v36 = vadd.f32 %v1103_v20, %v451_v23  ;;  %v434_v13 = vld [vmem:[%s4647_s12 + $0x140] sm:$0xff]  ;;  %v4812_v16 = vld [vmem:[#allocation7 + $0x90] sm:$0xff]  ;;  %v1422_v23 = vadd.f32 %v1358_v2, %v444_v8  ;;  %v485_v27 = vld [vmem:[%s4647_s12 + $0x2d8] sm:$0xff] }
  0xd1   : > { %1872 = vmatpush1.msra.mxu0 %v1802_v41  ;;  %3692 = vmatprep.subr.mxu1 %v4405_v0  ;;  %v454_v14 = vld [vmem:[%s4647_s12 + $0x1e0] sm:$0xff]  ;;  %v1485_v30 = vadd.f32 %v1421_v7, %v434_v13  ;;  %v504_v34 = vld [vmem:[%s4647_s12 + $0x370] sm:$0xff]  ;;  %v505_v35 = vld [vmem:[%s4647_s12 + $0x378] sm:$0xff] }
  0xd2   : > { %1873 = vmatprep.subr.mxu0 %v4405_v0  ;;  %3724 = vmatpush1.msra.mxu1 %v1802_v41  ;;  %v463_v41 = vld [vmem:[%s4647_s12 + $0x228] sm:$0xff]  ;;  %v1231_v54 = vadd.f32 %v1167_v36, %v452_v39  ;;  %v4829_v36 = vld [vmem:[#allocation7 + $0x80] sm:$0xff]  ;;  %v1108_v53 = vadd.f32 %v505_v35, %v504_v34  ;;  %v488_v35 = vld [vmem:[%s4647_s12 + $0x2f0] sm:$0xff] }
  0xd3   : > { %1874 = vmatpush2.msra.mxu0 %v1833_v44  ;;  %3693 = vmatprep.subr.mxu1 %v4405_v0  ;;  %v1232_v60 = vadd.f32 %v1168_v42, %v463_v41  ;;  %v435_v38 = vld [vmem:[%s4647_s12 + $0x148] sm:$0xff]  ;;  %v1738_v41 = vld [vmem:[%s4657_s29] sm:$0xff] }
  0xd4   : > { %1875 = vmatprep.subr.mxu0 %v4405_v0  ;;  %3725 = vmatpush2.msra.mxu1 %v1833_v44  ;;  %v1483_v44 = vadd.f32 %v1419_v26, %v412_v32  ;;  %v1295_v9 = vadd.f32 %v1231_v54, %v453_v57  ;;  %v475_v26 = vld [vmem:[%s4647_s12 + $0x288] sm:$0xff]  ;;  %v446_v42 = vld [vmem:[%s4647_s12 + $0x1a0] sm:$0xff] }
  0xd5   : > { %1876 = vmatpush2.msra.mxu0 %v1832_v51  ;;  %3694 = vmatprep.subr.mxu1 %v4405_v0  ;;  %v1296_v19 = vadd.f32 %v1232_v60, %v464_v3  ;;  %v455_v39 = vld [vmem:[%s4647_s12 + $0x1e8] sm:$0xff]  ;;  %v506_v57 = vld [vmem:[%s4647_s12 + $0x380] sm:$0xff]  ;;  %v516_v60 = vld [vmem:[%s4647_s12 + $0x3d0] sm:$0xff] }
  0xd6   : > { %1877 = vmatprep.subr.mxu0 %v4405_v0  ;;  %3726 = vmatpush2.msra.mxu1 %v1832_v51  ;;  %v1420_v51 = vadd.f32 %v1356_v33, %v422_v37  ;;  %v1547_v1 = vadd.f32 %v1483_v44, %v413_v50  ;;  %v1359_v32 = vadd.f32 %v1295_v9, %v454_v14  ;;  %v495_v33 = vld [vmem:[%s4647_s12 + $0x328] sm:$0xff]  ;;  %v425_v37 = vld [vmem:[%s4647_s12 + $0xf8] sm:$0xff]  ;;  %v486_v50 = vld [vmem:[%s4647_s12 + $0x2e0] sm:$0xff] }
  0xd7   : > { %1878 = vmatpush2.msra.mxu0 %v1831_v58  ;;  %3695 = vmatprep.subr.mxu1 %v4405_v0  ;;  %v1360_v44 = vadd.f32 %v1296_v19, %v465_v25  ;;  %v1739_v2 = vld [vmem:[%s4657_s29 + $0x8] sm:$0xff]  ;;  %v477_v9 = vld [vmem:[%s4647_s12 + $0x298] sm:$0xff]  ;;  %v478_v34 = vld [vmem:[%s4647_s12 + $0x2a0] sm:$0xff] }
  0xd8   : > { %1879 = vmatprep.subr.mxu0 %v4405_v0  ;;  %3727 = vmatpush2.msra.mxu1 %v1831_v58  ;;  %v4792_v58 = vld [vmem:[#allocation7 + $0xa0] sm:$0xff]  ;;  %v1484_v6 = vadd.f32 %v1420_v51, %v423_v55  ;;  %v1611_v22 = vadd.f32 %v1547_v1, %v414_v59  ;;  %v496_v51 = vld [vmem:[%s4647_s12 + $0x330] sm:$0xff]  ;;  %v1549_v55 = vadd.f32 %v1485_v30, %v435_v38  ;;  %v515_v59 = vld [vmem:[%s4647_s12 + $0x3c8] sm:$0xff] }
  0xd9   : > { %1880 = vmatpush2.msra.mxu0 %v1830_v61  ;;  %3696 = vmatprep.subr.mxu1 %v4405_v0  ;;  %v1423_v56 = vadd.f32 %v1359_v32, %v455_v39  ;;  %v456_v1 = vld [vmem:[%s4647_s12 + $0x1f0] sm:$0xff]  ;;  %v447_v3 = vld [vmem:[%s4647_s12 + $0x1a8] sm:$0xff]  ;;  %v1109_v13 = vadd.f32 %v516_v60, %v515_v59  ;;  %v497_v19 = vld [vmem:[%s4647_s12 + $0x338] sm:$0xff] }
  0xda   : > { %1881 = vmatprep.subr.mxu0 %v4405_v0  ;;  %3728 = vmatpush2.msra.mxu1 %v1830_v61  ;;  %v1169_v61 = vadd.f32 %v1105_v43, %v473_v46  ;;  %v1548_v29 = vadd.f32 %v1484_v6, %v424_v12  ;;  %v466_v43 = vld [vmem:[%s4647_s12 + $0x240] sm:$0xff]  ;;  %v1675_v46 = vadd.f32 %v1611_v22, %v415_v17  ;;  %v467_v8 = vld [vmem:[%s4647_s12 + $0x248] sm:$0xff]  ;;  %v457_v22 = vld [vmem:[%s4647_s12 + $0x1f8] sm:$0xff] }
  0xdb   : > { %1882 = vmatpush2.msra.mxu0 %v1829_v62  ;;  %3697 = vmatprep.subr.mxu1 %v4405_v0  ;;  %v1172_v12 = vadd.f32 %v1108_v53, %v506_v57  ;;  %v527_v25 = vld [vmem:[%s4647_s12 + $0x428] sm:$0xff] }
  0xdc   : > { %1883 = vmatprep.subr.mxu0 %v4405_v0  ;;  %3729 = vmatpush2.msra.mxu1 %v1829_v62  ;;  %v1106_v62 = vadd.f32 %v483_v48, %v482_v47  ;;  %v1233_v20 = vadd.f32 %v1169_v61, %v474_v4  ;;  %v1486_v47 = vadd.f32 %v1422_v23, %v445_v18  ;;  %v476_v48 = vld [vmem:[%s4647_s12 + $0x290] sm:$0xff]  ;;  %v426_v61 = vld [vmem:[%s4647_s12 + $0x100] sm:$0xff]  ;;  %v499_v57 = vld [vmem:[%s4647_s12 + $0x348] sm:$0xff] }
  0xdd   : > { %1884 = vmatpush2.msra.mxu0 %v1828_v10  ;;  %3698 = vmatprep.subr.mxu1 %v4405_v0  ;;  %v1612_v54 = vadd.f32 %v1548_v29, %v425_v37  ;;  %v1424_v4 = vadd.f32 %v1360_v44, %v466_v43  ;;  %v1487_v18 = vadd.f32 %v1423_v56, %v456_v1  ;;  %v526_v23 = vld [vmem:[%s4647_s12 + $0x420] sm:$0xff]  ;;  %v489_v56 = vld [vmem:[%s4647_s12 + $0x2f8] sm:$0xff]  ;;  %v519_v1 = vld [vmem:[%s4647_s12 + $0x3e8] sm:$0xff] }
  0xde   : > { %1885 = vmatprep.subr.mxu0 %v4405_v0  ;;  %3730 = vmatpush2.msra.mxu1 %v1828_v10  ;;  %v493_v10 = vld [vmem:[%s4647_s12 + $0x318] sm:$0xff]  ;;  %v1170_v21 = vadd.f32 %v1106_v62, %v484_v5  ;;  %v1297_v45 = vadd.f32 %v1233_v20, %v475_v26  ;;  %v436_v62 = vld [vmem:[%s4647_s12 + $0x150] sm:$0xff]  ;;  %v1550_v7 = vadd.f32 %v1486_v47, %v446_v42  ;;  %v507_v20 = vld [vmem:[%s4647_s12 + $0x388] sm:$0xff] }
  0xdf   : > { %1886 = vmatpush2.msra.mxu0 %v4747_v15  ;;  %3699 = vmatprep.subr.mxu1 %v4405_v0  ;;  %v1107_v28 = vadd.f32 %v494_v11, %v493_v10  ;;  %v487_v10 = vld [vmem:[%s4647_s12 + $0x2e8] sm:$0xff]  ;;  %v1676_v14 = vadd.f32 %v1612_v54, %v426_v61  ;;  %v1613_v17 = vadd.f32 %v1549_v55, %v436_v62  ;;  %v1740_v26 = vld [vmem:[%s4657_s29 + $0x10] sm:$0xff]  ;;  %v498_v43 = vld [vmem:[%s4647_s12 + $0x340] sm:$0xff] }
  0xe0   : > { %1887 = vmatprep.subr.mxu0 %v4405_v0  ;;  %3731 = vmatpush2.msra.mxu1 %v4747_v15  ;;  %v4818_v15 = vld [vmem:[#allocation7 + $0x88] sm:$0xff]  ;;  %v1361_v5 = vadd.f32 %v1297_v45, %v476_v48  ;;  %v1614_v32 = vadd.f32 %v1550_v7, %v447_v3  ;;  %v1236_v38 = vadd.f32 %v1172_v12, %v507_v20  ;;  %v518_v44 = vld [vmem:[%s4647_s12 + $0x3e0] sm:$0xff]  ;;  %v1741_v48 = vld [vmem:[%s4657_s29 + $0x18] sm:$0xff] }
  0xe1   : > { %1888 = vmatpush2.msra.mxu0 %v4756_v24  ;;  %3700 = vmatprep.subr.mxu1 %v4405_v0  ;;  %v1171_v52 = vadd.f32 %v1107_v28, %v495_v33  ;;  %v1488_v28 = vadd.f32 %v1424_v4, %v467_v8  ;;  %v468_v33 = vld [vmem:[%s4647_s12 + $0x250] sm:$0xff]  ;;  %v1551_v42 = vadd.f32 %v1487_v18, %v457_v22  ;;  %v538_v47 = vld [vmem:[%s4647_s12 + $0x480] sm:$0xff]  ;;  %v539_v7 = vld [vmem:[%s4647_s12 + $0x488] sm:$0xff] }
  0xe2   : > { %1889 = vmatprep.subr.mxu0 %v4405_v0  ;;  %3732 = vmatpush2.msra.mxu1 %v4756_v24  ;;  %v1234_v24 = vadd.f32 %v1170_v21, %v485_v27  ;;  %v517_v21 = vld [vmem:[%s4647_s12 + $0x3d8] sm:$0xff]  ;;  %v448_v27 = vld [vmem:[%s4647_s12 + $0x1b0] sm:$0xff]  ;;  %v1425_v29 = vadd.f32 %v1361_v5, %v477_v9  ;;  %v1110_v45 = vadd.f32 %v527_v25, %v526_v23  ;;  %v1742_v8 = vld [vmem:[%s4657_s29 + $0x20] sm:$0xff] }
  0xe3   : > { %1890 = vmatpush2.msra.mxu0 %v4764_v31  ;;  %3701 = vmatprep.subr.mxu1 %v4405_v0  ;;  %v1235_v11 = vadd.f32 %v1171_v52, %v496_v51  ;;  %v1173_v39 = vadd.f32 %v1109_v13, %v517_v21  ;;  %v1552_v51 = vadd.f32 %v1488_v28, %v468_v33  ;;  %v479_v52 = vld [vmem:[%s4647_s12 + $0x2a8] sm:$0xff]  ;;  %v548_v4 = vld [vmem:[%s4647_s12 + $0x4d0] sm:$0xff]  ;;  %v549_v5 = vld [vmem:[%s4647_s12 + $0x4d8] sm:$0xff] }
  0xe4   : > { %1891 = vmatprep.subr.mxu0 %v4405_v0  ;;  %3733 = vmatpush2.msra.mxu1 %v4764_v31  ;;  %v1298_v6 = vadd.f32 %v1234_v24, %v486_v50  ;;  %v437_v31 = vld [vmem:[%s4647_s12 + $0x158] sm:$0xff]  ;;  %v528_v24 = vld [vmem:[%s4647_s12 + $0x430] sm:$0xff]  ;;  %v1489_v53 = vadd.f32 %v1425_v29, %v478_v34  ;;  %v1678_v55 = vadd.f32 %v1614_v32, %v448_v27  ;;  %v470_v9 = vld [vmem:[%s4647_s12 + $0x260] sm:$0xff] }
  0xe5   : > { %1892 = vmatpush2.msra.mxu0 %v4774_v40  ;;  %3702 = vmatprep.subr.mxu1 %v4405_v0  ;;  %v1299_v37 = vadd.f32 %v1235_v11, %v497_v19  ;;  %v469_v50 = vld [vmem:[%s4647_s12 + $0x258] sm:$0xff]  ;;  %v1237_v61 = vadd.f32 %v1173_v39, %v518_v44  ;;  %v480_v11 = vld [vmem:[%s4647_s12 + $0x2b0] sm:$0xff]  ;;  %v510_v18 = vld [vmem:[%s4647_s12 + $0x3a0] sm:$0xff]  ;;  %v1112_v21 = vadd.f32 %v549_v5, %v548_v4 }
  0xe6   : > { %1893 = vmatprep.subr.mxu0 %v4405_v0  ;;  %3734 = vmatpush2.msra.mxu1 %v4774_v40  ;;  %v1362_v30 = vadd.f32 %v1298_v6, %v487_v10  ;;  %v458_v40 = vld [vmem:[%s4647_s12 + $0x200] sm:$0xff]  ;;  %v459_v6 = vld [vmem:[%s4647_s12 + $0x208] sm:$0xff]  ;;  %v1616_v10 = vadd.f32 %v1552_v51, %v469_v50  ;;  %v1553_v12 = vadd.f32 %v1489_v53, %v479_v52  ;;  %v520_v23 = vld [vmem:[%s4647_s12 + $0x3f0] sm:$0xff] }
  0xe7   : > { %1894 = vmatpush2.msra.mxu0 %v4783_v49  ;;  %3703 = vmatprep.subr.mxu1 %v4405_v0  ;;  %v1363_v59 = vadd.f32 %v1299_v37, %v498_v43  ;;  %v1615_v62 = vadd.f32 %v1551_v42, %v458_v40  ;;  %v1301_v20 = vadd.f32 %v1237_v61, %v519_v1  ;;  %v530_v25 = vld [vmem:[%s4647_s12 + $0x440] sm:$0xff]  ;;  %v540_v28 = vld [vmem:[%s4647_s12 + $0x490] sm:$0xff]  ;;  %v559_v29 = vld [vmem:[%s4647_s12 + $0x528] sm:$0xff] }
  0xe8   : > { %1895 = vmatprep.subr.mxu0 %v4405_v0  ;;  %3735 = vmatpush2.msra.mxu1 %v4783_v49  ;;  %v508_v49 = vld [vmem:[%s4647_s12 + $0x390] sm:$0xff]  ;;  %v1426_v54 = vadd.f32 %v1362_v30, %v488_v35  ;;  %v550_v27 = vld [vmem:[%s4647_s12 + $0x4e0] sm:$0xff]  ;;  %v1743_v32 = vld [vmem:[%s4657_s29 + $0x28] sm:$0xff]  ;;  %v1680_v40 = vadd.f32 %v1616_v10, %v470_v9  ;;  %v1617_v34 = vadd.f32 %v1553_v12, %v480_v11 }
  0xe9   : > { %1896 = vmatpush2.msra.mxu0 %v4792_v58  ;;  %3704 = vmatprep.subr.mxu1 %v4405_v0  ;;  %v1300_v60 = vadd.f32 %v1236_v38, %v508_v49  ;;  %v1679_v22 = vadd.f32 %v1615_v62, %v459_v6  ;;  %v560_v30 = vld [vmem:[%s4647_s12 + $0x530] sm:$0xff]  ;;  %v481_v33 = vld [vmem:[%s4647_s12 + $0x2b8] sm:$0xff]  ;;  %v491_v35 = vld [vmem:[%s4647_s12 + $0x308] sm:$0xff]  ;;  %v1176_v42 = vadd.f32 %v1112_v21, %v550_v27 }
  0xea   : > { %1897 = vmatprep.subr.mxu0 %v4405_v0  ;;  %3736 = vmatpush2.msra.mxu1 %v4792_v58  ;;  %v509_v58 = vld [vmem:[%s4647_s12 + $0x398] sm:$0xff]  ;;  %v1490_v13 = vadd.f32 %v1426_v54, %v489_v56  ;;  %v570_v43 = vld [vmem:[%s4647_s12 + $0x580] sm:$0xff]  ;;  %v571_v49 = vld [vmem:[%s4647_s12 + $0x588] sm:$0xff] }
  0xeb   : > { %1898 = vmatpush2.msra.mxu0 %v4797_v63  ;;  %3705 = vmatprep.subr.mxu1 %v4405_v0  ;;  %v1364_v19 = vadd.f32 %v1300_v60, %v509_v58  ;;  %v501_v38 = vld [vmem:[%s4647_s12 + $0x358] sm:$0xff]  ;;  %v511_v44 = vld [vmem:[%s4647_s12 + $0x3a8] sm:$0xff]  ;;  %v1744_v52 = vld [vmem:[%s4657_s29 + $0x30] sm:$0xff]  ;;  %v1114_v56 = vadd.f32 %v571_v49, %v570_v43 }
  0xec   : > { %1899 = vmatprep.subr.mxu0 %v4405_v0  ;;  %3737 = vmatpush2.msra.mxu1 %v4797_v63  ;;  %v490_v63 = vld [vmem:[%s4647_s12 + $0x300] sm:$0xff]  ;;  %v541_v50 = vld [vmem:[%s4647_s12 + $0x498] sm:$0xff]  ;;  %v492_v53 = vld [vmem:[%s4647_s12 + $0x310] sm:$0xff] }
  0xed   : > { %1900 = vmatpush2.msra.mxu0 %v4812_v16  ;;  %3706 = vmatprep.subr.mxu1 %v4405_v0  ;;  %v1554_v37 = vadd.f32 %v1490_v13, %v490_v63  ;;  %v561_v51 = vld [vmem:[%s4647_s12 + $0x538] sm:$0xff]  ;;  %v512_v58 = vld [vmem:[%s4647_s12 + $0x3b0] sm:$0xff]  ;;  %v522_v60 = vld [vmem:[%s4647_s12 + $0x400] sm:$0xff] }
  0xee   : > { %1901 = vmatprep.subr.mxu0 %v4405_v0  ;;  %3738 = vmatpush2.msra.mxu1 %v4812_v16  ;;  %v572_v62 = vld [vmem:[%s4647_s12 + $0x590] sm:$0xff]  ;;  %v581_v6 = vld [vmem:[%s4647_s12 + $0x5d8] sm:$0xff]  ;;  %v562_v9 = vld [vmem:[%s4647_s12 + $0x540] sm:$0xff] }
  0xef   : > { %1902 = vmatpush2.msra.mxu0 %v4818_v15  ;;  %3707 = vmatprep.subr.mxu1 %v4405_v0  ;;  %v1618_v54 = vadd.f32 %v1554_v37, %v491_v35  ;;  %v552_v4 = vld [vmem:[%s4647_s12 + $0x4f0] sm:$0xff]  ;;  %v1745_v10 = vld [vmem:[%s4657_s29 + $0x38] sm:$0xff]  ;;  %v503_v12 = vld [vmem:[%s4647_s12 + $0x368] sm:$0xff]  ;;  %v1178_v63 = vadd.f32 %v1114_v56, %v572_v62 }
  0xf0   : > { %1903 = vmatprep.subr.mxu0 %v4405_v0  ;;  %3739 = vmatpush2.msra.mxu1 %v4818_v15  ;;  %v1365_v15 = vadd.f32 %v1301_v20, %v520_v23  ;;  %v513_v13 = vld [vmem:[%s4647_s12 + $0x3b8] sm:$0xff]  ;;  %v592_v21 = vld [vmem:[%s4647_s12 + $0x630] sm:$0xff]  ;;  %v523_v23 = vld [vmem:[%s4647_s12 + $0x408] sm:$0xff] }
  0xf1   : > { %1904 = vmatpush2.msra.mxu0 %v4829_v36  ;;  %3708 = vmatprep.subr.mxu1 %v4405_v0  ;;  %v1682_v11 = vadd.f32 %v1618_v54, %v492_v53  ;;  %v553_v27 = vld [vmem:[%s4647_s12 + $0x4f8] sm:$0xff]  ;;  %v574_v43 = vld [vmem:[%s4647_s12 + $0x5a0] sm:$0xff]  ;;  %v564_v53 = vld [vmem:[%s4647_s12 + $0x550] sm:$0xff] }
  0xf2   : > { %1906 = vmatmul.mubr.f32.vlgmr.msra.gmra.mxu0 %v1738_v41  ;;  %v1677_v41 = vadd.f32 %v1613_v17, %v437_v31  ;;  %v529_v31 = vld [vmem:[%s4647_s12 + $0x438] sm:$0xff]  ;;  %v1427_v17 = vadd.f32 %v1363_v59, %v499_v57  ;;  %3740 = vmatpush2.msra.mxu1 %v4829_v36  ;;  %v1681_v57 = vadd.f32 %v1617_v34, %v481_v33  ;;  %v1746_v33 = vld [vmem:[%s4657_s29 + $0x40] sm:$0xff]  ;;  %v1747_v54 = vld [vmem:[%s4657_s29 + $0x48] sm:$0xff] }
  0xf3   : > { %1910 = vmatprep.mubr.f32.mxu0 %v1675_v46  ;;  %v537_v46 = vld [vmem:[%s4647_s12 + $0x478] sm:$0xff]  ;;  %v514_v34 = vld [vmem:[%s4647_s12 + $0x3c0] sm:$0xff] }
  0xf4   : > { %v1111_v3 = vadd.f32 %v538_v47, %v537_v46  ;;  %v551_v46 = vld [vmem:[%s4647_s12 + $0x4e8] sm:$0xff]  ;;  %v1113_v47 = vadd.f32 %v560_v30, %v559_v29  ;;  %v533_v30 = vld [vmem:[%s4647_s12 + $0x458] sm:$0xff] }
  0xf5   : > { %v1240_v61 = vadd.f32 %v1176_v42, %v551_v46  ;;  %v583_v29 = vld [vmem:[%s4647_s12 + $0x5e8] sm:$0xff] }
  0xf6   : > { %1911 = vmatmul.mubr.f32.gmra.mxu0 %v1739_v2  ;;  %v1174_v2 = vadd.f32 %v1110_v45, %v528_v24  ;;  %v1175_v16 = vadd.f32 %v1111_v3, %v539_v7  ;;  %v521_v45 = vld [vmem:[%s4647_s12 + $0x3f8] sm:$0xff]  ;;  %v1177_v5 = vadd.f32 %v1113_v47, %v561_v51  ;;  %v532_v7 = vld [vmem:[%s4647_s12 + $0x450] sm:$0xff]  ;;  %v534_v51 = vld [vmem:[%s4647_s12 + $0x460] sm:$0xff] }
  0xf7   : > { %1915 = vmatprep.mubr.f32.mxu0 %v1676_v14  ;;  %v500_v14 = vld [vmem:[%s4647_s12 + $0x350] sm:$0xff]  ;;  %v1429_v1 = vadd.f32 %v1365_v15, %v521_v45  ;;  %v554_v15 = vld [vmem:[%s4647_s12 + $0x500] sm:$0xff] }
  0xf8   : > { %v1491_v39 = vadd.f32 %v1427_v17, %v500_v14  ;;  %v1239_v0 = vadd.f32 %v1175_v16, %v540_v28  ;;  %v1241_v28 = vadd.f32 %v1177_v5, %v562_v9  ;;  %v584_v47 = vld [vmem:[%s4647_s12 + $0x5f0] sm:$0xff]  ;;  %v535_v9 = vld [vmem:[%s4647_s12 + $0x468] sm:$0xff] }
  0xfa   : > { %1916 = vmatmul.mubr.f32.gmra.mxu0 %v1740_v26  ;;  %v1238_v26 = vadd.f32 %v1174_v2, %v529_v31  ;;  %v1555_v59 = vadd.f32 %v1491_v39, %v501_v38  ;;  %v1303_v3 = vadd.f32 %v1239_v0, %v541_v50  ;;  %v582_v31 = vld [vmem:[%s4647_s12 + $0x5e0] sm:$0xff]  ;;  %v604_v50 = vld [vmem:[%s4647_s12 + $0x690] sm:$0xff] }
  0xfb   : > { %1920 = vmatprep.mubr.f32.mxu0 %v1677_v41  ;;  %v1428_v41 = vadd.f32 %v1364_v19, %v510_v18  ;;  %v1304_v18 = vadd.f32 %v1240_v61, %v552_v4  ;;  %v573_v19 = vld [vmem:[%s4647_s12 + $0x598] sm:$0xff]  ;;  %v1115_v20 = vadd.f32 %v582_v31, %v581_v6 }
  0xfc   : > { %v1302_v24 = vadd.f32 %v1238_v26, %v530_v25  ;;  %v1493_v25 = vadd.f32 %v1429_v1, %v522_v60  ;;  %v1242_v35 = vadd.f32 %v1178_v63, %v573_v19  ;;  %v575_v60 = vld [vmem:[%s4647_s12 + $0x5a8] sm:$0xff]  ;;  %v585_v61 = vld [vmem:[%s4647_s12 + $0x5f8] sm:$0xff] }
  0xfd   : > { %v1492_v36 = vadd.f32 %v1428_v41, %v511_v44  ;;  %v524_v41 = vld [vmem:[%s4647_s12 + $0x410] sm:$0xff]  ;;  %v1368_v42 = vadd.f32 %v1304_v18, %v553_v27  ;;  %v1179_v49 = vadd.f32 %v1115_v20, %v583_v29  ;;  %v594_v44 = vld [vmem:[%s4647_s12 + $0x640] sm:$0xff]  ;;  %v595_v1 = vld [vmem:[%s4647_s12 + $0x648] sm:$0xff] }
  0xfe   : > { %1921 = vmatmul.mubr.f32.gmra.mxu0 %v1741_v48  ;;  %v531_v48 = vld [vmem:[%s4647_s12 + $0x448] sm:$0xff]  ;;  %v1557_v45 = vadd.f32 %v1493_v25, %v523_v23  ;;  %v1306_v56 = vadd.f32 %v1242_v35, %v574_v43  ;;  %v605_v31 = vld [vmem:[%s4647_s12 + $0x698] sm:$0xff]  ;;  %v556_v18 = vld [vmem:[%s4647_s12 + $0x510] sm:$0xff] }
  0xff   : > { %1925 = vmatprep.mubr.f32.mxu0 %v1678_v55  ;;  %v502_v55 = vld [vmem:[%s4647_s12 + $0x360] sm:$0xff]  ;;  %v1366_v2 = vadd.f32 %v1302_v24, %v531_v48  ;;  %v1556_v17 = vadd.f32 %v1492_v36, %v512_v58  ;;  %v603_v48 = vld [vmem:[%s4647_s12 + $0x688] sm:$0xff]  ;;  %v525_v58 = vld [vmem:[%s4647_s12 + $0x418] sm:$0xff]  ;;  %v1432_v36 = vadd.f32 %v1368_v42, %v554_v15  ;;  %v1243_v62 = vadd.f32 %v1179_v49, %v584_v47 }
 0x100   : > { %v1619_v14 = vadd.f32 %v1555_v59, %v502_v55  ;;  %v555_v55 = vld [vmem:[%s4647_s12 + $0x508] sm:$0xff]  ;;  %v576_v20 = vld [vmem:[%s4647_s12 + $0x5b0] sm:$0xff]  ;;  %v586_v29 = vld [vmem:[%s4647_s12 + $0x600] sm:$0xff] }
 0x101   : > { %v1430_v26 = vadd.f32 %v1366_v2, %v532_v7  ;;  %v1620_v39 = vadd.f32 %v1556_v17, %v513_v13  ;;  %v1117_v2 = vadd.f32 %v604_v50, %v603_v48  ;;  %v614_v7 = vld [vmem:[%s4647_s12 + $0x6e0] sm:$0xff]  ;;  %v1370_v13 = vadd.f32 %v1306_v56, %v575_v60  ;;  %v1749_v35 = vld [vmem:[%s4657_s29 + $0x58] sm:$0xff]  ;;  %v567_v42 = vld [vmem:[%s4647_s12 + $0x568] sm:$0xff] }
 0x102   : > { %1926 = vmatmul.mubr.f32.gmra.mxu0 %v1742_v8  ;;  %v542_v8 = vld [vmem:[%s4647_s12 + $0x4a0] sm:$0xff]  ;;  %v1683_v38 = vadd.f32 %v1619_v14, %v503_v12  ;;  %v1748_v12 = vld [vmem:[%s4657_s29 + $0x50] sm:$0xff]  ;;  %v1496_v19 = vadd.f32 %v1432_v36, %v555_v55  ;;  %v577_v43 = vld [vmem:[%s4647_s12 + $0x5b8] sm:$0xff] }
 0x103   : > { %1930 = vmatprep.mubr.f32.mxu0 %v1679_v22  ;;  %v593_v22 = vld [vmem:[%s4647_s12 + $0x638] sm:$0xff]  ;;  %v1367_v16 = vadd.f32 %v1303_v3, %v542_v8  ;;  %v1494_v24 = vadd.f32 %v1430_v26, %v533_v30  ;;  %v1684_v59 = vadd.f32 %v1620_v39, %v514_v34  ;;  %v1621_v3 = vadd.f32 %v1557_v45, %v524_v41  ;;  %v615_v8 = vld [vmem:[%s4647_s12 + $0x6e8] sm:$0xff]  ;;  %v536_v14 = vld [vmem:[%s4647_s12 + $0x470] sm:$0xff] }
 0x104   : > { %v1116_v37 = vadd.f32 %v593_v22, %v592_v21  ;;  %v546_v17 = vld [vmem:[%s4647_s12 + $0x4c0] sm:$0xff]  ;;  %v1307_v21 = vadd.f32 %v1243_v62, %v585_v61  ;;  %v596_v22 = vld [vmem:[%s4647_s12 + $0x650] sm:$0xff]  ;;  %v1181_v23 = vadd.f32 %v1117_v2, %v605_v31  ;;  %v1118_v25 = vadd.f32 %v615_v8, %v614_v7  ;;  %v547_v41 = vld [vmem:[%s4647_s12 + $0x4c8] sm:$0xff] }
 0x105   : > { %v1558_v4 = vadd.f32 %v1494_v24, %v534_v51  ;;  %v1685_v26 = vadd.f32 %v1621_v3, %v525_v58  ;;  %v606_v30 = vld [vmem:[%s4647_s12 + $0x6a0] sm:$0xff]  ;;  %v1560_v15 = vadd.f32 %v1496_v19, %v556_v18  ;;  %v587_v48 = vld [vmem:[%s4647_s12 + $0x608] sm:$0xff]  ;;  %v617_v51 = vld [vmem:[%s4647_s12 + $0x6f8] sm:$0xff] }
 0x106   : > { %1931 = vmatmul.mubr.f32.gmra.mxu0 %v1743_v32  ;;  %v543_v32 = vld [vmem:[%s4647_s12 + $0x4a8] sm:$0xff]  ;;  %v626_v34 = vld [vmem:[%s4647_s12 + $0x740] sm:$0xff]  ;;  %v1371_v49 = vadd.f32 %v1307_v21, %v586_v29  ;;  %v1245_v45 = vadd.f32 %v1181_v23, %v606_v30  ;;  %v637_v55 = vld [vmem:[%s4647_s12 + $0x798] sm:$0xff] }
 0x107   : > { %1935 = vmatprep.mubr.f32.mxu0 %v1680_v40  ;;  %v563_v40 = vld [vmem:[%s4647_s12 + $0x548] sm:$0xff]  ;;  %v1431_v0 = vadd.f32 %v1367_v16, %v543_v32  ;;  %v1622_v16 = vadd.f32 %v1558_v4, %v535_v9  ;;  %v616_v32 = vld [vmem:[%s4647_s12 + $0x6f0] sm:$0xff]  ;;  %v1750_v56 = vld [vmem:[%s4657_s29 + $0x60] sm:$0xff] }
 0x108   : > { %v1305_v46 = vadd.f32 %v1241_v28, %v563_v40  ;;  %v566_v40 = vld [vmem:[%s4647_s12 + $0x560] sm:$0xff]  ;;  %v1182_v24 = vadd.f32 %v1118_v25, %v616_v32  ;;  %v607_v50 = vld [vmem:[%s4647_s12 + $0x6a8] sm:$0xff]  ;;  %v568_v60 = vld [vmem:[%s4647_s12 + $0x570] sm:$0xff] }
 0x109   : > { %v578_v61 = vld [vmem:[%s4647_s12 + $0x5c0] sm:$0xff]  ;;  %v588_v62 = vld [vmem:[%s4647_s12 + $0x610] sm:$0xff]  ;;  %v1309_v3 = vadd.f32 %v1245_v45, %v607_v50  ;;  %v589_v21 = vld [vmem:[%s4647_s12 + $0x618] sm:$0xff] }
 0x10a   : > { %1936 = vmatmul.mubr.f32.gmra.mxu0 %v1744_v52  ;;  %v544_v52 = vld [vmem:[%s4647_s12 + $0x4b0] sm:$0xff]  ;;  %v1369_v6 = vadd.f32 %v1305_v46, %v564_v53  ;;  %v627_v53 = vld [vmem:[%s4647_s12 + $0x748] sm:$0xff]  ;;  %v598_v2 = vld [vmem:[%s4647_s12 + $0x660] sm:$0xff]  ;;  %v1246_v4 = vadd.f32 %v1182_v24, %v617_v51 }
 0x10b   : > { %1940 = vmatprep.mubr.f32.mxu0 %v1681_v57  ;;  %v1180_v57 = vadd.f32 %v1116_v37, %v594_v44  ;;  %v1495_v5 = vadd.f32 %v1431_v0, %v544_v52  ;;  %v557_v37 = vld [vmem:[%s4647_s12 + $0x518] sm:$0xff]  ;;  %v1686_v0 = vadd.f32 %v1622_v16, %v536_v14  ;;  %v608_v31 = vld [vmem:[%s4647_s12 + $0x6b0] sm:$0xff]  ;;  %v618_v7 = vld [vmem:[%s4647_s12 + $0x700] sm:$0xff] }
 0x10c   : > { %v597_v44 = vld [vmem:[%s4647_s12 + $0x658] sm:$0xff]  ;;  %v1624_v36 = vadd.f32 %v1560_v15, %v557_v37  ;;  %v628_v8 = vld [vmem:[%s4647_s12 + $0x750] sm:$0xff]  ;;  %v579_v14 = vld [vmem:[%s4647_s12 + $0x5c8] sm:$0xff]  ;;  %v1310_v16 = vadd.f32 %v1246_v4, %v618_v7 }
 0x10d   : > { %v1244_v63 = vadd.f32 %v1180_v57, %v595_v1  ;;  %v558_v57 = vld [vmem:[%s4647_s12 + $0x520] sm:$0xff]  ;;  %v1435_v1 = vadd.f32 %v1371_v49, %v587_v48  ;;  %v599_v23 = vld [vmem:[%s4647_s12 + $0x668] sm:$0xff]  ;;  %v609_v25 = vld [vmem:[%s4647_s12 + $0x6b8] sm:$0xff] }
 0x10e   : > { %1941 = vmatmul.mubr.f32.gmra.mxu0 %v1745_v10  ;;  %v545_v10 = vld [vmem:[%s4647_s12 + $0x4b8] sm:$0xff]  ;;  %v1688_v19 = vadd.f32 %v1624_v36, %v558_v57  ;;  %v590_v15 = vld [vmem:[%s4647_s12 + $0x620] sm:$0xff]  ;;  %v600_v49 = vld [vmem:[%s4647_s12 + $0x670] sm:$0xff] }
 0x10f   : > { %1945 = vmatprep.mubr.f32.mxu0 %v1682_v11  ;;  %v565_v11 = vld [vmem:[%s4647_s12 + $0x558] sm:$0xff]  ;;  %v1559_v27 = vadd.f32 %v1495_v5, %v545_v10  ;;  %v1308_v39 = vadd.f32 %v1244_v63, %v596_v22  ;;  %v1751_v63 = vld [vmem:[%s4657_s29 + $0x68] sm:$0xff]  ;;  %v1499_v22 = vadd.f32 %v1435_v1, %v588_v62  ;;  %v620_v24 = vld [vmem:[%s4647_s12 + $0x710] sm:$0xff] }
 0x110   : > { %v1433_v28 = vadd.f32 %v1369_v6, %v565_v11  ;;  %v638_v11 = vld [vmem:[%s4647_s12 + $0x7a0] sm:$0xff]  ;;  %v649_v37 = vld [vmem:[%s4647_s12 + $0x7f8] sm:$0xff]  ;;  %v640_v51 = vld [vmem:[%s4647_s12 + $0x7b0] sm:$0xff] }
 0x111   : > { %v1623_v46 = vadd.f32 %v1559_v27, %v546_v17  ;;  %v1372_v58 = vadd.f32 %v1308_v39, %v597_v44  ;;  %v580_v39 = vld [vmem:[%s4647_s12 + $0x5d0] sm:$0xff]  ;;  %v610_v44 = vld [vmem:[%s4647_s12 + $0x6c0] sm:$0xff]  ;;  %v591_v36 = vld [vmem:[%s4647_s12 + $0x628] sm:$0xff] }
 0x112   : > { %1946 = vmatmul.mubr.f32.gmra.mxu0 %v1746_v33  ;;  %v625_v33 = vld [vmem:[%s4647_s12 + $0x738] sm:$0xff]  ;;  %v1497_v47 = vadd.f32 %v1433_v28, %v566_v40  ;;  %v619_v28 = vld [vmem:[%s4647_s12 + $0x708] sm:$0xff]  ;;  %v658_v40 = vld [vmem:[%s4647_s12 + $0x840] sm:$0xff] }
 0x113   : > { %1950 = vmatprep.mubr.f32.mxu0 %v1683_v38  ;;  %v1434_v38 = vadd.f32 %v1370_v13, %v576_v20  ;;  %v1119_v52 = vadd.f32 %v626_v34, %v625_v33  ;;  %v1687_v5 = vadd.f32 %v1623_v46, %v547_v41  ;;  %v648_v13 = vld [vmem:[%s4647_s12 + $0x7f0] sm:$0xff]  ;;  %v1436_v18 = vadd.f32 %v1372_v58, %v598_v2  ;;  %v569_v20 = vld [vmem:[%s4647_s12 + $0x578] sm:$0xff]  ;;  %v659_v33 = vld [vmem:[%s4647_s12 + $0x848] sm:$0xff] }
 0x114   : > { %v1561_v6 = vadd.f32 %v1497_v47, %v567_v42  ;;  %v629_v34 = vld [vmem:[%s4647_s12 + $0x758] sm:$0xff]  ;;  %v1122_v46 = vadd.f32 %v659_v33, %v658_v40  ;;  %v630_v48 = vld [vmem:[%s4647_s12 + $0x760] sm:$0xff]  ;;  %v611_v1 = vld [vmem:[%s4647_s12 + $0x6c8] sm:$0xff] }
 0x115   : > { %v1183_v9 = vadd.f32 %v1119_v52, %v627_v53  ;;  %v1500_v42 = vadd.f32 %v1436_v18, %v599_v23  ;;  %v670_v57 = vld [vmem:[%s4647_s12 + $0x8a0] sm:$0xff]  ;;  %v631_v7 = vld [vmem:[%s4647_s12 + $0x768] sm:$0xff] }
 0x116   : > { %1951 = vmatmul.mubr.f32.gmra.mxu0 %v1747_v54  ;;  %v636_v54 = vld [vmem:[%s4647_s12 + $0x790] sm:$0xff]  ;;  %v1625_v27 = vadd.f32 %v1561_v6, %v568_v60  ;;  %v601_v60 = vld [vmem:[%s4647_s12 + $0x678] sm:$0xff]  ;;  %v602_v18 = vld [vmem:[%s4647_s12 + $0x680] sm:$0xff] }
 0x117   : > { %1955 = vmatprep.mubr.f32.mxu0 %v1684_v59  ;;  %v1498_v59 = vadd.f32 %v1434_v38, %v577_v43  ;;  %v1120_v10 = vadd.f32 %v637_v55, %v636_v54  ;;  %v1247_v29 = vadd.f32 %v1183_v9, %v628_v8  ;;  %v1752_v38 = vld [vmem:[%s4657_s29 + $0x70] sm:$0xff]  ;;  %v1563_v43 = vadd.f32 %v1499_v22, %v589_v21  ;;  %v650_v55 = vld [vmem:[%s4647_s12 + $0x800] sm:$0xff]  ;;  %v681_v6 = vld [vmem:[%s4647_s12 + $0x8f8] sm:$0xff] }
 0x118   : > { %v1689_v47 = vadd.f32 %v1625_v27, %v569_v20  ;;  %v660_v54 = vld [vmem:[%s4647_s12 + $0x850] sm:$0xff]  ;;  %v662_v40 = vld [vmem:[%s4647_s12 + $0x860] sm:$0xff] }
 0x119   : > { %v1562_v17 = vadd.f32 %v1498_v59, %v578_v61  ;;  %v1184_v30 = vadd.f32 %v1120_v10, %v638_v11  ;;  %v1311_v50 = vadd.f32 %v1247_v29, %v629_v34  ;;  %v1753_v59 = vld [vmem:[%s4657_s29 + $0x78] sm:$0xff]  ;;  %v1564_v61 = vadd.f32 %v1500_v42, %v600_v49  ;;  %v612_v20 = vld [vmem:[%s4647_s12 + $0x6d0] sm:$0xff]  ;;  %v691_v34 = vld [vmem:[%s4647_s12 + $0x948] sm:$0xff] }
 0x11a   : > { %1956 = vmatmul.mubr.f32.gmra.mxu0 %v1748_v12  ;;  %v647_v12 = vld [vmem:[%s4647_s12 + $0x7e8] sm:$0xff]  ;;  %v1627_v62 = vadd.f32 %v1563_v43, %v590_v15  ;;  %v1186_v4 = vadd.f32 %v1122_v46, %v660_v54  ;;  %v661_v11 = vld [vmem:[%s4647_s12 + $0x858] sm:$0xff]  ;;  %v702_v43 = vld [vmem:[%s4647_s12 + $0x9a0] sm:$0xff] }
 0x11b   : > { %1960 = vmatprep.mubr.f32.mxu0 %v1685_v26  ;;  %v1373_v26 = vadd.f32 %v1309_v3, %v608_v31  ;;  %v1121_v32 = vadd.f32 %v648_v13, %v647_v12  ;;  %v1626_v41 = vadd.f32 %v1562_v17, %v579_v14  ;;  %v621_v31 = vld [vmem:[%s4647_s12 + $0x718] sm:$0xff]  ;;  %v1375_v8 = vadd.f32 %v1311_v50, %v630_v48  ;;  %v671_v14 = vld [vmem:[%s4647_s12 + $0x8a8] sm:$0xff]  ;;  %v1754_v17 = vld [vmem:[%s4657_s29 + $0x80] sm:$0xff] }
 0x11c   : > { %v641_v13 = vld [vmem:[%s4647_s12 + $0x7b8] sm:$0xff]  ;;  %v1691_v22 = vadd.f32 %v1627_v62, %v591_v36  ;;  %v1250_v27 = vadd.f32 %v1186_v4, %v661_v11  ;;  %v703_v49 = vld [vmem:[%s4647_s12 + $0x9a8] sm:$0xff]  ;;  %v624_v4 = vld [vmem:[%s4647_s12 + $0x730] sm:$0xff] }
 0x11d   : > { %v1437_v45 = vadd.f32 %v1373_v26, %v609_v25  ;;  %v1185_v53 = vadd.f32 %v1121_v32, %v649_v37  ;;  %v1690_v58 = vadd.f32 %v1626_v41, %v580_v39  ;;  %v622_v25 = vld [vmem:[%s4647_s12 + $0x720] sm:$0xff]  ;;  %v1439_v29 = vadd.f32 %v1375_v8, %v631_v7  ;;  %v672_v39 = vld [vmem:[%s4647_s12 + $0x8b0] sm:$0xff]  ;;  %v1755_v41 = vld [vmem:[%s4657_s29 + $0x88] sm:$0xff] }
 0x11e   : > { %1961 = vmatmul.mubr.f32.gmra.mxu0 %v1749_v35  ;;  %v639_v35 = vld [vmem:[%s4647_s12 + $0x7a8] sm:$0xff]  ;;  %v642_v37 = vld [vmem:[%s4647_s12 + $0x7c0] sm:$0xff]  ;;  %v1314_v46 = vadd.f32 %v1250_v27, %v662_v40  ;;  %v633_v50 = vld [vmem:[%s4647_s12 + $0x778] sm:$0xff]  ;;  %v1126_v36 = vadd.f32 %v703_v49, %v702_v43 }
 0x11f   : > { %1965 = vmatprep.mubr.f32.mxu0 %v1686_v0  ;;  %v1374_v0 = vadd.f32 %v1310_v16, %v619_v28  ;;  %v1248_v52 = vadd.f32 %v1184_v30, %v639_v35  ;;  %v1501_v2 = vadd.f32 %v1437_v45, %v610_v44  ;;  %v1249_v10 = vadd.f32 %v1185_v53, %v650_v55  ;;  %v632_v16 = vld [vmem:[%s4647_s12 + $0x770] sm:$0xff]  ;;  %v682_v28 = vld [vmem:[%s4647_s12 + $0x900] sm:$0xff]  ;;  %v613_v44 = vld [vmem:[%s4647_s12 + $0x6d8] sm:$0xff] }
 0x120   : > { %v692_v35 = vld [vmem:[%s4647_s12 + $0x950] sm:$0xff]  ;;  %v663_v54 = vld [vmem:[%s4647_s12 + $0x868] sm:$0xff]  ;;  %v713_v62 = vld [vmem:[%s4647_s12 + $0x9f8] sm:$0xff] }
 0x121   : > { %v1438_v3 = vadd.f32 %v1374_v0, %v620_v24  ;;  %v1312_v9 = vadd.f32 %v1248_v52, %v640_v51  ;;  %v1565_v23 = vadd.f32 %v1501_v2, %v611_v1  ;;  %v623_v24 = vld [vmem:[%s4647_s12 + $0x728] sm:$0xff]  ;;  %v1125_v48 = vadd.f32 %v692_v35, %v691_v34  ;;  %v714_v1 = vld [vmem:[%s4647_s12 + $0xa00] sm:$0xff]  ;;  %v1756_v2 = vld [vmem:[%s4657_s29 + $0x90] sm:$0xff] }
 0x122   : > { %1966 = vmatmul.mubr.f32.gmra.mxu0 %v1750_v56  ;;  %v669_v56 = vld [vmem:[%s4647_s12 + $0x898] sm:$0xff]  ;;  %v1503_v51 = vadd.f32 %v1439_v29, %v632_v16  ;;  %v634_v8 = vld [vmem:[%s4647_s12 + $0x780] sm:$0xff]  ;;  %v724_v29 = vld [vmem:[%s4647_s12 + $0xa50] sm:$0xff] }
 0x123   : > { %1970 = vmatprep.mubr.f32.mxu0 %v1687_v5  ;;  %v680_v5 = vld [vmem:[%s4647_s12 + $0x8f0] sm:$0xff]  ;;  %v1123_v12 = vadd.f32 %v670_v57, %v669_v56  ;;  %v1502_v26 = vadd.f32 %v1438_v3, %v621_v31  ;;  %v1376_v30 = vadd.f32 %v1312_v9, %v641_v13  ;;  %v1629_v45 = vadd.f32 %v1565_v23, %v612_v20  ;;  %v693_v56 = vld [vmem:[%s4647_s12 + $0x958] sm:$0xff]  ;;  %v643_v57 = vld [vmem:[%s4647_s12 + $0x7c8] sm:$0xff] }
 0x124   : > { %v1124_v21 = vadd.f32 %v681_v6, %v680_v5  ;;  %v1378_v6 = vadd.f32 %v1314_v46, %v663_v54  ;;  %v684_v31 = vld [vmem:[%s4647_s12 + $0x910] sm:$0xff]  ;;  %v1189_v7 = vadd.f32 %v1125_v48, %v693_v56  ;;  %v1567_v9 = vadd.f32 %v1503_v51, %v633_v50  ;;  %v705_v23 = vld [vmem:[%s4647_s12 + $0x9b8] sm:$0xff]  ;;  %v1758_v49 = vld [vmem:[%s4657_s29 + $0xa0] sm:$0xff] }
 0x125   : > { %v1187_v33 = vadd.f32 %v1123_v12, %v671_v14  ;;  %v1566_v0 = vadd.f32 %v1502_v26, %v622_v25  ;;  %v1440_v52 = vadd.f32 %v1376_v30, %v642_v37  ;;  %v1693_v3 = vadd.f32 %v1629_v45, %v613_v44  ;;  %v664_v12 = vld [vmem:[%s4647_s12 + $0x870] sm:$0xff]  ;;  %v715_v25 = vld [vmem:[%s4647_s12 + $0xa08] sm:$0xff]  ;;  %v685_v27 = vld [vmem:[%s4647_s12 + $0x918] sm:$0xff] }
 0x126   : > { %1971 = vmatmul.mubr.f32.gmra.mxu0 %v1751_v63  ;;  %v651_v63 = vld [vmem:[%s4647_s12 + $0x808] sm:$0xff]  ;;  %v1188_v42 = vadd.f32 %v1124_v21, %v682_v28  ;;  %v644_v14 = vld [vmem:[%s4647_s12 + $0x7d0] sm:$0xff]  ;;  %v1127_v20 = vadd.f32 %v714_v1, %v713_v62  ;;  %v1757_v21 = vld [vmem:[%s4657_s29 + $0x98] sm:$0xff]  ;;  %v1442_v16 = vadd.f32 %v1378_v6, %v664_v12  ;;  %v1631_v40 = vadd.f32 %v1567_v9, %v634_v8 }
 0x127   : > { %1975 = vmatprep.mubr.f32.mxu0 %v1688_v19  ;;  %v1628_v19 = vadd.f32 %v1564_v61, %v601_v60  ;;  %v1313_v32 = vadd.f32 %v1249_v10, %v651_v63  ;;  %v1251_v55 = vadd.f32 %v1187_v33, %v672_v39  ;;  %v704_v61 = vld [vmem:[%s4647_s12 + $0x9b0] sm:$0xff]  ;;  %v1630_v5 = vadd.f32 %v1566_v0, %v623_v24  ;;  %v694_v63 = vld [vmem:[%s4647_s12 + $0x960] sm:$0xff]  ;;  %v725_v30 = vld [vmem:[%s4647_s12 + $0xa58] sm:$0xff] }
 0x128   : > { %v1504_v10 = vadd.f32 %v1440_v52, %v643_v57  ;;  %v1253_v28 = vadd.f32 %v1189_v7, %v694_v63  ;;  %v665_v35 = vld [vmem:[%s4647_s12 + $0x878] sm:$0xff]  ;;  %v1191_v43 = vadd.f32 %v1127_v20, %v715_v25  ;;  %v666_v44 = vld [vmem:[%s4647_s12 + $0x880] sm:$0xff]  ;;  %v716_v0 = vld [vmem:[%s4647_s12 + $0xa10] sm:$0xff]  ;;  %v1128_v46 = vadd.f32 %v725_v30, %v724_v29 }
 0x129   : > { %v1692_v15 = vadd.f32 %v1628_v19, %v602_v18  ;;  %v674_v18 = vld [vmem:[%s4647_s12 + $0x8c0] sm:$0xff]  ;;  %v1190_v19 = vadd.f32 %v1126_v36, %v704_v61  ;;  %v1694_v26 = vadd.f32 %v1630_v5, %v624_v4  ;;  %v645_v39 = vld [vmem:[%s4647_s12 + $0x7d8] sm:$0xff]  ;;  %v656_v48 = vld [vmem:[%s4647_s12 + $0x830] sm:$0xff]  ;;  %v1506_v50 = vadd.f32 %v1442_v16, %v665_v35 }
 0x12a   : > { %1976 = vmatmul.mubr.f32.gmra.mxu0 %v1752_v38  ;;  %v652_v38 = vld [vmem:[%s4647_s12 + $0x810] sm:$0xff]  ;;  %v1568_v33 = vadd.f32 %v1504_v10, %v644_v14  ;;  %v706_v24 = vld [vmem:[%s4647_s12 + $0x9c0] sm:$0xff]  ;;  %v735_v36 = vld [vmem:[%s4647_s12 + $0xaa8] sm:$0xff]  ;;  %v1255_v1 = vadd.f32 %v1191_v43, %v716_v0 }
 0x12b   : > { %1980 = vmatprep.mubr.f32.mxu0 %v1689_v47  ;;  %v683_v47 = vld [vmem:[%s4647_s12 + $0x908] sm:$0xff]  ;;  %v1377_v53 = vadd.f32 %v1313_v32, %v652_v38  ;;  %v676_v51 = vld [vmem:[%s4647_s12 + $0x8d0] sm:$0xff]  ;;  %v686_v52 = vld [vmem:[%s4647_s12 + $0x920] sm:$0xff]  ;;  %v1570_v12 = vadd.f32 %v1506_v50, %v666_v44 }
 0x12c   : > { %v1252_v60 = vadd.f32 %v1188_v42, %v683_v47  ;;  %v635_v32 = vld [vmem:[%s4647_s12 + $0x788] sm:$0xff]  ;;  %v1254_v42 = vadd.f32 %v1190_v19, %v705_v23  ;;  %v646_v47 = vld [vmem:[%s4647_s12 + $0x7e0] sm:$0xff]  ;;  %v1632_v56 = vadd.f32 %v1568_v33, %v645_v39  ;;  %v717_v7 = vld [vmem:[%s4647_s12 + $0xa18] sm:$0xff] }
 0x12d   : > { %v695_v38 = vld [vmem:[%s4647_s12 + $0x968] sm:$0xff]  ;;  %v726_v54 = vld [vmem:[%s4647_s12 + $0xa60] sm:$0xff]  ;;  %v924_v9 = vld [vmem:[%s4647_s12 + $0x1090] sm:$0xff]  ;;  %v1319_v29 = vadd.f32 %v1255_v1, %v717_v7 }
 0x12e   : > { %1981 = vmatmul.mubr.f32.gmra.mxu0 %v1753_v59  ;;  %v653_v59 = vld [vmem:[%s4647_s12 + $0x818] sm:$0xff]  ;;  %v687_v61 = vld [vmem:[%s4647_s12 + $0x928] sm:$0xff]  ;;  %v1318_v62 = vadd.f32 %v1254_v42, %v706_v24  ;;  %v1192_v8 = vadd.f32 %v1128_v46, %v726_v54  ;;  %v1696_v19 = vadd.f32 %v1632_v56, %v646_v47  ;;  %v746_v23 = vld [vmem:[%s4647_s12 + $0xb00] sm:$0xff] }
 0x12f   : > { %1985 = vmatprep.mubr.f32.mxu0 %v1690_v58  ;;  %v673_v58 = vld [vmem:[%s4647_s12 + $0x8b8] sm:$0xff]  ;;  %v1441_v11 = vadd.f32 %v1377_v53, %v653_v59  ;;  %v1317_v53 = vadd.f32 %v1253_v28, %v695_v38  ;;  %v1759_v4 = vld [vmem:[%s4657_s29 + $0xa8] sm:$0xff]  ;;  %v926_v30 = vld [vmem:[%s4647_s12 + $0x10a0] sm:$0xff] }
 0x130   : > { %v1315_v13 = vadd.f32 %v1251_v55, %v673_v58  ;;  %v1695_v55 = vadd.f32 %v1631_v40, %v635_v32  ;;  %v696_v58 = vld [vmem:[%s4647_s12 + $0x970] sm:$0xff]  ;;  %v667_v5 = vld [vmem:[%s4647_s12 + $0x888] sm:$0xff]  ;;  %v677_v16 = vld [vmem:[%s4647_s12 + $0x8d8] sm:$0xff] }
 0x131   : > { %v1381_v63 = vadd.f32 %v1317_v53, %v696_v58  ;;  %v727_v14 = vld [vmem:[%s4647_s12 + $0xa68] sm:$0xff]  ;;  %v1760_v32 = vld [vmem:[%s4657_s29 + $0xb0] sm:$0xff]  ;;  %v933_v56 = vld [vmem:[%s4647_s12 + $0x10d8] sm:$0xff] }
 0x132   : > { %1986 = vmatmul.mubr.f32.gmra.mxu0 %v1754_v17  ;;  %v654_v17 = vld [vmem:[%s4647_s12 + $0x820] sm:$0xff]  ;;  %v1379_v37 = vadd.f32 %v1315_v13, %v674_v18  ;;  %v697_v13 = vld [vmem:[%s4647_s12 + $0x978] sm:$0xff]  ;;  %v747_v25 = vld [vmem:[%s4647_s12 + $0xb08] sm:$0xff]  ;;  %v1256_v38 = vadd.f32 %v1192_v8, %v727_v14 }
 0x133   : > { %1990 = vmatprep.mubr.f32.mxu0 %v1691_v22  ;;  %v1316_v22 = vadd.f32 %v1252_v60, %v684_v31  ;;  %v1505_v34 = vadd.f32 %v1441_v11, %v654_v17  ;;  %v736_v60 = vld [vmem:[%s4647_s12 + $0xab0] sm:$0xff]  ;;  %v707_v31 = vld [vmem:[%s4647_s12 + $0x9c8] sm:$0xff]  ;;  %v657_v11 = vld [vmem:[%s4647_s12 + $0x838] sm:$0xff]  ;;  %v1445_v42 = vadd.f32 %v1381_v63, %v697_v13 }
 0x134   : > { %v1129_v17 = vadd.f32 %v736_v60, %v735_v36  ;;  %v925_v18 = vld [vmem:[%s4647_s12 + $0x1098] sm:$0xff]  ;;  %v1382_v28 = vadd.f32 %v1318_v62, %v707_v31  ;;  %v668_v40 = vld [vmem:[%s4647_s12 + $0x890] sm:$0xff]  ;;  %v927_v24 = vld [vmem:[%s4647_s12 + $0x10a8] sm:$0xff] }
 0x135   : > { %v1380_v45 = vadd.f32 %v1316_v22, %v685_v27  ;;  %v737_v22 = vld [vmem:[%s4647_s12 + $0xab8] sm:$0xff]  ;;  %v688_v27 = vld [vmem:[%s4647_s12 + $0x930] sm:$0xff]  ;;  %v699_v36 = vld [vmem:[%s4647_s12 + $0x988] sm:$0xff] }
 0x136   : > { %1991 = vmatmul.mubr.f32.gmra.mxu0 %v1755_v41  ;;  %v655_v41 = vld [vmem:[%s4647_s12 + $0x828] sm:$0xff]  ;;  %v708_v35 = vld [vmem:[%s4647_s12 + $0x9d0] sm:$0xff]  ;;  %v1193_v44 = vadd.f32 %v1129_v17, %v737_v22  ;;  %v709_v60 = vld [vmem:[%s4647_s12 + $0x9d8] sm:$0xff] }
 0x137   : > { %1995 = vmatprep.mubr.f32.mxu0 %v1692_v15  ;;  %v675_v15 = vld [vmem:[%s4647_s12 + $0x8c8] sm:$0xff]  ;;  %v1569_v57 = vadd.f32 %v1505_v34, %v655_v41  ;;  %v1444_v6 = vadd.f32 %v1380_v45, %v686_v52  ;;  %v698_v34 = vld [vmem:[%s4647_s12 + $0x980] sm:$0xff]  ;;  %v1634_v41 = vadd.f32 %v1570_v12, %v667_v5  ;;  %v728_v43 = vld [vmem:[%s4647_s12 + $0xa70] sm:$0xff]  ;;  %v1130_v45 = vadd.f32 %v747_v25, %v746_v23 }
 0x138   : > { %v1443_v59 = vadd.f32 %v1379_v37, %v675_v15  ;;  %v718_v37 = vld [vmem:[%s4647_s12 + $0xa20] sm:$0xff]  ;;  %v748_v47 = vld [vmem:[%s4647_s12 + $0xb10] sm:$0xff]  ;;  %v689_v52 = vld [vmem:[%s4647_s12 + $0x938] sm:$0xff]  ;;  %v1446_v53 = vadd.f32 %v1382_v28, %v708_v35  ;;  %v1320_v62 = vadd.f32 %v1256_v38, %v728_v43 }
 0x139   : > { %v1633_v20 = vadd.f32 %v1569_v57, %v656_v48  ;;  %v1508_v33 = vadd.f32 %v1444_v6, %v687_v61  ;;  %v678_v15 = vld [vmem:[%s4647_s12 + $0x8e0] sm:$0xff]  ;;  %v928_v48 = vld [vmem:[%s4647_s12 + $0x10b0] sm:$0xff]  ;;  %v1383_v54 = vadd.f32 %v1319_v29, %v718_v37  ;;  %v719_v61 = vld [vmem:[%s4647_s12 + $0xa28] sm:$0xff]  ;;  %v1509_v6 = vadd.f32 %v1445_v42, %v698_v34 }
 0x13a   : > { %1996 = vmatmul.mubr.f32.gmra.mxu0 %v1756_v2  ;;  %v922_v2 = vld [vmem:[%s4647_s12 + $0x1080] sm:$0xff]  ;;  %v679_v5 = vld [vmem:[%s4647_s12 + $0x8e8] sm:$0xff]  ;;  %v729_v31 = vld [vmem:[%s4647_s12 + $0xa78] sm:$0xff]  ;;  %v1194_v8 = vadd.f32 %v1130_v45, %v748_v47 }
 0x13b   : > { %2000 = vmatprep.mubr.f32.mxu0 %v1693_v3  ;;  %v923_v3 = vld [vmem:[%s4647_s12 + $0x1088] sm:$0xff]  ;;  %v1697_v0 = vadd.f32 %v1633_v20, %v657_v11  ;;  %v934_v57 = vld [vmem:[%s4647_s12 + $0x10e0] sm:$0xff]  ;;  %v1572_v58 = vadd.f32 %v1508_v33, %v688_v27  ;;  %v720_v13 = vld [vmem:[%s4647_s12 + $0xa30] sm:$0xff]  ;;  %v1447_v22 = vadd.f32 %v1383_v54, %v719_v61  ;;  %v1573_v37 = vadd.f32 %v1509_v6, %v699_v36 }
 0x13c   : > { %v1146_v10 = vadd.f32 %v923_v3, %v922_v2  ;;  %v935_v2 = vld [vmem:[%s4647_s12 + $0x10e8] sm:$0xff]  ;;  %v1147_v3 = vadd.f32 %v934_v57, %v933_v56  ;;  %v710_v12 = vld [vmem:[%s4647_s12 + $0x9e0] sm:$0xff]  ;;  %v749_v14 = vld [vmem:[%s4647_s12 + $0xb18] sm:$0xff] }
 0x13d   : > { %v739_v63 = vld [vmem:[%s4647_s12 + $0xac8] sm:$0xff]  ;;  %v930_v17 = vld [vmem:[%s4647_s12 + $0x10c0] sm:$0xff]  ;;  %v937_v25 = vld [vmem:[%s4647_s12 + $0x10f8] sm:$0xff]  ;;  %v1636_v28 = vadd.f32 %v1572_v58, %v689_v52  ;;  %v1511_v52 = vadd.f32 %v1447_v22, %v720_v13 }
 0x13e   : > { %2001 = vmatmul.mubr.f32.gmra.mxu0 %v1757_v21  ;;  %v1507_v21 = vadd.f32 %v1443_v59, %v676_v51  ;;  %v757_v51 = vld [vmem:[%s4647_s12 + $0xb58] sm:$0xff]  ;;  %v1211_v20 = vadd.f32 %v1147_v3, %v935_v2  ;;  %v759_v23 = vld [vmem:[%s4647_s12 + $0xb68] sm:$0xff]  ;;  %v690_v27 = vld [vmem:[%s4647_s12 + $0x940] sm:$0xff] }
 0x13f   : > { %2005 = vmatprep.mubr.f32.mxu0 %v1694_v26  ;;  %v1210_v26 = vadd.f32 %v1146_v10, %v924_v9  ;;  %v1761_v59 = vld [vmem:[%s4657_s29 + $0xb8] sm:$0xff]  ;;  %v936_v10 = vld [vmem:[%s4647_s12 + $0x10f0] sm:$0xff]  ;;  %v770_v35 = vld [vmem:[%s4647_s12 + $0xbc0] sm:$0xff]  ;;  %v1700_v2 = vadd.f32 %v1636_v28, %v690_v27 }
 0x140   : > { %v1571_v46 = vadd.f32 %v1507_v21, %v677_v16  ;;  %v929_v9 = vld [vmem:[%s4647_s12 + $0x10b8] sm:$0xff]  ;;  %v1510_v21 = vadd.f32 %v1446_v53, %v709_v60  ;;  %v1762_v16 = vld [vmem:[%s4657_s29 + $0xc0] sm:$0xff]  ;;  %v700_v29 = vld [vmem:[%s4647_s12 + $0x990] sm:$0xff]  ;;  %v1275_v33 = vadd.f32 %v1211_v20, %v936_v10 }
 0x141   : > { %v1274_v39 = vadd.f32 %v1210_v26, %v925_v18  ;;  %v768_v26 = vld [vmem:[%s4647_s12 + $0xbb0] sm:$0xff]  ;;  %v769_v34 = vld [vmem:[%s4647_s12 + $0xbb8] sm:$0xff]  ;;  %v938_v42 = vld [vmem:[%s4647_s12 + $0x1100] sm:$0xff] }
 0x142   : > { %2006 = vmatmul.mubr.f32.gmra.mxu0 %v1758_v49  ;;  %v738_v49 = vld [vmem:[%s4647_s12 + $0xac0] sm:$0xff]  ;;  %v1635_v11 = vadd.f32 %v1571_v46, %v678_v15  ;;  %v740_v38 = vld [vmem:[%s4647_s12 + $0xad0] sm:$0xff]  ;;  %v931_v15 = vld [vmem:[%s4647_s12 + $0x10c8] sm:$0xff]  ;;  %v1132_v43 = vadd.f32 %v769_v34, %v768_v26 }
 0x143   : > { %2010 = vmatprep.mubr.f32.mxu0 %v1695_v55  ;;  %v1338_v50 = vadd.f32 %v1274_v39, %v926_v30  ;;  %v758_v55 = vld [vmem:[%s4647_s12 + $0xb60] sm:$0xff]  ;;  %v1257_v7 = vadd.f32 %v1193_v44, %v738_v49  ;;  %v711_v44 = vld [vmem:[%s4647_s12 + $0x9e8] sm:$0xff]  ;;  %v760_v46 = vld [vmem:[%s4647_s12 + $0xb70] sm:$0xff] }
 0x144   : > { %v730_v30 = vld [vmem:[%s4647_s12 + $0xa80] sm:$0xff]  ;;  %v1699_v49 = vadd.f32 %v1635_v11, %v679_v5  ;;  %v939_v53 = vld [vmem:[%s4647_s12 + $0x1108] sm:$0xff]  ;;  %v1196_v54 = vadd.f32 %v1132_v43, %v770_v35  ;;  %v945_v56 = vld [vmem:[%s4647_s12 + $0x1138] sm:$0xff] }
 0x145   : > { %v1402_v1 = vadd.f32 %v1338_v50, %v927_v24  ;;  %v1321_v39 = vadd.f32 %v1257_v7, %v739_v63  ;;  %v750_v45 = vld [vmem:[%s4647_s12 + $0xb20] sm:$0xff]  ;;  %v932_v24 = vld [vmem:[%s4647_s12 + $0x10d0] sm:$0xff]  ;;  %v1574_v50 = vadd.f32 %v1510_v21, %v710_v12  ;;  %v1763_v57 = vld [vmem:[%s4657_s29 + $0xc8] sm:$0xff] }
 0x146   : > { %2011 = vmatmul.mubr.f32.gmra.mxu0 %v1759_v4  ;;  %v1698_v4 = vadd.f32 %v1634_v41, %v668_v40  ;;  %v1258_v41 = vadd.f32 %v1194_v8, %v749_v14  ;;  %v771_v61 = vld [vmem:[%s4647_s12 + $0xbc8] sm:$0xff]  ;;  %v701_v3 = vld [vmem:[%s4647_s12 + $0x998] sm:$0xff]  ;;  %v940_v7 = vld [vmem:[%s4647_s12 + $0x1110] sm:$0xff] }
 0x147   : > { %2015 = vmatprep.mubr.f32.mxu0 %v1696_v19  ;;  %v1466_v18 = vadd.f32 %v1402_v1, %v928_v48  ;;  %v1131_v19 = vadd.f32 %v758_v55, %v757_v51  ;;  %v1339_v48 = vadd.f32 %v1275_v33, %v937_v25  ;;  %v721_v51 = vld [vmem:[%s4647_s12 + $0xa38] sm:$0xff]  ;;  %v944_v55 = vld [vmem:[%s4647_s12 + $0x1130] sm:$0xff]  ;;  %v1385_v6 = vadd.f32 %v1321_v39, %v740_v38  ;;  %v947_v8 = vld [vmem:[%s4647_s12 + $0x1148] sm:$0xff] }
 0x148   : > { %v1148_v1 = vadd.f32 %v945_v56, %v944_v55  ;;  %v741_v5 = vld [vmem:[%s4647_s12 + $0xad8] sm:$0xff]  ;;  %v751_v10 = vld [vmem:[%s4647_s12 + $0xb28] sm:$0xff]  ;;  %v1786_v12 = vld [vmem:[%s4657_s29 + $0x180] sm:$0xff]  ;;  %v1260_v21 = vadd.f32 %v1196_v54, %v771_v61 }
 0x149   : > { %v1530_v40 = vadd.f32 %v1466_v18, %v929_v9  ;;  %v1195_v47 = vadd.f32 %v1131_v19, %v759_v23  ;;  %v1403_v60 = vadd.f32 %v1339_v48, %v938_v42  ;;  %v712_v9 = vld [vmem:[%s4647_s12 + $0x9f0] sm:$0xff]  ;;  %v761_v13 = vld [vmem:[%s4647_s12 + $0xb78] sm:$0xff]  ;;  %v1638_v18 = vadd.f32 %v1574_v50, %v711_v44  ;;  %v779_v23 = vld [vmem:[%s4647_s12 + $0xc08] sm:$0xff] }
 0x14a   : > { %2016 = vmatmul.mubr.f32.gmra.mxu0 %v1760_v32  ;;  %v1384_v32 = vadd.f32 %v1320_v62, %v729_v31  ;;  %v946_v62 = vld [vmem:[%s4647_s12 + $0x1140] sm:$0xff]  ;;  %v1322_v31 = vadd.f32 %v1258_v41, %v750_v45  ;;  %v732_v19 = vld [vmem:[%s4647_s12 + $0xa90] sm:$0xff]  ;;  %v941_v20 = vld [vmem:[%s4647_s12 + $0x1118] sm:$0xff]  ;;  %v1449_v34 = vadd.f32 %v1385_v6, %v741_v5 }
 0x14b   : > { %2020 = vmatprep.mubr.f32.mxu0 %v1697_v0  ;;  %v1594_v0 = vadd.f32 %v1530_v40, %v930_v17  ;;  %v1259_v63 = vadd.f32 %v1195_v47, %v760_v46  ;;  %v1467_v14 = vadd.f32 %v1403_v60, %v939_v53  ;;  %v1212_v17 = vadd.f32 %v1148_v1, %v946_v62  ;;  %v948_v22 = vld [vmem:[%s4647_s12 + $0x1150] sm:$0xff]  ;;  %v722_v26 = vld [vmem:[%s4647_s12 + $0xa40] sm:$0xff]  ;;  %v781_v33 = vld [vmem:[%s4647_s12 + $0xc18] sm:$0xff] }
 0x14c   : > { %v1448_v58 = vadd.f32 %v1384_v32, %v730_v30  ;;  %v1764_v25 = vld [vmem:[%s4657_s29 + $0xd0] sm:$0xff]  ;;  %v742_v28 = vld [vmem:[%s4647_s12 + $0xae0] sm:$0xff]  ;;  %v949_v39 = vld [vmem:[%s4647_s12 + $0x1158] sm:$0xff] }
 0x14d   : > { %v1658_v36 = vadd.f32 %v1594_v0, %v931_v15  ;;  %v772_v30 = vld [vmem:[%s4647_s12 + $0xbd0] sm:$0xff]  ;;  %v1276_v32 = vadd.f32 %v1212_v17, %v947_v8  ;;  %v942_v38 = vld [vmem:[%s4647_s12 + $0x1120] sm:$0xff]  ;;  %v1323_v43 = vadd.f32 %v1259_v63, %v761_v13  ;;  %v1702_v0 = vadd.f32 %v1638_v18, %v712_v9  ;;  %v733_v46 = vld [vmem:[%s4647_s12 + $0xa98] sm:$0xff] }
 0x14e   : > { %2021 = vmatmul.mubr.f32.gmra.mxu0 %v1761_v59  ;;  %v731_v59 = vld [vmem:[%s4647_s12 + $0xa88] sm:$0xff]  ;;  %v780_v40 = vld [vmem:[%s4647_s12 + $0xc10] sm:$0xff]  ;;  %v762_v42 = vld [vmem:[%s4647_s12 + $0xb80] sm:$0xff]  ;;  %v1324_v47 = vadd.f32 %v1260_v21, %v772_v30  ;;  %v1513_v62 = vadd.f32 %v1449_v34, %v742_v28 }
 0x14f   : > { %2025 = vmatprep.mubr.f32.mxu0 %v1698_v4  ;;  %v1637_v4 = vadd.f32 %v1573_v37, %v700_v29  ;;  %v1722_v11 = vadd.f32 %v1658_v36, %v932_v24  ;;  %v1512_v27 = vadd.f32 %v1448_v58, %v731_v59  ;;  %v1531_v29 = vadd.f32 %v1467_v14, %v940_v7  ;;  %v752_v35 = vld [vmem:[%s4647_s12 + $0xb30] sm:$0xff]  ;;  %v782_v24 = vld [vmem:[%s4647_s12 + $0xc20] sm:$0xff]  ;;  %v1765_v53 = vld [vmem:[%s4657_s29 + $0xd8] sm:$0xff] }
 0x150   : > { %v1386_v37 = vadd.f32 %v1322_v31, %v751_v10  ;;  %v1133_v41 = vadd.f32 %v780_v40, %v779_v23  ;;  %v1340_v45 = vadd.f32 %v1276_v32, %v948_v22  ;;  %v950_v48 = vld [vmem:[%s4647_s12 + $0x1160] sm:$0xff]  ;;  %v743_v55 = vld [vmem:[%s4647_s12 + $0xae8] sm:$0xff]  ;;  %v957_v58 = vld [vmem:[%s4647_s12 + $0x1198] sm:$0xff]  ;;  %v1387_v7 = vadd.f32 %v1323_v43, %v762_v42 }
 0x151   : > { %2145 = vmatprep.mubr.f32.mxu1 %v1722_v11  ;;  %v1701_v15 = vadd.f32 %v1637_v4, %v701_v3  ;;  %v1595_v44 = vadd.f32 %v1531_v29, %v941_v20  ;;  %v1576_v54 = vadd.f32 %v1512_v27, %v732_v19  ;;  %v723_v60 = vld [vmem:[%s4647_s12 + $0xa48] sm:$0xff]  ;;  %v958_v5 = vld [vmem:[%s4647_s12 + $0x11a0] sm:$0xff]  ;;  %v753_v6 = vld [vmem:[%s4647_s12 + $0xb38] sm:$0xff]  ;;  %v1577_v28 = vadd.f32 %v1513_v62, %v743_v55 }
 0x152   : > { %2026 = vmatmul.mubr.f32.gmra.mxu0 %v1762_v16  ;;  %v1575_v16 = vadd.f32 %v1511_v52, %v721_v51  ;;  %2146 = vmatmul.mubr.f32.vlgmr.msra.gmra.mxu1 %v1786_v12  ;;  %v1197_v50 = vadd.f32 %v1133_v41, %v781_v33  ;;  %v955_v51 = vld [vmem:[%s4647_s12 + $0x1188] sm:$0xff]  ;;  %v956_v52 = vld [vmem:[%s4647_s12 + $0x1190] sm:$0xff]  ;;  %v1404_v59 = vadd.f32 %v1340_v45, %v949_v39  ;;  %v790_v14 = vld [vmem:[%s4647_s12 + $0xc60] sm:$0xff] }
 0x153   : > { %2030 = vmatprep.mubr.f32.mxu0 %v1699_v49  ;;  %v943_v49 = vld [vmem:[%s4647_s12 + $0x1128] sm:$0xff]  ;;  %v1659_v56 = vadd.f32 %v1595_v44, %v942_v38  ;;  %v1149_v36 = vadd.f32 %v956_v52, %v955_v51  ;;  %v1450_v1 = vadd.f32 %v1386_v37, %v752_v35  ;;  %v952_v13 = vld [vmem:[%s4647_s12 + $0x1170] sm:$0xff]  ;;  %v1766_v17 = vld [vmem:[%s4657_s29 + $0xe0] sm:$0xff]  ;;  %v1640_v19 = vadd.f32 %v1576_v54, %v733_v46 }
 0x154   : > { %v1639_v61 = vadd.f32 %v1575_v16, %v722_v26  ;;  %v783_v3 = vld [vmem:[%s4647_s12 + $0xc28] sm:$0xff]  ;;  %v1261_v4 = vadd.f32 %v1197_v50, %v782_v24  ;;  %v1468_v10 = vadd.f32 %v1404_v59, %v950_v48  ;;  %v734_v18 = vld [vmem:[%s4647_s12 + $0xaa0] sm:$0xff]  ;;  %v744_v20 = vld [vmem:[%s4647_s12 + $0xaf0] sm:$0xff] }
 0x155   : > { %v763_v31 = vld [vmem:[%s4647_s12 + $0xb88] sm:$0xff]  ;;  %v1723_v8 = vadd.f32 %v1659_v56, %v943_v49  ;;  %v1213_v11 = vadd.f32 %v1149_v36, %v957_v58  ;;  %v754_v21 = vld [vmem:[%s4647_s12 + $0xb40] sm:$0xff]  ;;  %v792_v27 = vld [vmem:[%s4647_s12 + $0xc70] sm:$0xff]  ;;  %v1514_v29 = vadd.f32 %v1450_v1, %v753_v6  ;;  %v1704_v54 = vadd.f32 %v1640_v19, %v734_v18 }
 0x156   : > { %2031 = vmatmul.mubr.f32.gmra.mxu0 %v1763_v57  ;;  %v773_v57 = vld [vmem:[%s4647_s12 + $0xbd8] sm:$0xff]  ;;  %v1787_v9 = vld [vmem:[%s4657_s29 + $0x188] sm:$0xff]  ;;  %v774_v22 = vld [vmem:[%s4647_s12 + $0xbe0] sm:$0xff]  ;;  %v1703_v34 = vadd.f32 %v1639_v61, %v723_v60  ;;  %v1451_v37 = vadd.f32 %v1387_v7, %v763_v31  ;;  %v1641_v56 = vadd.f32 %v1577_v28, %v744_v20 }
 0x157   : > { %2035 = vmatprep.mubr.f32.mxu0 %v1700_v2  ;;  %v951_v2 = vld [vmem:[%s4647_s12 + $0x1168] sm:$0xff]  ;;  %v1388_v12 = vadd.f32 %v1324_v47, %v773_v57  ;;  %2150 = vmatprep.mubr.f32.mxu1 %v1723_v8  ;;  %v1277_v26 = vadd.f32 %v1213_v11, %v958_v5  ;;  %v953_v30 = vld [vmem:[%s4647_s12 + $0x1178] sm:$0xff]  ;;  %v784_v32 = vld [vmem:[%s4647_s12 + $0xc30] sm:$0xff]  ;;  %v1578_v57 = vadd.f32 %v1514_v29, %v754_v21 }
 0x158   : > { %v959_v63 = vld [vmem:[%s4647_s12 + $0x11a8] sm:$0xff]  ;;  %v1532_v23 = vadd.f32 %v1468_v10, %v951_v2  ;;  %2151 = vmatmul.mubr.f32.gmra.mxu1 %v1787_v9  ;;  %v960_v40 = vld [vmem:[%s4647_s12 + $0x11b0] sm:$0xff]  ;;  %v954_v38 = vld [vmem:[%s4647_s12 + $0x1180] sm:$0xff] }
 0x159   : > { %v791_v16 = vld [vmem:[%s4647_s12 + $0xc68] sm:$0xff]  ;;  %v764_v35 = vld [vmem:[%s4647_s12 + $0xb90] sm:$0xff]  ;;  %v1341_v41 = vadd.f32 %v1277_v26, %v959_v63  ;;  %v1452_v42 = vadd.f32 %v1388_v12, %v774_v22  ;;  %v961_v43 = vld [vmem:[%s4647_s12 + $0x11b8] sm:$0xff] }
 0x15a   : > { %2036 = vmatmul.mubr.f32.gmra.mxu0 %v1764_v25  ;;  %v1325_v25 = vadd.f32 %v1261_v4, %v783_v3  ;;  %v1134_v33 = vadd.f32 %v791_v16, %v790_v14  ;;  %v1596_v39 = vadd.f32 %v1532_v23, %v952_v13  ;;  %v966_v44 = vld [vmem:[%s4647_s12 + $0x11e0] sm:$0xff]  ;;  %v967_v45 = vld [vmem:[%s4647_s12 + $0x11e8] sm:$0xff]  ;;  %v968_v52 = vld [vmem:[%s4647_s12 + $0x11f0] sm:$0xff]  ;;  %v1515_v62 = vadd.f32 %v1451_v37, %v764_v35 }
 0x15b   : > { %2040 = vmatprep.mubr.f32.mxu0 %v1701_v15  ;;  %v793_v15 = vld [vmem:[%s4647_s12 + $0xc78] sm:$0xff]  ;;  %v1767_v24 = vld [vmem:[%s4657_s29 + $0xe8] sm:$0xff]  ;;  %v1405_v50 = vadd.f32 %v1341_v41, %v960_v40  ;;  %v794_v51 = vld [vmem:[%s4647_s12 + $0xc80] sm:$0xff] }
 0x15c   : > { %v1198_v49 = vadd.f32 %v1134_v33, %v792_v27  ;;  %v755_v46 = vld [vmem:[%s4647_s12 + $0xb48] sm:$0xff]  ;;  %v1660_v47 = vadd.f32 %v1596_v39, %v953_v30  ;;  %v1389_v48 = vadd.f32 %v1325_v25, %v784_v32  ;;  %v745_v55 = vld [vmem:[%s4647_s12 + $0xaf8] sm:$0xff]  ;;  %v962_v58 = vld [vmem:[%s4647_s12 + $0x11c0] sm:$0xff] }
 0x15d   : > { %v785_v59 = vld [vmem:[%s4647_s12 + $0xc38] sm:$0xff]  ;;  %v1788_v2 = vld [vmem:[%s4657_s29 + $0x190] sm:$0xff]  ;;  %v1469_v3 = vadd.f32 %v1405_v50, %v961_v43  ;;  %v795_v4 = vld [vmem:[%s4647_s12 + $0xc88] sm:$0xff]  ;;  %v1642_v19 = vadd.f32 %v1578_v57, %v755_v46  ;;  %v1705_v16 = vadd.f32 %v1641_v56, %v745_v55 }
 0x15e   : > { %2041 = vmatmul.mubr.f32.gmra.mxu0 %v1765_v53  ;;  %v1150_v53 = vadd.f32 %v967_v45, %v966_v44  ;;  %v1262_v36 = vadd.f32 %v1198_v49, %v793_v15  ;;  %v969_v60 = vld [vmem:[%s4647_s12 + $0x11f8] sm:$0xff]  ;;  %v1724_v1 = vadd.f32 %v1660_v47, %v954_v38  ;;  %v963_v31 = vld [vmem:[%s4647_s12 + $0x11c8] sm:$0xff]  ;;  %v970_v8 = vld [vmem:[%s4647_s12 + $0x1200] sm:$0xff]  ;;  %v1453_v13 = vadd.f32 %v1389_v48, %v785_v59 }
 0x15f   : > { %2045 = vmatprep.mubr.f32.mxu0 %v1702_v0  ;;  %v775_v0 = vld [vmem:[%s4647_s12 + $0xbe8] sm:$0xff]  ;;  %v765_v61 = vld [vmem:[%s4647_s12 + $0xb98] sm:$0xff]  ;;  %v1768_v10 = vld [vmem:[%s4657_s29 + $0xf0] sm:$0xff]  ;;  %v1533_v63 = vadd.f32 %v1469_v3, %v962_v58 }
 0x160   : > { %v1214_v5 = vadd.f32 %v1150_v53, %v968_v52  ;;  %v1516_v6 = vadd.f32 %v1452_v42, %v775_v0  ;;  %v1326_v7 = vadd.f32 %v1262_v36, %v794_v51  ;;  %v801_v9 = vld [vmem:[%s4647_s12 + $0xcb8] sm:$0xff]  ;;  %v756_v11 = vld [vmem:[%s4647_s12 + $0xb50] sm:$0xff]  ;;  %2155 = vmatprep.mubr.f32.mxu1 %v1724_v1  ;;  %v803_v18 = vld [vmem:[%s4647_s12 + $0xcc8] sm:$0xff]  ;;  %v1579_v27 = vadd.f32 %v1515_v62, %v765_v61 }
 0x161   : > { %v776_v12 = vld [vmem:[%s4647_s12 + $0xbf0] sm:$0xff]  ;;  %v766_v20 = vld [vmem:[%s4647_s12 + $0xba0] sm:$0xff]  ;;  %2156 = vmatmul.mubr.f32.gmra.mxu1 %v1788_v2  ;;  %v971_v25 = vld [vmem:[%s4647_s12 + $0x1208] sm:$0xff]  ;;  %v1597_v29 = vadd.f32 %v1533_v63, %v963_v31 }
 0x162   : > { %2046 = vmatmul.mubr.f32.gmra.mxu0 %v1766_v17  ;;  %v1278_v14 = vadd.f32 %v1214_v5, %v969_v60  ;;  %v802_v17 = vld [vmem:[%s4647_s12 + $0xcc0] sm:$0xff]  ;;  %v964_v22 = vld [vmem:[%s4647_s12 + $0x11d0] sm:$0xff]  ;;  %v1390_v23 = vadd.f32 %v1326_v7, %v795_v4  ;;  %v965_v28 = vld [vmem:[%s4647_s12 + $0x11d8] sm:$0xff]  ;;  %v1580_v33 = vadd.f32 %v1516_v6, %v776_v12  ;;  %v1643_v52 = vadd.f32 %v1579_v27, %v766_v20 }
 0x163   : > { %2050 = vmatprep.mubr.f32.mxu0 %v1703_v34  ;;  %v786_v21 = vld [vmem:[%s4647_s12 + $0xc40] sm:$0xff]  ;;  %v1135_v26 = vadd.f32 %v802_v17, %v801_v9  ;;  %v796_v30 = vld [vmem:[%s4647_s12 + $0xc90] sm:$0xff]  ;;  %v977_v37 = vld [vmem:[%s4647_s12 + $0x1238] sm:$0xff]  ;;  %v1661_v42 = vadd.f32 %v1597_v29, %v964_v22 }
 0x164   : > { %v1342_v32 = vadd.f32 %v1278_v14, %v970_v8  ;;  %v804_v40 = vld [vmem:[%s4647_s12 + $0xcd0] sm:$0xff]  ;;  %v978_v38 = vld [vmem:[%s4647_s12 + $0x1240] sm:$0xff]  ;;  %v1769_v39 = vld [vmem:[%s4657_s29 + $0xf8] sm:$0xff]  ;;  %v1517_v15 = vadd.f32 %v1453_v13, %v786_v21  ;;  %v1454_v47 = vadd.f32 %v1390_v23, %v796_v30 }
 0x165   : > { %v972_v34 = vld [vmem:[%s4647_s12 + $0x1210] sm:$0xff]  ;;  %v1199_v35 = vadd.f32 %v1135_v26, %v803_v18  ;;  %v777_v41 = vld [vmem:[%s4647_s12 + $0xbf8] sm:$0xff]  ;;  %v979_v44 = vld [vmem:[%s4647_s12 + $0x1248] sm:$0xff]  ;;  %v1151_v45 = vadd.f32 %v978_v38, %v977_v37  ;;  %v1725_v53 = vadd.f32 %v1661_v42, %v965_v28 }
 0x166   : > { %2051 = vmatmul.mubr.f32.gmra.mxu0 %v1767_v24  ;;  %v1406_v43 = vadd.f32 %v1342_v32, %v971_v25  ;;  %v805_v49 = vld [vmem:[%s4647_s12 + $0xcd8] sm:$0xff]  ;;  %v1706_v24 = vadd.f32 %v1642_v19, %v756_v11  ;;  %v767_v46 = vld [vmem:[%s4647_s12 + $0xba8] sm:$0xff]  ;;  %v980_v51 = vld [vmem:[%s4647_s12 + $0x1250] sm:$0xff]  ;;  %v1644_v2 = vadd.f32 %v1580_v33, %v777_v41 }
 0x167   : > { %2055 = vmatprep.mubr.f32.mxu0 %v1704_v54  ;;  %v787_v0 = vld [vmem:[%s4647_s12 + $0xc48] sm:$0xff]  ;;  %v973_v48 = vld [vmem:[%s4647_s12 + $0x1218] sm:$0xff]  ;;  %v1263_v50 = vadd.f32 %v1199_v35, %v804_v40  ;;  %v806_v57 = vld [vmem:[%s4647_s12 + $0xce0] sm:$0xff]  ;;  %v1215_v59 = vadd.f32 %v1151_v45, %v979_v44  ;;  %2160 = vmatprep.mubr.f32.mxu1 %v1725_v53  ;;  %v1707_v14 = vadd.f32 %v1643_v52, %v767_v46 }
 0x168   : > { %v1789_v54 = vld [vmem:[%s4657_s29 + $0x198] sm:$0xff]  ;;  %v1470_v56 = vadd.f32 %v1406_v43, %v972_v34  ;;  %v974_v58 = vld [vmem:[%s4647_s12 + $0x1220] sm:$0xff]  ;;  %v812_v61 = vld [vmem:[%s4647_s12 + $0xd10] sm:$0xff]  ;;  %v1581_v4 = vadd.f32 %v1517_v15, %v787_v0 }
 0x169   : > { %v797_v55 = vld [vmem:[%s4647_s12 + $0xc98] sm:$0xff]  ;;  %v1327_v36 = vadd.f32 %v1263_v50, %v805_v49  ;;  %v1770_v62 = vld [vmem:[%s4657_s29 + $0x100] sm:$0xff]  ;;  %v788_v3 = vld [vmem:[%s4647_s12 + $0xc50] sm:$0xff]  ;;  %v1279_v31 = vadd.f32 %v1215_v59, %v980_v51  ;;  %2161 = vmatmul.mubr.f32.gmra.mxu1 %v1789_v54 }
 0x16a   : > { %2056 = vmatmul.mubr.f32.gmra.mxu0 %v1768_v10  ;;  %v981_v60 = vld [vmem:[%s4647_s12 + $0x1258] sm:$0xff]  ;;  %v778_v1 = vld [vmem:[%s4647_s12 + $0xc00] sm:$0xff]  ;;  %v1534_v5 = vadd.f32 %v1470_v56, %v973_v48  ;;  %v807_v6 = vld [vmem:[%s4647_s12 + $0xce8] sm:$0xff]  ;;  %v1518_v10 = vadd.f32 %v1454_v47, %v797_v55  ;;  %v1645_v35 = vadd.f32 %v1581_v4, %v788_v3 }
 0x16b   : > { %2060 = vmatprep.mubr.f32.mxu0 %v1705_v16  ;;  %v813_v7 = vld [vmem:[%s4647_s12 + $0xd18] sm:$0xff]  ;;  %v814_v8 = vld [vmem:[%s4647_s12 + $0xd20] sm:$0xff]  ;;  %v975_v11 = vld [vmem:[%s4647_s12 + $0x1228] sm:$0xff]  ;;  %v1391_v12 = vadd.f32 %v1327_v36, %v806_v57  ;;  %v1343_v20 = vadd.f32 %v1279_v31, %v981_v60  ;;  %v1708_v33 = vadd.f32 %v1644_v2, %v778_v1 }
 0x16c   : > { %v798_v9 = vld [vmem:[%s4647_s12 + $0xca0] sm:$0xff]  ;;  %v1136_v63 = vadd.f32 %v813_v7, %v812_v61  ;;  %v976_v17 = vld [vmem:[%s4647_s12 + $0x1230] sm:$0xff]  ;;  %v1598_v18 = vadd.f32 %v1534_v5, %v974_v58  ;;  %v815_v21 = vld [vmem:[%s4647_s12 + $0xd28] sm:$0xff] }
 0x16d   : > { %v982_v13 = vld [vmem:[%s4647_s12 + $0x1260] sm:$0xff]  ;;  %v808_v19 = vld [vmem:[%s4647_s12 + $0xcf0] sm:$0xff]  ;;  %v1455_v22 = vadd.f32 %v1391_v12, %v807_v6  ;;  %v983_v23 = vld [vmem:[%s4647_s12 + $0x1268] sm:$0xff]  ;;  %v1582_v38 = vadd.f32 %v1518_v10, %v798_v9 }
 0x16e   : > { %2061 = vmatmul.mubr.f32.gmra.mxu0 %v1769_v39  ;;  %v1200_v25 = vadd.f32 %v1136_v63, %v814_v8  ;;  %v988_v26 = vld [vmem:[%s4647_s12 + $0x1290] sm:$0xff]  ;;  %v989_v16 = vld [vmem:[%s4647_s12 + $0x1298] sm:$0xff]  ;;  %v1771_v27 = vld [vmem:[%s4657_s29 + $0x108] sm:$0xff]  ;;  %v1662_v28 = vadd.f32 %v1598_v18, %v975_v11  ;;  %v1407_v29 = vadd.f32 %v1343_v20, %v982_v13 }
 0x16f   : > { %2065 = vmatprep.mubr.f32.mxu0 %v1706_v24  ;;  %v816_v30 = vld [vmem:[%s4647_s12 + $0xd30] sm:$0xff]  ;;  %v990_v32 = vld [vmem:[%s4647_s12 + $0x12a0] sm:$0xff]  ;;  %v1152_v40 = vadd.f32 %v989_v16, %v988_v26  ;;  %v789_v34 = vld [vmem:[%s4647_s12 + $0xc58] sm:$0xff]  ;;  %v1519_v44 = vadd.f32 %v1455_v22, %v808_v19 }
 0x170   : > { %v799_v37 = vld [vmem:[%s4647_s12 + $0xca8] sm:$0xff]  ;;  %v984_v39 = vld [vmem:[%s4647_s12 + $0x1270] sm:$0xff]  ;;  %v1264_v41 = vadd.f32 %v1200_v25, %v815_v21  ;;  %v1726_v42 = vadd.f32 %v1662_v28, %v976_v17  ;;  %v1790_v43 = vld [vmem:[%s4657_s29 + $0x1a0] sm:$0xff]  ;;  %v1471_v45 = vadd.f32 %v1407_v29, %v983_v23  ;;  %v1709_v1 = vadd.f32 %v1645_v35, %v789_v34 }
 0x171   : > { %v991_v15 = vld [vmem:[%s4647_s12 + $0x12a8] sm:$0xff]  ;;  %v809_v49 = vld [vmem:[%s4647_s12 + $0xcf8] sm:$0xff]  ;;  %v1216_v46 = vadd.f32 %v1152_v40, %v990_v32  ;;  %v992_v48 = vld [vmem:[%s4647_s12 + $0x12b0] sm:$0xff]  ;;  %v1646_v59 = vadd.f32 %v1582_v38, %v799_v37 }
 0x172   : > { %2066 = vmatmul.mubr.f32.gmra.mxu0 %v1770_v62  ;;  %v817_v24 = vld [vmem:[%s4647_s12 + $0xd38] sm:$0xff]  ;;  %v1328_v47 = vadd.f32 %v1264_v41, %v816_v30  ;;  %v823_v50 = vld [vmem:[%s4647_s12 + $0xd68] sm:$0xff]  ;;  %v1772_v51 = vld [vmem:[%s4657_s29 + $0x110] sm:$0xff]  ;;  %2165 = vmatprep.mubr.f32.mxu1 %v1726_v42  ;;  %v1535_v53 = vadd.f32 %v1471_v45, %v984_v39  ;;  %v1583_v2 = vadd.f32 %v1519_v44, %v809_v49 }
 0x173   : > { %2070 = vmatprep.mubr.f32.mxu0 %v1707_v14  ;;  %v985_v0 = vld [vmem:[%s4647_s12 + $0x1278] sm:$0xff]  ;;  %v800_v52 = vld [vmem:[%s4647_s12 + $0xcb0] sm:$0xff]  ;;  %v818_v54 = vld [vmem:[%s4647_s12 + $0xd40] sm:$0xff]  ;;  %v1280_v55 = vadd.f32 %v1216_v46, %v991_v15  ;;  %2166 = vmatmul.mubr.f32.gmra.mxu1 %v1790_v43 }
 0x174   : > { %v824_v56 = vld [vmem:[%s4647_s12 + $0xd70] sm:$0xff]  ;;  %v825_v57 = vld [vmem:[%s4647_s12 + $0xd78] sm:$0xff]  ;;  %v810_v58 = vld [vmem:[%s4647_s12 + $0xd00] sm:$0xff]  ;;  %v1392_v60 = vadd.f32 %v1328_v47, %v817_v24  ;;  %v1599_v4 = vadd.f32 %v1535_v53, %v985_v0  ;;  %v1710_v20 = vadd.f32 %v1646_v59, %v800_v52 }
 0x175   : > { %v986_v36 = vld [vmem:[%s4647_s12 + $0x1280] sm:$0xff]  ;;  %v993_v61 = vld [vmem:[%s4647_s12 + $0x12b8] sm:$0xff]  ;;  %v1137_v62 = vadd.f32 %v824_v56, %v823_v50  ;;  %v987_v3 = vld [vmem:[%s4647_s12 + $0x1288] sm:$0xff]  ;;  %v1344_v6 = vadd.f32 %v1280_v55, %v992_v48  ;;  %v1647_v16 = vadd.f32 %v1583_v2, %v810_v58 }
 0x176   : > { %2071 = vmatmul.mubr.f32.gmra.mxu0 %v1771_v27  ;;  %v819_v5 = vld [vmem:[%s4647_s12 + $0xd48] sm:$0xff]  ;;  %v826_v31 = vld [vmem:[%s4647_s12 + $0xd80] sm:$0xff]  ;;  %v1456_v7 = vadd.f32 %v1392_v60, %v818_v54  ;;  %v1000_v11 = vld [vmem:[%s4647_s12 + $0x12f0] sm:$0xff]  ;;  %v1663_v13 = vadd.f32 %v1599_v4, %v986_v36 }
 0x177   : > { %2075 = vmatprep.mubr.f32.mxu0 %v1708_v33  ;;  %v994_v8 = vld [vmem:[%s4647_s12 + $0x12c0] sm:$0xff]  ;;  %v1201_v9 = vadd.f32 %v1137_v62, %v825_v57  ;;  %v999_v10 = vld [vmem:[%s4647_s12 + $0x12e8] sm:$0xff]  ;;  %v1773_v12 = vld [vmem:[%s4657_s29 + $0x118] sm:$0xff]  ;;  %v1408_v14 = vadd.f32 %v1344_v6, %v993_v61 }
 0x178   : > { %v820_v63 = vld [vmem:[%s4647_s12 + $0xd50] sm:$0xff]  ;;  %v827_v17 = vld [vmem:[%s4647_s12 + $0xd88] sm:$0xff]  ;;  %v1001_v18 = vld [vmem:[%s4647_s12 + $0x12f8] sm:$0xff]  ;;  %v1153_v19 = vadd.f32 %v1000_v11, %v999_v10  ;;  %v1520_v22 = vadd.f32 %v1456_v7, %v819_v5  ;;  %v1727_v27 = vadd.f32 %v1663_v13, %v987_v3 }
 0x179   : > { %v811_v21 = vld [vmem:[%s4647_s12 + $0xd08] sm:$0xff]  ;;  %v1265_v25 = vadd.f32 %v1201_v9, %v826_v31  ;;  %v1002_v26 = vld [vmem:[%s4647_s12 + $0x1300] sm:$0xff]  ;;  %v821_v29 = vld [vmem:[%s4647_s12 + $0xd58] sm:$0xff]  ;;  %v1472_v30 = vadd.f32 %v1408_v14, %v994_v8 }
 0x17a   : > { %2076 = vmatmul.mubr.f32.gmra.mxu0 %v1772_v51  ;;  %v995_v23 = vld [vmem:[%s4647_s12 + $0x12c8] sm:$0xff]  ;;  %v828_v32 = vld [vmem:[%s4647_s12 + $0xd90] sm:$0xff]  ;;  %v1217_v40 = vadd.f32 %v1153_v19, %v1001_v18  ;;  %v1584_v33 = vadd.f32 %v1520_v22, %v820_v63  ;;  %v834_v38 = vld [vmem:[%s4647_s12 + $0xdc0] sm:$0xff]  ;;  %2170 = vmatprep.mubr.f32.mxu1 %v1727_v27  ;;  %v1711_v47 = vadd.f32 %v1647_v16, %v811_v21 }
 0x17b   : > { %2080 = vmatprep.mubr.f32.mxu0 %v1709_v1  ;;  %v1791_v28 = vld [vmem:[%s4657_s29 + $0x1a8] sm:$0xff]  ;;  %v996_v34 = vld [vmem:[%s4647_s12 + $0x12d0] sm:$0xff]  ;;  %v1329_v35 = vadd.f32 %v1265_v25, %v827_v17  ;;  %v1774_v39 = vld [vmem:[%s4657_s29 + $0x120] sm:$0xff]  ;;  %v1536_v41 = vadd.f32 %v1472_v30, %v995_v23 }
 0x17c   : > { %v1003_v37 = vld [vmem:[%s4647_s12 + $0x1308] sm:$0xff]  ;;  %v829_v15 = vld [vmem:[%s4647_s12 + $0xd98] sm:$0xff]  ;;  %v1281_v42 = vadd.f32 %v1217_v40, %v1002_v26  ;;  %v836_v49 = vld [vmem:[%s4647_s12 + $0xdd0] sm:$0xff]  ;;  %2171 = vmatmul.mubr.f32.gmra.mxu1 %v1791_v28  ;;  %v1648_v48 = vadd.f32 %v1584_v33, %v821_v29 }
 0x17d   : > { %v835_v43 = vld [vmem:[%s4647_s12 + $0xdc8] sm:$0xff]  ;;  %v822_v44 = vld [vmem:[%s4647_s12 + $0xd60] sm:$0xff]  ;;  %v997_v45 = vld [vmem:[%s4647_s12 + $0x12d8] sm:$0xff]  ;;  %v1393_v24 = vadd.f32 %v1329_v35, %v828_v32  ;;  %v1600_v51 = vadd.f32 %v1536_v41, %v996_v34 }
 0x17e   : > { %2081 = vmatmul.mubr.f32.gmra.mxu0 %v1773_v12  ;;  %v1004_v46 = vld [vmem:[%s4647_s12 + $0x1310] sm:$0xff]  ;;  %v1138_v0 = vadd.f32 %v835_v43, %v834_v38  ;;  %v998_v50 = vld [vmem:[%s4647_s12 + $0x12e0] sm:$0xff]  ;;  %v1345_v53 = vadd.f32 %v1281_v42, %v1003_v37  ;;  %v837_v54 = vld [vmem:[%s4647_s12 + $0xdd8] sm:$0xff]  ;;  %v1712_v8 = vadd.f32 %v1648_v48, %v822_v44 }
 0x17f   : > { %2085 = vmatprep.mubr.f32.mxu0 %v1710_v20  ;;  %v830_v52 = vld [vmem:[%s4647_s12 + $0xda0] sm:$0xff]  ;;  %v1457_v55 = vadd.f32 %v1393_v24, %v829_v15  ;;  %v1005_v56 = vld [vmem:[%s4647_s12 + $0x1318] sm:$0xff]  ;;  %v1011_v58 = vld [vmem:[%s4647_s12 + $0x1348] sm:$0xff]  ;;  %v1664_v60 = vadd.f32 %v1600_v51, %v997_v45 }
 0x180   : > { %v1202_v57 = vadd.f32 %v1138_v0, %v836_v49  ;;  %v1010_v59 = vld [vmem:[%s4647_s12 + $0x1340] sm:$0xff]  ;;  %v1775_v36 = vld [vmem:[%s4657_s29 + $0x128] sm:$0xff]  ;;  %v1409_v62 = vadd.f32 %v1345_v53, %v1004_v46  ;;  %v1012_v2 = vld [vmem:[%s4647_s12 + $0x1350] sm:$0xff] }
 0x181   : > { %v831_v61 = vld [vmem:[%s4647_s12 + $0xda8] sm:$0xff]  ;;  %v838_v1 = vld [vmem:[%s4647_s12 + $0xde0] sm:$0xff]  ;;  %v1154_v3 = vadd.f32 %v1011_v58, %v1010_v59  ;;  %v1792_v4 = vld [vmem:[%s4657_s29 + $0x1b0] sm:$0xff]  ;;  %v1521_v5 = vadd.f32 %v1457_v55, %v830_v52  ;;  %v1728_v9 = vadd.f32 %v1664_v60, %v998_v50 }
 0x182   : > { %2086 = vmatmul.mubr.f32.gmra.mxu0 %v1774_v39  ;;  %v1006_v6 = vld [vmem:[%s4647_s12 + $0x1320] sm:$0xff]  ;;  %v1266_v31 = vadd.f32 %v1202_v57, %v837_v54  ;;  %v1013_v7 = vld [vmem:[%s4647_s12 + $0x1358] sm:$0xff]  ;;  %v832_v10 = vld [vmem:[%s4647_s12 + $0xdb0] sm:$0xff]  ;;  %v1473_v12 = vadd.f32 %v1409_v62, %v1005_v56 }
 0x183   : > { %2090 = vmatprep.mubr.f32.mxu0 %v1711_v47  ;;  %v833_v11 = vld [vmem:[%s4647_s12 + $0xdb8] sm:$0xff]  ;;  %v839_v13 = vld [vmem:[%s4647_s12 + $0xde8] sm:$0xff]  ;;  %v1218_v63 = vadd.f32 %v1154_v3, %v1012_v2  ;;  %v1585_v14 = vadd.f32 %v1521_v5, %v831_v61  ;;  %v1014_v19 = vld [vmem:[%s4647_s12 + $0x1360] sm:$0xff]  ;;  %2175 = vmatprep.mubr.f32.mxu1 %v1728_v9 }
 0x184   : > { %v1007_v17 = vld [vmem:[%s4647_s12 + $0x1328] sm:$0xff]  ;;  %v1330_v18 = vadd.f32 %v1266_v31, %v838_v1  ;;  %v845_v20 = vld [vmem:[%s4647_s12 + $0xe18] sm:$0xff]  ;;  %v1537_v21 = vadd.f32 %v1473_v12, %v1006_v6  ;;  %v840_v22 = vld [vmem:[%s4647_s12 + $0xdf0] sm:$0xff]  ;;  %2176 = vmatmul.mubr.f32.gmra.mxu1 %v1792_v4 }
 0x185   : > { %v1282_v23 = vadd.f32 %v1218_v63, %v1013_v7  ;;  %v846_v25 = vld [vmem:[%s4647_s12 + $0xe20] sm:$0xff]  ;;  %v847_v26 = vld [vmem:[%s4647_s12 + $0xe28] sm:$0xff]  ;;  %v1776_v16 = vld [vmem:[%s4657_s29 + $0x130] sm:$0xff]  ;;  %v1649_v27 = vadd.f32 %v1585_v14, %v832_v10 }
 0x186   : > { %2091 = vmatmul.mubr.f32.gmra.mxu0 %v1775_v36  ;;  %v1008_v28 = vld [vmem:[%s4647_s12 + $0x1330] sm:$0xff]  ;;  %v1394_v29 = vadd.f32 %v1330_v18, %v839_v13  ;;  %v1015_v30 = vld [vmem:[%s4647_s12 + $0x1368] sm:$0xff]  ;;  %v1139_v32 = vadd.f32 %v846_v25, %v845_v20  ;;  %v1009_v40 = vld [vmem:[%s4647_s12 + $0x1338] sm:$0xff]  ;;  %v1601_v33 = vadd.f32 %v1537_v21, %v1007_v17 }
 0x187   : > { %2095 = vmatprep.mubr.f32.mxu0 %v1712_v8  ;;  %v841_v34 = vld [vmem:[%s4647_s12 + $0xdf8] sm:$0xff]  ;;  %v1346_v35 = vadd.f32 %v1282_v23, %v1014_v19  ;;  %v848_v37 = vld [vmem:[%s4647_s12 + $0xe30] sm:$0xff]  ;;  %v1713_v38 = vadd.f32 %v1649_v27, %v833_v11  ;;  %v1022_v43 = vld [vmem:[%s4647_s12 + $0x13a0] sm:$0xff] }
 0x188   : > { %v1458_v39 = vadd.f32 %v1394_v29, %v840_v22  ;;  %v1016_v41 = vld [vmem:[%s4647_s12 + $0x1370] sm:$0xff]  ;;  %v1203_v15 = vadd.f32 %v1139_v32, %v847_v26  ;;  %v1021_v42 = vld [vmem:[%s4647_s12 + $0x1398] sm:$0xff]  ;;  %v1665_v49 = vadd.f32 %v1601_v33, %v1008_v28  ;;  %v842_v45 = vld [vmem:[%s4647_s12 + $0xe00] sm:$0xff] }
 0x189   : > { %v1777_v44 = vld [vmem:[%s4657_s29 + $0x138] sm:$0xff]  ;;  %v1410_v24 = vadd.f32 %v1346_v35, %v1015_v30  ;;  %v1023_v0 = vld [vmem:[%s4647_s12 + $0x13a8] sm:$0xff]  ;;  %v1155_v47 = vadd.f32 %v1022_v43, %v1021_v42  ;;  %v1024_v53 = vld [vmem:[%s4647_s12 + $0x13b0] sm:$0xff] }
 0x18a   : > { %v849_v46 = vld [vmem:[%s4647_s12 + $0xe38] sm:$0xff]  ;;  %2096 = vmatmul.mubr.f32.gmra.mxu0 %v1776_v16  ;;  %v1522_v50 = vadd.f32 %v1458_v39, %v841_v34  ;;  %v1267_v52 = vadd.f32 %v1203_v15, %v848_v37  ;;  %v1729_v54 = vadd.f32 %v1665_v49, %v1009_v40  ;;  %v843_v55 = vld [vmem:[%s4647_s12 + $0xe08] sm:$0xff]  ;;  %v844_v56 = vld [vmem:[%s4647_s12 + $0xe10] sm:$0xff] }
 0x18b   : > { %v1793_v48 = vld [vmem:[%s4657_s29 + $0x1b8] sm:$0xff]  ;;  %2100 = vmatprep.mubr.f32.mxu0 %v1713_v38  ;;  %v1474_v57 = vadd.f32 %v1410_v24, %v1016_v41  ;;  %v850_v59 = vld [vmem:[%s4647_s12 + $0xe40] sm:$0xff]  ;;  %v1219_v58 = vadd.f32 %v1155_v47, %v1023_v0  ;;  %v856_v1 = vld [vmem:[%s4647_s12 + $0xe70] sm:$0xff] }
 0x18c   : > { %v1017_v51 = vld [vmem:[%s4647_s12 + $0x1378] sm:$0xff]  ;;  %v1586_v36 = vadd.f32 %v1522_v50, %v842_v45  ;;  %v1018_v60 = vld [vmem:[%s4647_s12 + $0x1380] sm:$0xff]  ;;  %v1331_v61 = vadd.f32 %v1267_v52, %v849_v46  ;;  %2180 = vmatprep.mubr.f32.mxu1 %v1729_v54  ;;  %v851_v3 = vld [vmem:[%s4647_s12 + $0xe48] sm:$0xff] }
 0x18d   : > { %v1025_v62 = vld [vmem:[%s4647_s12 + $0x13b8] sm:$0xff]  ;;  %v1538_v2 = vadd.f32 %v1474_v57, %v1017_v51  ;;  %v1283_v4 = vadd.f32 %v1219_v58, %v1024_v53  ;;  %v858_v6 = vld [vmem:[%s4647_s12 + $0xe80] sm:$0xff]  ;;  %2181 = vmatmul.mubr.f32.gmra.mxu1 %v1793_v48  ;;  %v1019_v7 = vld [vmem:[%s4647_s12 + $0x1388] sm:$0xff] }
 0x18e   : > { %v857_v5 = vld [vmem:[%s4647_s12 + $0xe78] sm:$0xff]  ;;  %2101 = vmatmul.mubr.f32.gmra.mxu0 %v1777_v44  ;;  %v1650_v31 = vadd.f32 %v1586_v36, %v843_v55  ;;  %v1020_v8 = vld [vmem:[%s4647_s12 + $0x1390] sm:$0xff]  ;;  %v1395_v9 = vadd.f32 %v1331_v61, %v850_v59  ;;  %v1026_v10 = vld [vmem:[%s4647_s12 + $0x13c0] sm:$0xff] }
 0x18f   : > { %v1140_v11 = vadd.f32 %v857_v5, %v856_v1  ;;  %v1602_v12 = vadd.f32 %v1538_v2, %v1018_v60  ;;  %v1778_v13 = vld [vmem:[%s4657_s29 + $0x140] sm:$0xff]  ;;  %v852_v63 = vld [vmem:[%s4647_s12 + $0xe50] sm:$0xff]  ;;  %v1347_v14 = vadd.f32 %v1283_v4, %v1025_v62  ;;  %v859_v17 = vld [vmem:[%s4647_s12 + $0xe88] sm:$0xff] }
 0x190   : > { %v1714_v18 = vadd.f32 %v1650_v31, %v844_v56  ;;  %v1459_v19 = vadd.f32 %v1395_v9, %v851_v3  ;;  %v1027_v20 = vld [vmem:[%s4647_s12 + $0x13c8] sm:$0xff]  ;;  %v1032_v22 = vld [vmem:[%s4647_s12 + $0x13f0] sm:$0xff]  ;;  %v1033_v23 = vld [vmem:[%s4647_s12 + $0x13f8] sm:$0xff] }
 0x191   : > { %v1204_v21 = vadd.f32 %v1140_v11, %v858_v6  ;;  %v1666_v25 = vadd.f32 %v1602_v12, %v1019_v7  ;;  %v853_v26 = vld [vmem:[%s4647_s12 + $0xe58] sm:$0xff]  ;;  %v1411_v16 = vadd.f32 %v1347_v14, %v1026_v10  ;;  %v860_v27 = vld [vmem:[%s4647_s12 + $0xe90] sm:$0xff]  ;;  %v1034_v28 = vld [vmem:[%s4647_s12 + $0x1400] sm:$0xff]  ;;  %v1156_v29 = vadd.f32 %v1033_v23, %v1032_v22 }
 0x192   : > { %2105 = vmatprep.mubr.f32.mxu0 %v1714_v18  ;;  %v1794_v30 = vld [vmem:[%s4657_s29 + $0x1c0] sm:$0xff]  ;;  %v1523_v32 = vadd.f32 %v1459_v19, %v852_v63  ;;  %v1028_v40 = vld [vmem:[%s4647_s12 + $0x13d0] sm:$0xff]  ;;  %v1035_v34 = vld [vmem:[%s4647_s12 + $0x1408] sm:$0xff] }
 0x193   : > { %v1268_v33 = vadd.f32 %v1204_v21, %v859_v17  ;;  %v1730_v35 = vadd.f32 %v1666_v25, %v1020_v8  ;;  %2106 = vmatmul.mubr.f32.gmra.mxu0 %v1778_v13  ;;  %v854_v37 = vld [vmem:[%s4647_s12 + $0xe60] sm:$0xff]  ;;  %v855_v38 = vld [vmem:[%s4647_s12 + $0xe68] sm:$0xff]  ;;  %v1475_v39 = vadd.f32 %v1411_v16, %v1027_v20  ;;  %v861_v41 = vld [vmem:[%s4647_s12 + $0xe98] sm:$0xff]  ;;  %v1220_v15 = vadd.f32 %v1156_v29, %v1034_v28 }
 0x194   : > { %v1587_v42 = vadd.f32 %v1523_v32, %v853_v26  ;;  %v1029_v43 = vld [vmem:[%s4647_s12 + $0x13d8] sm:$0xff]  ;;  %v1036_v44 = vld [vmem:[%s4647_s12 + $0x1410] sm:$0xff]  ;;  %v867_v45 = vld [vmem:[%s4647_s12 + $0xec8] sm:$0xff] }
 0x195   : > { %v1332_v49 = vadd.f32 %v1268_v33, %v860_v27  ;;  %2185 = vmatprep.mubr.f32.mxu1 %v1730_v35  ;;  %v1539_v24 = vadd.f32 %v1475_v39, %v1028_v40  ;;  %v862_v46 = vld [vmem:[%s4647_s12 + $0xea0] sm:$0xff]  ;;  %v1284_v0 = vadd.f32 %v1220_v15, %v1035_v34  ;;  %v868_v47 = vld [vmem:[%s4647_s12 + $0xed0] sm:$0xff]  ;;  %v869_v48 = vld [vmem:[%s4647_s12 + $0xed8] sm:$0xff] }
 0x196   : > { %2186 = vmatmul.mubr.f32.gmra.mxu1 %v1794_v30  ;;  %v1651_v50 = vadd.f32 %v1587_v42, %v854_v37  ;;  %v1030_v51 = vld [vmem:[%s4647_s12 + $0x13e0] sm:$0xff]  ;;  %v1031_v52 = vld [vmem:[%s4647_s12 + $0x13e8] sm:$0xff]  ;;  %v1037_v54 = vld [vmem:[%s4647_s12 + $0x1418] sm:$0xff]  ;;  %v1141_v55 = vadd.f32 %v868_v47, %v867_v45 }
 0x197   : > { %v1396_v53 = vadd.f32 %v1332_v49, %v861_v41  ;;  %v1603_v56 = vadd.f32 %v1539_v24, %v1029_v43  ;;  %v1779_v57 = vld [vmem:[%s4657_s29 + $0x148] sm:$0xff]  ;;  %v1348_v58 = vadd.f32 %v1284_v0, %v1036_v44  ;;  %v870_v36 = vld [vmem:[%s4647_s12 + $0xee0] sm:$0xff]  ;;  %v1044_v3 = vld [vmem:[%s4647_s12 + $0x1450] sm:$0xff] }
 0x198   : > { %v863_v59 = vld [vmem:[%s4647_s12 + $0xea8] sm:$0xff]  ;;  %v1715_v60 = vadd.f32 %v1651_v50, %v855_v38  ;;  %v1038_v62 = vld [vmem:[%s4647_s12 + $0x1420] sm:$0xff]  ;;  %v1205_v1 = vadd.f32 %v1141_v55, %v869_v48  ;;  %v864_v5 = vld [vmem:[%s4647_s12 + $0xeb0] sm:$0xff] }
 0x199   : > { %v1460_v61 = vadd.f32 %v1396_v53, %v862_v46  ;;  %v1043_v2 = vld [vmem:[%s4647_s12 + $0x1448] sm:$0xff]  ;;  %v1667_v4 = vadd.f32 %v1603_v56, %v1030_v51  ;;  %v1412_v6 = vadd.f32 %v1348_v58, %v1037_v54  ;;  %v1045_v7 = vld [vmem:[%s4647_s12 + $0x1458] sm:$0xff]  ;;  %v1046_v13 = vld [vmem:[%s4647_s12 + $0x1460] sm:$0xff] }
 0x19a   : > { %v871_v31 = vld [vmem:[%s4647_s12 + $0xee8] sm:$0xff]  ;;  %v1157_v8 = vadd.f32 %v1044_v3, %v1043_v2  ;;  %2110 = vmatprep.mubr.f32.mxu0 %v1715_v60  ;;  %v1269_v12 = vadd.f32 %v1205_v1, %v870_v36  ;;  %v865_v14 = vld [vmem:[%s4647_s12 + $0xeb8] sm:$0xff]  ;;  %v866_v17 = vld [vmem:[%s4647_s12 + $0xec0] sm:$0xff] }
 0x19b   : > { %v1795_v9 = vld [vmem:[%s4657_s29 + $0x1c8] sm:$0xff]  ;;  %v1524_v10 = vadd.f32 %v1460_v61, %v863_v59  ;;  %v1731_v63 = vadd.f32 %v1667_v4, %v1031_v52  ;;  %2111 = vmatmul.mubr.f32.gmra.mxu0 %v1779_v57  ;;  %v1476_v18 = vadd.f32 %v1412_v6, %v1038_v62  ;;  %v872_v19 = vld [vmem:[%s4647_s12 + $0xef0] sm:$0xff]  ;;  %v878_v26 = vld [vmem:[%s4647_s12 + $0xf20] sm:$0xff] }
 0x19c   : > { %v1039_v11 = vld [vmem:[%s4647_s12 + $0x1428] sm:$0xff]  ;;  %v1221_v20 = vadd.f32 %v1157_v8, %v1045_v7  ;;  %v1040_v22 = vld [vmem:[%s4647_s12 + $0x1430] sm:$0xff]  ;;  %v1333_v23 = vadd.f32 %v1269_v12, %v871_v31  ;;  %v873_v27 = vld [vmem:[%s4647_s12 + $0xef8] sm:$0xff] }
 0x19d   : > { %v1588_v21 = vadd.f32 %v1524_v10, %v864_v5  ;;  %v1047_v25 = vld [vmem:[%s4647_s12 + $0x1468] sm:$0xff]  ;;  %2190 = vmatprep.mubr.f32.mxu1 %v1731_v63  ;;  %v1540_v16 = vadd.f32 %v1476_v18, %v1039_v11  ;;  %v880_v30 = vld [vmem:[%s4647_s12 + $0xf30] sm:$0xff]  ;;  %v1041_v40 = vld [vmem:[%s4647_s12 + $0x1438] sm:$0xff] }
 0x19e   : > { %v1285_v28 = vadd.f32 %v1221_v20, %v1046_v13  ;;  %v879_v29 = vld [vmem:[%s4647_s12 + $0xf28] sm:$0xff]  ;;  %2191 = vmatmul.mubr.f32.gmra.mxu1 %v1795_v9  ;;  %v1042_v33 = vld [vmem:[%s4647_s12 + $0x1440] sm:$0xff]  ;;  %v1397_v34 = vadd.f32 %v1333_v23, %v872_v19  ;;  %v1048_v35 = vld [vmem:[%s4647_s12 + $0x1470] sm:$0xff] }
 0x19f   : > { %v1652_v32 = vadd.f32 %v1588_v21, %v865_v14  ;;  %v1142_v37 = vadd.f32 %v879_v29, %v878_v26  ;;  %v1604_v38 = vadd.f32 %v1540_v16, %v1040_v22  ;;  %v1780_v39 = vld [vmem:[%s4657_s29 + $0x150] sm:$0xff]  ;;  %v874_v41 = vld [vmem:[%s4647_s12 + $0xf00] sm:$0xff]  ;;  %v881_v42 = vld [vmem:[%s4647_s12 + $0xf38] sm:$0xff] }
 0x1a0   : > { %v1349_v15 = vadd.f32 %v1285_v28, %v1047_v25  ;;  %v1461_v49 = vadd.f32 %v1397_v34, %v873_v27  ;;  %v1049_v44 = vld [vmem:[%s4647_s12 + $0x1478] sm:$0xff]  ;;  %v1054_v24 = vld [vmem:[%s4647_s12 + $0x14a0] sm:$0xff]  ;;  %v1055_v46 = vld [vmem:[%s4647_s12 + $0x14a8] sm:$0xff] }
 0x1a1   : > { %v1716_v43 = vadd.f32 %v1652_v32, %v866_v17  ;;  %v1206_v45 = vadd.f32 %v1142_v37, %v880_v30  ;;  %v1668_v0 = vadd.f32 %v1604_v38, %v1041_v40  ;;  %v875_v47 = vld [vmem:[%s4647_s12 + $0xf08] sm:$0xff]  ;;  %v882_v50 = vld [vmem:[%s4647_s12 + $0xf40] sm:$0xff]  ;;  %v1056_v51 = vld [vmem:[%s4647_s12 + $0x14b0] sm:$0xff]  ;;  %v1158_v52 = vadd.f32 %v1055_v46, %v1054_v24 }
 0x1a2   : > { %v1413_v48 = vadd.f32 %v1349_v15, %v1048_v35  ;;  %v1796_v53 = vld [vmem:[%s4657_s29 + $0x1d0] sm:$0xff]  ;;  %v1525_v54 = vadd.f32 %v1461_v49, %v874_v41  ;;  %v1050_v55 = vld [vmem:[%s4647_s12 + $0x1480] sm:$0xff]  ;;  %v1057_v57 = vld [vmem:[%s4647_s12 + $0x14b8] sm:$0xff] }
 0x1a3   : > { %2115 = vmatprep.mubr.f32.mxu0 %v1716_v43  ;;  %v1270_v56 = vadd.f32 %v1206_v45, %v881_v42  ;;  %v1732_v59 = vadd.f32 %v1668_v0, %v1042_v33  ;;  %v876_v58 = vld [vmem:[%s4647_s12 + $0xf10] sm:$0xff]  ;;  %v877_v36 = vld [vmem:[%s4647_s12 + $0xf18] sm:$0xff]  ;;  %v883_v61 = vld [vmem:[%s4647_s12 + $0xf48] sm:$0xff]  ;;  %v1222_v62 = vadd.f32 %v1158_v52, %v1056_v51 }
 0x1a4   : > { %2116 = vmatmul.mubr.f32.gmra.mxu0 %v1780_v39  ;;  %v1477_v60 = vadd.f32 %v1413_v48, %v1049_v44  ;;  %v1589_v1 = vadd.f32 %v1525_v54, %v875_v47  ;;  %v1051_v2 = vld [vmem:[%s4647_s12 + $0x1488] sm:$0xff]  ;;  %v1058_v4 = vld [vmem:[%s4647_s12 + $0x14c0] sm:$0xff]  ;;  %v889_v5 = vld [vmem:[%s4647_s12 + $0xf78] sm:$0xff] }
 0x1a5   : > { %v1334_v3 = vadd.f32 %v1270_v56, %v882_v50  ;;  %2195 = vmatprep.mubr.f32.mxu1 %v1732_v59  ;;  %v884_v31 = vld [vmem:[%s4647_s12 + $0xf50] sm:$0xff]  ;;  %v1286_v7 = vadd.f32 %v1222_v62, %v1057_v57  ;;  %v890_v8 = vld [vmem:[%s4647_s12 + $0xf80] sm:$0xff]  ;;  %v891_v9 = vld [vmem:[%s4647_s12 + $0xf88] sm:$0xff] }
 0x1a6   : > { %v1541_v6 = vadd.f32 %v1477_v60, %v1050_v55  ;;  %2196 = vmatmul.mubr.f32.gmra.mxu1 %v1796_v53  ;;  %v1653_v10 = vadd.f32 %v1589_v1, %v876_v58  ;;  %v1052_v11 = vld [vmem:[%s4647_s12 + $0x1490] sm:$0xff]  ;;  %v1053_v12 = vld [vmem:[%s4647_s12 + $0x1498] sm:$0xff]  ;;  %v1059_v63 = vld [vmem:[%s4647_s12 + $0x14c8] sm:$0xff]  ;;  %v1143_v14 = vadd.f32 %v890_v8, %v889_v5 }
 0x1a7   : > { %v1398_v13 = vadd.f32 %v1334_v3, %v883_v61  ;;  %v1781_v18 = vld [vmem:[%s4657_s29 + $0x158] sm:$0xff]  ;;  %v1350_v20 = vadd.f32 %v1286_v7, %v1058_v4  ;;  %v892_v21 = vld [vmem:[%s4647_s12 + $0xf90] sm:$0xff]  ;;  %v1066_v27 = vld [vmem:[%s4647_s12 + $0x1500] sm:$0xff] }
 0x1a8   : > { %v1605_v17 = vadd.f32 %v1541_v6, %v1051_v2  ;;  %v885_v19 = vld [vmem:[%s4647_s12 + $0xf58] sm:$0xff]  ;;  %v1717_v22 = vadd.f32 %v1653_v10, %v877_v36  ;;  %v1060_v25 = vld [vmem:[%s4647_s12 + $0x14d0] sm:$0xff]  ;;  %v1207_v26 = vadd.f32 %v1143_v14, %v891_v9  ;;  %v886_v29 = vld [vmem:[%s4647_s12 + $0xf60] sm:$0xff] }
 0x1a9   : > { %v1462_v23 = vadd.f32 %v1398_v13, %v884_v31  ;;  %v1065_v16 = vld [vmem:[%s4647_s12 + $0x14f8] sm:$0xff]  ;;  %v1414_v30 = vadd.f32 %v1350_v20, %v1059_v63  ;;  %v1067_v40 = vld [vmem:[%s4647_s12 + $0x1508] sm:$0xff]  ;;  %v1068_v39 = vld [vmem:[%s4647_s12 + $0x1510] sm:$0xff] }
 0x1aa   : > { %v1669_v28 = vadd.f32 %v1605_v17, %v1052_v11  ;;  %v893_v32 = vld [vmem:[%s4647_s12 + $0xf98] sm:$0xff]  ;;  %v1159_v33 = vadd.f32 %v1066_v27, %v1065_v16  ;;  %2120 = vmatprep.mubr.f32.mxu0 %v1717_v22  ;;  %v1271_v38 = vadd.f32 %v1207_v26, %v892_v21  ;;  %v887_v15 = vld [vmem:[%s4647_s12 + $0xf68] sm:$0xff]  ;;  %v888_v42 = vld [vmem:[%s4647_s12 + $0xf70] sm:$0xff] }
 0x1ab   : > { %v1797_v34 = vld [vmem:[%s4657_s29 + $0x1d8] sm:$0xff]  ;;  %v1526_v35 = vadd.f32 %v1462_v23, %v885_v19  ;;  %2121 = vmatmul.mubr.f32.gmra.mxu0 %v1781_v18  ;;  %v1478_v43 = vadd.f32 %v1414_v30, %v1060_v25  ;;  %v894_v49 = vld [vmem:[%s4647_s12 + $0xfa0] sm:$0xff]  ;;  %v900_v47 = vld [vmem:[%s4647_s12 + $0xfd0] sm:$0xff] }
 0x1ac   : > { %v1061_v37 = vld [vmem:[%s4647_s12 + $0x14d8] sm:$0xff]  ;;  %v1733_v41 = vadd.f32 %v1669_v28, %v1053_v12  ;;  %v1223_v44 = vadd.f32 %v1159_v33, %v1067_v40  ;;  %v1062_v24 = vld [vmem:[%s4647_s12 + $0x14e0] sm:$0xff]  ;;  %v1335_v46 = vadd.f32 %v1271_v38, %v893_v32  ;;  %v895_v50 = vld [vmem:[%s4647_s12 + $0xfa8] sm:$0xff] }
 0x1ad   : > { %v1590_v45 = vadd.f32 %v1526_v35, %v886_v29  ;;  %v1069_v0 = vld [vmem:[%s4647_s12 + $0x1518] sm:$0xff]  ;;  %v1542_v48 = vadd.f32 %v1478_v43, %v1061_v37  ;;  %v902_v53 = vld [vmem:[%s4647_s12 + $0xfe0] sm:$0xff]  ;;  %v1063_v55 = vld [vmem:[%s4647_s12 + $0x14e8] sm:$0xff] }
 0x1ae   : > { %2200 = vmatprep.mubr.f32.mxu1 %v1733_v41  ;;  %v1287_v51 = vadd.f32 %v1223_v44, %v1068_v39  ;;  %v901_v52 = vld [vmem:[%s4647_s12 + $0xfd8] sm:$0xff]  ;;  %v1064_v56 = vld [vmem:[%s4647_s12 + $0x14f0] sm:$0xff]  ;;  %v1399_v57 = vadd.f32 %v1335_v46, %v894_v49  ;;  %v1070_v59 = vld [vmem:[%s4647_s12 + $0x1520] sm:$0xff] }
 0x1af   : > { %2201 = vmatmul.mubr.f32.gmra.mxu1 %v1797_v34  ;;  %v1654_v54 = vadd.f32 %v1590_v45, %v887_v15  ;;  %v1144_v58 = vadd.f32 %v901_v52, %v900_v47  ;;  %v1606_v36 = vadd.f32 %v1542_v48, %v1062_v24  ;;  %v1782_v60 = vld [vmem:[%s4657_s29 + $0x160] sm:$0xff]  ;;  %v896_v61 = vld [vmem:[%s4647_s12 + $0xfb0] sm:$0xff]  ;;  %v903_v1 = vld [vmem:[%s4647_s12 + $0xfe8] sm:$0xff] }
 0x1b0   : > { %v1351_v62 = vadd.f32 %v1287_v51, %v1069_v0  ;;  %v1463_v3 = vadd.f32 %v1399_v57, %v895_v50  ;;  %v1071_v4 = vld [vmem:[%s4647_s12 + $0x1528] sm:$0xff]  ;;  %v1076_v6 = vld [vmem:[%s4647_s12 + $0x1550] sm:$0xff]  ;;  %v1077_v31 = vld [vmem:[%s4647_s12 + $0x1558] sm:$0xff] }
 0x1b1   : > { %v1718_v2 = vadd.f32 %v1654_v54, %v888_v42  ;;  %v1208_v5 = vadd.f32 %v1144_v58, %v902_v53  ;;  %v1670_v7 = vadd.f32 %v1606_v36, %v1063_v55  ;;  %v897_v8 = vld [vmem:[%s4647_s12 + $0xfb8] sm:$0xff]  ;;  %v904_v10 = vld [vmem:[%s4647_s12 + $0xff0] sm:$0xff]  ;;  %v1078_v11 = vld [vmem:[%s4647_s12 + $0x1560] sm:$0xff]  ;;  %v1160_v12 = vadd.f32 %v1077_v31, %v1076_v6 }
 0x1b2   : > { %v1415_v9 = vadd.f32 %v1351_v62, %v1070_v59  ;;  %v1798_v13 = vld [vmem:[%s4657_s29 + $0x1e0] sm:$0xff]  ;;  %v1527_v63 = vadd.f32 %v1463_v3, %v896_v61  ;;  %v1072_v14 = vld [vmem:[%s4647_s12 + $0x1530] sm:$0xff]  ;;  %v1079_v18 = vld [vmem:[%s4647_s12 + $0x1568] sm:$0xff]  ;;  %v5501_v19 = vpop.f32.mrf.mxu0 }
 0x1b3   : > { %2125 = vmatprep.mubr.f32.mxu0 %v1718_v2  ;;  %v1272_v17 = vadd.f32 %v1208_v5, %v903_v1  ;;  %v1734_v20 = vadd.f32 %v1670_v7, %v1064_v56  ;;  %v898_v21 = vld [vmem:[%s4647_s12 + $0xfc0] sm:$0xff]  ;;  %v899_v22 = vld [vmem:[%s4647_s12 + $0xfc8] sm:$0xff]  ;;  %v905_v25 = vld [vmem:[%s4647_s12 + $0xff8] sm:$0xff]  ;;  %v1224_v26 = vadd.f32 %v1160_v12, %v1078_v11 }
 0x1b4   : > { %2126 = vmatmul.mubr.f32.gmra.mxu0 %v1782_v60  ;;  %v1479_v23 = vadd.f32 %v1415_v9, %v1071_v4  ;;  %v1591_v16 = vadd.f32 %v1527_v63, %v897_v8  ;;  %v1073_v27 = vld [vmem:[%s4647_s12 + $0x1538] sm:$0xff]  ;;  %v1080_v29 = vld [vmem:[%s4647_s12 + $0x1570] sm:$0xff]  ;;  %v911_v30 = vld [vmem:[%s4647_s12 + $0x1028] sm:$0xff]  ;;  %v1909_v32 = vpop.f32.mrf.mxu0 }
 0x1b5   : > { %v1336_v28 = vadd.f32 %v1272_v17, %v904_v10  ;;  %2205 = vmatprep.mubr.f32.mxu1 %v1734_v20  ;;  %v906_v33 = vld [vmem:[%s4647_s12 + $0x1000] sm:$0xff]  ;;  %v1288_v34 = vadd.f32 %v1224_v26, %v1079_v18  ;;  %v912_v35 = vld [vmem:[%s4647_s12 + $0x1030] sm:$0xff]  ;;  %v913_v37 = vld [vmem:[%s4647_s12 + $0x1038] sm:$0xff] }
 0x1b6   : > { %v1543_v40 = vadd.f32 %v1479_v23, %v1072_v14  ;;  %2206 = vmatmul.mubr.f32.gmra.mxu1 %v1798_v13  ;;  %v1655_v38 = vadd.f32 %v1591_v16, %v898_v21  ;;  %v1074_v39 = vld [vmem:[%s4647_s12 + $0x1540] sm:$0xff]  ;;  %v1075_v41 = vld [vmem:[%s4647_s12 + $0x1548] sm:$0xff]  ;;  %v1081_v42 = vld [vmem:[%s4647_s12 + $0x1578] sm:$0xff]  ;;  %v1145_v43 = vadd.f32 %v912_v35, %v911_v30  ;;  %v1912_v49 = vpop.f32.mrf.mxu0 }
 0x1b7   : > { %v1400_v15 = vadd.f32 %v1336_v28, %v905_v25  ;;  %v1783_v45 = vld [vmem:[%s4657_s29 + $0x168] sm:$0xff]  ;;  %v1352_v46 = vadd.f32 %v1288_v34, %v1080_v29  ;;  %v914_v0 = vld [vmem:[%s4647_s12 + $0x1040] sm:$0xff]  ;;  %v1088_v53 = vld [vmem:[%s4647_s12 + $0x15b0] sm:$0xff] }
 0x1b8   : > { %v1607_v44 = vadd.f32 %v1543_v40, %v1073_v27  ;;  %v907_v24 = vld [vmem:[%s4647_s12 + $0x1008] sm:$0xff]  ;;  %v1719_v47 = vadd.f32 %v1655_v38, %v899_v22  ;;  %v1082_v50 = vld [vmem:[%s4647_s12 + $0x1580] sm:$0xff]  ;;  %v1209_v51 = vadd.f32 %v1145_v43, %v913_v37  ;;  %v1914_v54 = vpop.f32.mrf.mxu0  ;;  %v908_v56 = vld [vmem:[%s4647_s12 + $0x1010] sm:$0xff] }
 0x1b9   : > { %v1464_v48 = vadd.f32 %v1400_v15, %v906_v33  ;;  %v1087_v52 = vld [vmem:[%s4647_s12 + $0x15a8] sm:$0xff]  ;;  %v1416_v57 = vadd.f32 %v1352_v46, %v1081_v42  ;;  %v1089_v58 = vld [vmem:[%s4647_s12 + $0x15b8] sm:$0xff]  ;;  %v1090_v2 = vld [vmem:[%s4647_s12 + $0x15c0] sm:$0xff] }
 0x1ba   : > { %v1671_v55 = vadd.f32 %v1607_v44, %v1074_v39  ;;  %v915_v59 = vld [vmem:[%s4647_s12 + $0x1048] sm:$0xff]  ;;  %v1161_v36 = vadd.f32 %v1088_v53, %v1087_v52  ;;  %2130 = vmatprep.mubr.f32.mxu0 %v1719_v47  ;;  %v1273_v1 = vadd.f32 %v1209_v51, %v914_v0  ;;  %v1917_v3 = vpop.f32.mrf.mxu0  ;;  %v909_v5 = vld [vmem:[%s4647_s12 + $0x1018] sm:$0xff]  ;;  %v910_v6 = vld [vmem:[%s4647_s12 + $0x1020] sm:$0xff] }
 0x1bb   : > { %v1799_v60 = vld [vmem:[%s4657_s29 + $0x1e8] sm:$0xff]  ;;  %v1528_v61 = vadd.f32 %v1464_v48, %v907_v24  ;;  %2131 = vmatmul.mubr.f32.gmra.mxu0 %v1783_v45  ;;  %v1480_v31 = vadd.f32 %v1416_v57, %v1082_v50  ;;  %v916_v7 = vld [vmem:[%s4647_s12 + $0x1050] sm:$0xff]  ;;  %v5532_v13 = vld [vmem:[#allocation8] ss:$0 sm:$0xff] }
 0x1bc   : > { %v1083_v62 = vld [vmem:[%s4647_s12 + $0x1588] sm:$0xff]  ;;  %v1735_v4 = vadd.f32 %v1671_v55, %v1075_v41  ;;  %v1225_v8 = vadd.f32 %v1161_v36, %v1089_v58  ;;  %v1084_v10 = vld [vmem:[%s4647_s12 + $0x1590] sm:$0xff]  ;;  %v1337_v11 = vadd.f32 %v1273_v1, %v915_v59  ;;  %v1919_v63 = vpop.f32.mrf.mxu0  ;;  %v917_v17 = vld [vmem:[%s4647_s12 + $0x1058] sm:$0xff]  ;;  %v5537_v20 = vadd.f32 %v5532_v13, %v5501_v19 }
 0x1bd   : > { %v1592_v9 = vadd.f32 %v1528_v61, %v908_v56  ;;  %v1091_v12 = vld [vmem:[%s4647_s12 + $0x15c8] sm:$0xff]  ;;  %v1544_v14 = vadd.f32 %v1480_v31, %v1083_v62  ;;  %v5540_v21 = vadd.f32 %v5532_v13, %v1912_v49  ;;  %v2689_v22 = vld [vmem:[#allocation10 + $0x78] sm:$0xff]  ;;  %v2688_v23 = vld [vmem:[#allocation10 + $0x70] sm:$0xff]  ;;  %v5545_v28 = vadd.f32 %v5532_v13, %v1917_v3 }
 0x1be   : > { %2210 = vmatprep.mubr.f32.mxu1 %v1735_v4  ;;  %v1289_v18 = vadd.f32 %v1225_v8, %v1090_v2  ;;  %v1085_v26 = vld [vmem:[%s4647_s12 + $0x1598] sm:$0xff]  ;;  %v1401_v16 = vadd.f32 %v1337_v11, %v916_v7  ;;  %v1092_v27 = vld [vmem:[%s4647_s12 + $0x15d0] sm:$0xff]  ;;  %3549 = vmatprep.subr.mxu1 %v2689_v22  ;;  %v1922_v29 = vpop.f32.mrf.mxu0  ;;  %v918_v30 = vld [vmem:[%s4647_s12 + $0x1060] sm:$0xff]  ;;  %v3393_v40 = vmul.f32 -1.442695, %v5537_v20 }
 0x1bf   : > { %2211 = vmatmul.mubr.f32.gmra.mxu1 %v1799_v60  ;;  %v1656_v25 = vadd.f32 %v1592_v9, %v909_v5  ;;  %v1608_v19 = vadd.f32 %v1544_v14, %v1084_v10  ;;  %v3394_v33 = vmul.f32 -1.442695, %v5540_v21  ;;  %v2687_v34 = vld [vmem:[#allocation10 + $0x68] sm:$0xff]  ;;  %v1086_v37 = vld [vmem:[%s4647_s12 + $0x15a0] sm:$0xff]  ;;  %v1093_v41 = vld [vmem:[%s4647_s12 + $0x15d8] sm:$0xff]  ;;  %v5555_v42 = vadd.f32 %v5532_v13, %v1922_v29 }
 0x1c0   : > { %v1353_v32 = vadd.f32 %v1289_v18, %v1091_v12  ;;  %3550 = vmatpush3.msra.mxu1 %v2689_v22  ;;  %v1784_v38 = vld [vmem:[%s4657_s29 + $0x170] sm:$0xff]  ;;  %v1465_v39 = vadd.f32 %v1401_v16, %v917_v17  ;;  %v3395_v15 = vmul.f32 -1.442695, %v5545_v28  ;;  %v1924_v43 = vpop.f32.mrf.mxu0  ;;  %v919_v44 = vld [vmem:[%s4647_s12 + $0x1068] sm:$0xff]  ;;  %3834 = vpow2.f32 %v3393_v40  ;;  %v1094_v0 = vld [vmem:[%s4647_s12 + $0x15e0] sm:$0xff] }
 0x1c1   : > { %v1720_v35 = vadd.f32 %v1656_v25, %v910_v6  ;;  %3551 = vmatprep.subr.mxu1 %v2688_v23  ;;  %v1672_v49 = vadd.f32 %v1608_v19, %v1085_v26  ;;  %v2686_v24 = vld [vmem:[#allocation10 + $0x60] sm:$0xff]  ;;  %3836 = vpow2.f32 %v3394_v33  ;;  %v3396_v47 = vmul.f32 -1.442695, %v5555_v42  ;;  %v1800_v51 = vld [vmem:[%s4657_s29 + $0x1f0] sm:$0xff]  ;;  %v2685_v55 = vld [vmem:[#allocation10 + $0x58] sm:$0xff] }
 0x1c2   : > { %v1417_v45 = vadd.f32 %v1353_v32, %v1092_v27  ;;  %3552 = vmatpush3.msra.mxu1 %v2688_v23  ;;  %v1529_v46 = vadd.f32 %v1465_v39, %v918_v30  ;;  %v1927_v48 = vpop.f32.mrf.mxu0  ;;  %v920_v52 = vld [vmem:[%s4647_s12 + $0x1070] sm:$0xff]  ;;  %3838 = vpow2.f32 %v3395_v15  ;;  %v1095_v57 = vld [vmem:[%s4647_s12 + $0x15e8] sm:$0xff]  ;;  %v921_v58 = vld [vmem:[%s4647_s12 + $0x1078] sm:$0xff] }
 0x1c3   : > { %2135 = vmatprep.mubr.f32.mxu0 %v1720_v35  ;;  %3553 = vmatprep.subr.mxu1 %v2687_v34  ;;  %v1736_v50 = vadd.f32 %v1672_v49, %v1086_v37  ;;  %v5563_v54 = vadd.f32 %v5532_v13, %v1927_v48  ;;  %3840 = vpow2.f32 %v3396_v47  ;;  %v2684_v61 = vld [vmem:[#allocation10 + $0x50] sm:$0xff]  ;;  %v2683_v5 = vld [vmem:[#allocation10 + $0x48] sm:$0xff]  ;;  %v2682_v11 = vld [vmem:[#allocation10 + $0x40] sm:$0xff] }
 0x1c4   : > { %2136 = vmatmul.mubr.f32.gmra.mxu0 %v1784_v38  ;;  %v1481_v53 = vadd.f32 %v1417_v45, %v1093_v41  ;;  %3554 = vmatpush3.msra.mxu1 %v2687_v34  ;;  %v1593_v56 = vadd.f32 %v1529_v46, %v919_v44  ;;  %v1929_v59 = vpop.f32.mrf.mxu0  ;;  %v1096_v1 = vld [vmem:[%s4647_s12 + $0x15f0] sm:$0xff]  ;;  %v1097_v31 = vld [vmem:[%s4647_s12 + $0x15f8] sm:$0xff]  ;;  %v2678_v38 = vld [vmem:[#allocation10 + $0x20] sm:$0xff] }
 0x1c5   : > { %3555 = vmatprep.subr.mxu1 %v2686_v24  ;;  %2215 = vmatprep.mubr.f32.mxu1 %v1736_v50  ;;  %v3397_v60 = vmul.f32 -1.442695, %v5563_v54  ;;  %v1785_v7 = vld [vmem:[%s4657_s29 + $0x178] sm:$0xff]  ;;  %v2679_v30 = vld [vmem:[#allocation10 + $0x28] sm:$0xff] }
 0x1c6   : > { %v1545_v36 = vadd.f32 %v1481_v53, %v1094_v0  ;;  %3556 = vmatpush3.msra.mxu1 %v2686_v24  ;;  %v1657_v62 = vadd.f32 %v1593_v56, %v920_v52  ;;  %v1932_v2 = vpop.f32.mrf.mxu0  ;;  %v1801_v14 = vld [vmem:[%s4657_s29 + $0x1f8] sm:$0xff]  ;;  %v2675_v48 = vld [vmem:[#allocation10 + $0x8] sm:$0xff] }
 0x1c7   : > { %2216 = vmatmul.mubr.f32.gmra.mxu1 %v1800_v51  ;;  %3557 = vmatprep.subr.mxu1 %v2685_v55  ;;  %3842 = vpow2.f32 %v3397_v60  ;;  %v5570_v4 = vadd.f32 %v5532_v13, %v1932_v2  ;;  %v2681_v18 = vld [vmem:[#allocation10 + $0x38] sm:$0xff]  ;;  %v2680_v25 = vld [vmem:[#allocation10 + $0x30] sm:$0xff] }
 0x1c8   : > { %v1609_v3 = vadd.f32 %v1545_v36, %v1095_v57  ;;  %3558 = vmatpush3.msra.mxu1 %v2685_v55  ;;  %v1721_v6 = vadd.f32 %v1657_v62, %v921_v58  ;;  %v1934_v8 = vpop.f32.mrf.mxu0  ;;  %v2677_v43 = vld [vmem:[#allocation10 + $0x18] sm:$0xff]  ;;  %v2676_v46 = vld [vmem:[#allocation10 + $0x10] sm:$0xff]  ;;  %v2674_v55 = vld [vmem:[#allocation10] sm:$0xff] }
 0x1c9   : > { %3559 = vmatprep.subr.mxu1 %v2684_v61  ;;  %v3398_v10 = vmul.f32 -1.442695, %v5570_v4 }
 0x1ca   : > { %v1673_v9 = vadd.f32 %v1609_v3, %v1096_v1  ;;  %3560 = vmatpush3.msra.mxu1 %v2684_v61  ;;  %2140 = vmatprep.mubr.f32.mxu0 %v1721_v6  ;;  %v1937_v12 = vpop.f32.mrf.mxu0 }
 0x1cb   : > { %3561 = vmatprep.subr.mxu1 %v2683_v5  ;;  %2141 = vmatmul.mubr.f32.gmra.mxu0 %v1785_v7  ;;  %3844 = vpow2.f32 %v3398_v10  ;;  %v5577_v17 = vadd.f32 %v5532_v13, %v1937_v12 }
 0x1cc   : > { %v1737_v63 = vadd.f32 %v1673_v9, %v1097_v31  ;;  %3562 = vmatpush3.msra.mxu1 %v2683_v5  ;;  %v1939_v22 = vpop.f32.mrf.mxu0 }
 0x1cd   : > { %3563 = vmatprep.subr.mxu1 %v2682_v11  ;;  %v3399_v23 = vmul.f32 -1.442695, %v5577_v17  ;;  %v3835_v26 = vpop.eup %3834 }
 0x1ce   : > { %2220 = vmatprep.mubr.f32.mxu1 %v1737_v63  ;;  %3564 = vmatpush3.msra.mxu1 %v2682_v11  ;;  %v1942_v16 = vpop.f32.mrf.mxu0  ;;  %v3837_v27 = vpop.eup %3836  ;;  %v2418_v29 = vadd.f32 1.0, %v3835_v26 }
 0x1cf   : > { %2221 = vmatmul.mubr.f32.gmra.mxu1 %v1801_v14  ;;  %3565 = vmatprep.subr.mxu1 %v2681_v18  ;;  %3846 = vpow2.f32 %v3399_v23  ;;  %v5581_v19 = vadd.f32 %v5532_v13, %v1942_v16  ;;  %v3839_v32 = vpop.eup %3838  ;;  %v2419_v40 = vadd.f32 1.0, %v3837_v27 }
 0x1d0   : > { %3566 = vmatpush3.msra.mxu1 %v2681_v18  ;;  %v1944_v33 = vpop.f32.mrf.mxu0  ;;  %v3841_v34 = vpop.eup %3840  ;;  %3848 = vrcp.f32 %v2418_v29  ;;  %v2420_v35 = vadd.f32 1.0, %v3839_v32 }
 0x1d1   : > { %3567 = vmatprep.subr.mxu1 %v2680_v25  ;;  %v3400_v37 = vmul.f32 -1.442695, %v5581_v19  ;;  %3850 = vrcp.f32 %v2419_v40  ;;  %v2421_v39 = vadd.f32 1.0, %v3841_v34 }
 0x1d2   : > { %3568 = vmatpush3.msra.mxu1 %v2680_v25  ;;  %v1947_v41 = vpop.f32.mrf.mxu0  ;;  %3852 = vrcp.f32 %v2420_v35 }
 0x1d3   : > { %3569 = vmatprep.subr.mxu1 %v2679_v30  ;;  %v5585_v15 = vadd.f32 %v5532_v13, %v1947_v41  ;;  %3854 = vrcp.f32 %v2421_v39 }
 0x1d4   : > { %3570 = vmatpush3.msra.mxu1 %v2679_v30  ;;  %v3843_v49 = vpop.eup %3842  ;;  %v1949_v44 = vpop.f32.mrf.mxu0  ;;  %3856 = vpow2.f32 %v3400_v37 }
 0x1d5   : > { %3571 = vmatprep.subr.mxu1 %v2678_v38  ;;  %v2422_v45 = vadd.f32 1.0, %v3843_v49  ;;  %v3401_v24 = vmul.f32 -1.442695, %v5585_v15 }
 0x1d6   : > { %3572 = vmatpush3.msra.mxu1 %v2678_v38  ;;  %v1952_v0 = vpop.f32.mrf.mxu0 }
 0x1d7   : > { %3573 = vmatprep.subr.mxu1 %v2677_v43  ;;  %3858 = vrcp.f32 %v2422_v45  ;;  %v5589_v47 = vadd.f32 %v5532_v13, %v1952_v0 }
 0x1d8   : > { %3574 = vmatpush3.msra.mxu1 %v2677_v43  ;;  %v3845_v50 = vpop.eup %3844  ;;  %3860 = vpow2.f32 %v3401_v24  ;;  %v1954_v51 = vpop.f32.mrf.mxu0 }
 0x1d9   : > { %3575 = vmatprep.subr.mxu1 %v2676_v46  ;;  %v2423_v52 = vadd.f32 1.0, %v3845_v50  ;;  %v3402_v53 = vmul.f32 -1.442695, %v5589_v47 }
 0x1da   : > { %3576 = vmatpush3.msra.mxu1 %v2676_v46  ;;  %v1957_v56 = vpop.f32.mrf.mxu0 }
 0x1db   : > { %3577 = vmatprep.subr.mxu1 %v2675_v48  ;;  %3862 = vrcp.f32 %v2423_v52  ;;  %v5593_v57 = vadd.f32 %v5532_v13, %v1957_v56 }
 0x1dc   : > { %3578 = vmatpush3.msra.mxu1 %v2675_v48  ;;  %v3847_v59 = vpop.eup %3846  ;;  %3864 = vpow2.f32 %v3402_v53  ;;  %v1959_v58 = vpop.f32.mrf.mxu0 }
 0x1dd   : > { %3579 = vmatprep.subr.mxu1 %v2674_v55  ;;  %v2424_v36 = vadd.f32 1.0, %v3847_v59  ;;  %v3403_v60 = vmul.f32 -1.442695, %v5593_v57  ;;  %v3849_v61 = vpop.eup %3848 }
 0x1de   : > { %3580 = vmatpush3.msra.mxu1 %v2674_v55  ;;  %v1962_v62 = vpop.f32.mrf.mxu0  ;;  %v3851_v1 = vpop.eup %3850  ;;  %v2610_v2 = vmul.f32 %v3849_v61, %v5537_v20 }
 0x1df   : > { %3866 = vrcp.f32 %v2424_v36  ;;  %v5598_v3 = vadd.f32 %v5532_v13, %v1962_v62  ;;  %v3853_v5 = vpop.eup %3852  ;;  %v2611_v6 = vmul.f32 %v3851_v1, %v5540_v21 }
 0x1e0   : > { %3868 = vpow2.f32 %v3403_v60  ;;  %v1964_v31 = vpop.f32.mrf.mxu0  ;;  %v3855_v7 = vpop.eup %3854  ;;  %v2612_v8 = vmul.f32 %v3853_v5, %v5545_v28  ;;  %3581 = vmatprep.mubr.f32.mxu1 %v2610_v2 }
 0x1e1   : > { %v3404_v9 = vmul.f32 -1.442695, %v5598_v3  ;;  %v3857_v10 = vpop.eup %3856  ;;  %v2613_v11 = vmul.f32 %v3855_v7, %v5555_v42  ;;  %3582 = vmatmul.mubr.f32.vlgmr.msra.gmra.mxu1 %v2611_v6 }
 0x1e2   : > { %v1967_v20 = vpop.f32.mrf.mxu0  ;;  %v2425_v12 = vadd.f32 1.0, %v3857_v10  ;;  %3584 = vmatprep.mubr.f32.mxu1 %v2612_v8 }
 0x1e3   : > { %3870 = vpow2.f32 %v3404_v9  ;;  %v5605_v63 = vadd.f32 %v5532_v13, %v1967_v20 }
 0x1e4   : > { %v3859_v21 = vpop.eup %3858  ;;  %v1969_v14 = vpop.f32.mrf.mxu0  ;;  %3872 = vrcp.f32 %v2425_v12 }
 0x1e5   : > { %v3861_v18 = vpop.eup %3860  ;;  %v2614_v22 = vmul.f32 %v3859_v21, %v5563_v54  ;;  %v3405_v28 = vmul.f32 -1.442695, %v5605_v63  ;;  %3585 = vmatmul.mubr.f32.gmra.mxu1 %v2613_v11 }
 0x1e6   : > { %v2426_v23 = vadd.f32 1.0, %v3861_v18  ;;  %v1972_v25 = vpop.f32.mrf.mxu0 }
 0x1e7   : > { %3874 = vpow2.f32 %v3405_v28  ;;  %v5610_v42 = vadd.f32 %v5532_v13, %v1972_v25  ;;  %3587 = vmatprep.mubr.f32.mxu1 %v2614_v22 }
 0x1e8   : > { %v3863_v26 = vpop.eup %3862  ;;  %3876 = vrcp.f32 %v2426_v23  ;;  %v1974_v16 = vpop.f32.mrf.mxu0 }
 0x1e9   : > { %v3865_v27 = vpop.eup %3864  ;;  %v2615_v29 = vmul.f32 %v3863_v26, %v5570_v4  ;;  %v3406_v30 = vmul.f32 -1.442695, %v5610_v42 }
 0x1ea   : > { %v2427_v54 = vadd.f32 1.0, %v3865_v27  ;;  %v1977_v32 = vpop.f32.mrf.mxu0 }
 0x1eb   : > { %3878 = vpow2.f32 %v3406_v30  ;;  %v5615_v40 = vadd.f32 %v5532_v13, %v1977_v32  ;;  %3588 = vmatmul.mubr.f32.gmra.mxu1 %v2615_v29 }
 0x1ec   : > { %v3867_v33 = vpop.eup %3866  ;;  %3880 = vrcp.f32 %v2427_v54  ;;  %v1979_v34 = vpop.f32.mrf.mxu0 }
 0x1ed   : > { %v3869_v35 = vpop.eup %3868  ;;  %v2616_v37 = vmul.f32 %v3867_v33, %v5577_v17  ;;  %v3407_v38 = vmul.f32 -1.442695, %v5615_v40 }
 0x1ee   : > { %v2428_v39 = vadd.f32 1.0, %v3869_v35  ;;  %v1982_v41 = vpop.f32.mrf.mxu0 }
 0x1ef   : > { %3882 = vpow2.f32 %v3407_v38  ;;  %v5620_v4 = vadd.f32 %v5532_v13, %v1982_v41  ;;  %3590 = vmatprep.mubr.f32.mxu1 %v2616_v37 }
 0x1f0   : > { %v3871_v43 = vpop.eup %3870  ;;  %3884 = vrcp.f32 %v2428_v39  ;;  %v1984_v49 = vpop.f32.mrf.mxu0 }
 0x1f1   : > { %v2429_v44 = vadd.f32 1.0, %v3871_v43  ;;  %v3408_v45 = vmul.f32 -1.442695, %v5620_v4  ;;  %v3873_v24 = vpop.eup %3872 }
 0x1f2   : > { %v1987_v46 = vpop.f32.mrf.mxu0  ;;  %v2617_v0 = vmul.f32 %v3873_v24, %v5581_v19 }
 0x1f3   : > { %3886 = vrcp.f32 %v2429_v44  ;;  %v5625_v17 = vadd.f32 %v5532_v13, %v1987_v46 }
 0x1f4   : > { %v3875_v48 = vpop.eup %3874  ;;  %3888 = vpow2.f32 %v3408_v45  ;;  %v1989_v50 = vpop.f32.mrf.mxu0  ;;  %3591 = vmatmul.mubr.f32.gmra.mxu1 %v2617_v0 }
 0x1f5   : > { %v3877_v51 = vpop.eup %3876  ;;  %v2430_v52 = vadd.f32 1.0, %v3875_v48  ;;  %v3409_v53 = vmul.f32 -1.442695, %v5625_v17 }
 0x1f6   : > { %v2618_v55 = vmul.f32 %v3877_v51, %v5585_v15  ;;  %v1992_v56 = vpop.f32.mrf.mxu0 }
 0x1f7   : > { %3890 = vrcp.f32 %v2430_v52  ;;  %v5630_v59 = vadd.f32 %v5532_v13, %v1992_v56 }
 0x1f8   : > { %v3879_v19 = vpop.eup %3878  ;;  %3892 = vpow2.f32 %v3409_v53  ;;  %3593 = vmatprep.mubr.f32.mxu1 %v2618_v55  ;;  %v1994_v58 = vpop.f32.mrf.mxu0 }
 0x1f9   : > { %v3881_v36 = vpop.eup %3880  ;;  %v2431_v60 = vadd.f32 1.0, %v3879_v19  ;;  %v3410_v61 = vmul.f32 -1.442695, %v5630_v59 }
 0x1fa   : > { %v2619_v62 = vmul.f32 %v3881_v36, %v5589_v47  ;;  %v1997_v1 = vpop.f32.mrf.mxu0 }
 0x1fb   : > { %3894 = vrcp.f32 %v2431_v60  ;;  %v5635_v2 = vadd.f32 %v5532_v13, %v1997_v1 }
 0x1fc   : > { %v3883_v15 = vpop.eup %3882  ;;  %3896 = vpow2.f32 %v3410_v61  ;;  %3594 = vmatmul.mubr.f32.gmra.mxu1 %v2619_v62  ;;  %v1999_v5 = vpop.f32.mrf.mxu0 }
 0x1fd   : > { %v3885_v6 = vpop.eup %3884  ;;  %v2432_v31 = vadd.f32 1.0, %v3883_v15  ;;  %v3411_v7 = vmul.f32 -1.442695, %v5635_v2 }
 0x1fe   : > { %v2620_v8 = vmul.f32 %v3885_v6, %v5593_v57  ;;  %v2002_v9 = vpop.f32.mrf.mxu0 }
 0x1ff   : > { %3898 = vrcp.f32 %v2432_v31  ;;  %v5640_v10 = vadd.f32 %v5532_v13, %v2002_v9 }
 0x200   : > { %v3887_v47 = vpop.eup %3886  ;;  %3900 = vpow2.f32 %v3411_v7  ;;  %3596 = vmatprep.mubr.f32.mxu1 %v2620_v8  ;;  %v2004_v11 = vpop.f32.mrf.mxu0 }
 0x201   : > { %v3889_v20 = vpop.eup %3888  ;;  %v2621_v12 = vmul.f32 %v3887_v47, %v5598_v3  ;;  %v3412_v21 = vmul.f32 -1.442695, %v5640_v10 }
 0x202   : > { %v2433_v14 = vadd.f32 1.0, %v3889_v20  ;;  %v2007_v18 = vpop.f32.mrf.mxu0 }
 0x203   : > { %3902 = vpow2.f32 %v3412_v21  ;;  %v5645_v22 = vadd.f32 %v5532_v13, %v2007_v18  ;;  %3597 = vmatmul.mubr.f32.gmra.mxu1 %v2621_v12 }
 0x204   : > { %v3891_v57 = vpop.eup %3890  ;;  %3904 = vrcp.f32 %v2433_v14  ;;  %v2009_v28 = vpop.f32.mrf.mxu0 }
 0x205   : > { %v3893_v23 = vpop.eup %3892  ;;  %v2622_v25 = vmul.f32 %v3891_v57, %v5605_v63  ;;  %v3413_v26 = vmul.f32 -1.442695, %v5645_v22 }
 0x206   : > { %v2434_v16 = vadd.f32 1.0, %v3893_v23  ;;  %v2012_v27 = vpop.f32.mrf.mxu0 }
 0x207   : > { %3906 = vpow2.f32 %v3413_v26  ;;  %v5650_v3 = vadd.f32 %v5532_v13, %v2012_v27  ;;  %3599 = vmatprep.mubr.f32.mxu1 %v2622_v25 }
 0x208   : > { %v3895_v29 = vpop.eup %3894  ;;  %3908 = vrcp.f32 %v2434_v16  ;;  %v2014_v30 = vpop.f32.mrf.mxu0 }
 0x209   : > { %v3897_v54 = vpop.eup %3896  ;;  %v2623_v32 = vmul.f32 %v3895_v29, %v5610_v42  ;;  %v3414_v33 = vmul.f32 -1.442695, %v5650_v3 }
 0x20a   : > { %v2435_v34 = vadd.f32 1.0, %v3897_v54  ;;  %v2017_v35 = vpop.f32.mrf.mxu0 }
 0x20b   : > { %3910 = vpow2.f32 %v3414_v33  ;;  %v5655_v63 = vadd.f32 %v5532_v13, %v2017_v35  ;;  %3600 = vmatmul.mubr.f32.gmra.mxu1 %v2623_v32 }
 0x20c   : > { %v3899_v37 = vpop.eup %3898  ;;  %3912 = vrcp.f32 %v2435_v34  ;;  %v2019_v38 = vpop.f32.mrf.mxu0 }
 0x20d   : > { %v3901_v39 = vpop.eup %3900  ;;  %v2624_v41 = vmul.f32 %v3899_v37, %v5615_v40  ;;  %v3415_v43 = vmul.f32 -1.442695, %v5655_v63 }
 0x20e   : > { %v2436_v49 = vadd.f32 1.0, %v3901_v39  ;;  %v2022_v44 = vpop.f32.mrf.mxu0 }
 0x20f   : > { %3914 = vpow2.f32 %v3415_v43  ;;  %v5660_v42 = vadd.f32 %v5532_v13, %v2022_v44  ;;  %3602 = vmatprep.mubr.f32.mxu1 %v2624_v41 }
 0x210   : > { %v3903_v45 = vpop.eup %3902  ;;  %3916 = vrcp.f32 %v2436_v49  ;;  %v2024_v24 = vpop.f32.mrf.mxu0 }
 0x211   : > { %v3905_v46 = vpop.eup %3904  ;;  %v2437_v0 = vadd.f32 1.0, %v3903_v45  ;;  %v3416_v48 = vmul.f32 -1.442695, %v5660_v42 }
 0x212   : > { %v2625_v50 = vmul.f32 %v3905_v46, %v5620_v4  ;;  %v2027_v51 = vpop.f32.mrf.mxu0  ;;  %v5669_v60 = vpop.f32.mrf.mxu1 }
 0x213   : > { %3918 = vrcp.f32 %v2437_v0  ;;  %v5665_v40 = vadd.f32 %v5532_v13, %v2027_v51 }
 0x214   : > { %v3907_v52 = vpop.eup %3906  ;;  %3920 = vpow2.f32 %v3416_v48  ;;  %3603 = vmatmul.mubr.f32.gmra.mxu1 %v2625_v50  ;;  %v2029_v53 = vpop.f32.mrf.mxu0 }
 0x215   : > { %v3909_v55 = vpop.eup %3908  ;;  %v2438_v56 = vadd.f32 1.0, %v3907_v52  ;;  %v3417_v19 = vmul.f32 -1.442695, %v5665_v40  ;;  %v2149_v1 = vpop.f32.mrf.mxu1 }
 0x216   : > { %v2626_v58 = vmul.f32 %v3909_v55, %v5625_v17  ;;  %v2032_v36 = vpop.f32.mrf.mxu0 }
 0x217   : > { %3922 = vrcp.f32 %v2438_v56  ;;  %v5672_v4 = vadd.f32 %v5532_v13, %v2032_v36 }
 0x218   : > { %v3911_v61 = vpop.eup %3910  ;;  %3924 = vpow2.f32 %v3417_v19  ;;  %3605 = vmatprep.mubr.f32.mxu1 %v2626_v58  ;;  %v2034_v62 = vpop.f32.mrf.mxu0 }
 0x219   : > { %v3913_v15 = vpop.eup %3912  ;;  %v2439_v5 = vadd.f32 1.0, %v3911_v61  ;;  %v3418_v6 = vmul.f32 -1.442695, %v5672_v4  ;;  %v5681_v14 = vpop.f32.mrf.mxu1 }
 0x21a   : > { %v2627_v31 = vmul.f32 %v3913_v15, %v5630_v59  ;;  %v2037_v7 = vpop.f32.mrf.mxu0 }
 0x21b   : > { %3926 = vrcp.f32 %v2439_v5  ;;  %v5677_v17 = vadd.f32 %v5532_v13, %v2037_v7  ;;  %v2154_v28 = vpop.f32.mrf.mxu1 }
 0x21c   : > { %v3915_v8 = vpop.eup %3914  ;;  %3928 = vpow2.f32 %v3418_v6  ;;  %3606 = vmatmul.mubr.f32.gmra.mxu1 %v2627_v31  ;;  %v2039_v9 = vpop.f32.mrf.mxu0 }
 0x21d   : > { %v3917_v47 = vpop.eup %3916  ;;  %v2440_v11 = vadd.f32 1.0, %v3915_v8  ;;  %v3419_v20 = vmul.f32 -1.442695, %v5677_v17 }
 0x21e   : > { %v2628_v12 = vmul.f32 %v3917_v47, %v5635_v2  ;;  %v2042_v21 = vpop.f32.mrf.mxu0 }
 0x21f   : > { %3930 = vrcp.f32 %v2440_v11  ;;  %v5684_v59 = vadd.f32 %v5532_v13, %v2042_v21 }
 0x220   : > { %v3919_v18 = vpop.eup %3918  ;;  %3932 = vpow2.f32 %v3419_v20  ;;  %3608 = vmatprep.mubr.f32.mxu1 %v2628_v12  ;;  %v2044_v57 = vpop.f32.mrf.mxu0 }
 0x221   : > { %v3921_v23 = vpop.eup %3920  ;;  %v2629_v25 = vmul.f32 %v3919_v18, %v5640_v10  ;;  %v3420_v26 = vmul.f32 -1.442695, %v5684_v59  ;;  %v5693_v10 = vpop.f32.mrf.mxu1 }
 0x222   : > { %v2441_v16 = vadd.f32 1.0, %v3921_v23  ;;  %v2047_v27 = vpop.f32.mrf.mxu0 }
 0x223   : > { %3934 = vpow2.f32 %v3420_v26  ;;  %v5689_v2 = vadd.f32 %v5532_v13, %v2047_v27  ;;  %3609 = vmatmul.mubr.f32.gmra.mxu1 %v2629_v25  ;;  %v2159_v41 = vpop.f32.mrf.mxu1 }
 0x224   : > { %v3923_v29 = vpop.eup %3922  ;;  %3936 = vrcp.f32 %v2441_v16  ;;  %v2049_v30 = vpop.f32.mrf.mxu0 }
 0x225   : > { %v3925_v54 = vpop.eup %3924  ;;  %v2630_v32 = vmul.f32 %v3923_v29, %v5645_v22  ;;  %v3421_v33 = vmul.f32 -1.442695, %v5689_v2 }
 0x226   : > { %v2442_v34 = vadd.f32 1.0, %v3925_v54  ;;  %v2052_v35 = vpop.f32.mrf.mxu0 }
 0x227   : > { %3938 = vpow2.f32 %v3421_v33  ;;  %v5696_v37 = vadd.f32 %v5532_v13, %v2052_v35  ;;  %3611 = vmatprep.mubr.f32.mxu1 %v2630_v32 }
 0x228   : > { %v3927_v38 = vpop.eup %3926  ;;  %3940 = vrcp.f32 %v2442_v34  ;;  %v2054_v39 = vpop.f32.mrf.mxu0 }
 0x229   : > { %v3929_v43 = vpop.eup %3928  ;;  %v2631_v49 = vmul.f32 %v3927_v38, %v5650_v3  ;;  %v3422_v22 = vmul.f32 -1.442695, %v5696_v37  ;;  %v5705_v3 = vpop.f32.mrf.mxu1 }
 0x22a   : > { %v2443_v44 = vadd.f32 1.0, %v3929_v43  ;;  %v2057_v45 = vpop.f32.mrf.mxu0 }
 0x22b   : > { %3942 = vpow2.f32 %v3422_v22  ;;  %v5701_v24 = vadd.f32 %v5532_v13, %v2057_v45  ;;  %3612 = vmatmul.mubr.f32.gmra.mxu1 %v2631_v49  ;;  %v2164_v58 = vpop.f32.mrf.mxu1 }
 0x22c   : > { %v3931_v46 = vpop.eup %3930  ;;  %3944 = vrcp.f32 %v2443_v44  ;;  %v2059_v0 = vpop.f32.mrf.mxu0 }
 0x22d   : > { %v3933_v48 = vpop.eup %3932  ;;  %v2632_v50 = vmul.f32 %v3931_v46, %v5655_v63  ;;  %v3423_v51 = vmul.f32 -1.442695, %v5701_v24 }
 0x22e   : > { %v2444_v52 = vadd.f32 1.0, %v3933_v48  ;;  %v2062_v53 = vpop.f32.mrf.mxu0 }
 0x22f   : > { %3946 = vpow2.f32 %v3423_v51  ;;  %v5708_v55 = vadd.f32 %v5532_v13, %v2062_v53  ;;  %3614 = vmatprep.mubr.f32.mxu1 %v2632_v50 }
 0x230   : > { %v3935_v56 = vpop.eup %3934  ;;  %3948 = vrcp.f32 %v2444_v52  ;;  %v2064_v19 = vpop.f32.mrf.mxu0 }
 0x231   : > { %v3937_v36 = vpop.eup %3936  ;;  %v2445_v61 = vadd.f32 1.0, %v3935_v56  ;;  %v3424_v62 = vmul.f32 -1.442695, %v5708_v55 }
 0x232   : > { %v2633_v63 = vmul.f32 %v3937_v36, %v5660_v42  ;;  %v2067_v1 = vpop.f32.mrf.mxu0 }
 0x233   : > { %3950 = vrcp.f32 %v2445_v61  ;;  %v5713_v15 = vadd.f32 %v5532_v13, %v2067_v1  ;;  %v5717_v11 = vpop.f32.mrf.mxu1 }
 0x234   : > { %v3939_v5 = vpop.eup %3938  ;;  %3952 = vpow2.f32 %v3424_v62  ;;  %3615 = vmatmul.mubr.f32.gmra.mxu1 %v2633_v63  ;;  %v2069_v6 = vpop.f32.mrf.mxu0 }
 0x235   : > { %v3941_v31 = vpop.eup %3940  ;;  %v2446_v7 = vadd.f32 1.0, %v3939_v5  ;;  %v3425_v8 = vmul.f32 -1.442695, %v5713_v15  ;;  %v2169_v21 = vpop.f32.mrf.mxu1 }
 0x236   : > { %v2634_v9 = vmul.f32 %v3941_v31, %v5665_v40  ;;  %v2072_v47 = vpop.f32.mrf.mxu0 }
 0x237   : > { %3954 = vrcp.f32 %v2446_v7  ;;  %v5720_v42 = vadd.f32 %v5532_v13, %v2072_v47 }
 0x238   : > { %v3943_v20 = vpop.eup %3942  ;;  %3956 = vpow2.f32 %v3425_v8  ;;  %3617 = vmatprep.mubr.f32.mxu1 %v2634_v9  ;;  %v2074_v12 = vpop.f32.mrf.mxu0 }
 0x239   : > { %v3945_v18 = vpop.eup %3944  ;;  %v2447_v57 = vadd.f32 1.0, %v3943_v20  ;;  %v3426_v28 = vmul.f32 -1.442695, %v5720_v42 }
 0x23a   : > { %v2635_v23 = vmul.f32 %v3945_v18, %v5672_v4  ;;  %v2077_v25 = vpop.f32.mrf.mxu0 }
 0x23b   : > { %3958 = vrcp.f32 %v2447_v57  ;;  %v5725_v40 = vadd.f32 %v5532_v13, %v2077_v25 }
 0x23c   : > { %v3947_v26 = vpop.eup %3946  ;;  %3960 = vpow2.f32 %v3426_v28  ;;  %3618 = vmatmul.mubr.f32.gmra.mxu1 %v2635_v23  ;;  %v2079_v16 = vpop.f32.mrf.mxu0 }
 0x23d   : > { %v3949_v27 = vpop.eup %3948  ;;  %v2448_v29 = vadd.f32 1.0, %v3947_v26  ;;  %v3427_v30 = vmul.f32 -1.442695, %v5725_v40  ;;  %v5729_v33 = vpop.f32.mrf.mxu1  ;;  %v5760_v26 = vld [vmem:[#allocation8] ss:$0 sm:$0xff] }
 0x23e   : > { %v2636_v54 = vmul.f32 %v3949_v27, %v5677_v17  ;;  %v2082_v32 = vpop.f32.mrf.mxu0 }
 0x23f   : > { %3962 = vrcp.f32 %v2448_v29  ;;  %v5732_v4 = vadd.f32 %v5532_v13, %v2082_v32  ;;  %v2174_v38 = vpop.f32.mrf.mxu1 }
 0x240   : > { %v3951_v34 = vpop.eup %3950  ;;  %3964 = vpow2.f32 %v3427_v30  ;;  %3620 = vmatprep.mubr.f32.mxu1 %v2636_v54  ;;  %v2084_v35 = vpop.f32.mrf.mxu0 }
 0x241   : > { %v3953_v39 = vpop.eup %3952  ;;  %v2637_v41 = vmul.f32 %v3951_v34, %v5684_v59  ;;  %v3428_v43 = vmul.f32 -1.442695, %v5732_v4 }
 0x242   : > { %v2449_v49 = vadd.f32 1.0, %v3953_v39  ;;  %v2087_v22 = vpop.f32.mrf.mxu0 }
 0x243   : > { %3966 = vpow2.f32 %v3428_v43  ;;  %v5737_v17 = vadd.f32 %v5532_v13, %v2087_v22  ;;  %3621 = vmatmul.mubr.f32.gmra.mxu1 %v2637_v41 }
 0x244   : > { %v3955_v44 = vpop.eup %3954  ;;  %3968 = vrcp.f32 %v2449_v49  ;;  %v2089_v45 = vpop.f32.mrf.mxu0 }
 0x245   : > { %v3957_v46 = vpop.eup %3956  ;;  %v2638_v0 = vmul.f32 %v3955_v44, %v5689_v2  ;;  %v3429_v48 = vmul.f32 -1.442695, %v5737_v17  ;;  %v5741_v59 = vpop.f32.mrf.mxu1 }
 0x246   : > { %v2450_v50 = vadd.f32 1.0, %v3957_v46  ;;  %v2092_v51 = vpop.f32.mrf.mxu0 }
 0x247   : > { %3970 = vpow2.f32 %v3429_v48  ;;  %v5744_v52 = vadd.f32 %v5532_v13, %v2092_v51  ;;  %3623 = vmatprep.mubr.f32.mxu1 %v2638_v0  ;;  %v2179_v19 = vpop.f32.mrf.mxu1 }
 0x248   : > { %v3959_v53 = vpop.eup %3958  ;;  %3972 = vrcp.f32 %v2450_v50  ;;  %v2094_v56 = vpop.f32.mrf.mxu0 }
 0x249   : > { %v3961_v58 = vpop.eup %3960  ;;  %v2639_v36 = vmul.f32 %v3959_v53, %v5696_v37  ;;  %v3430_v2 = vmul.f32 -1.442695, %v5744_v52 }
 0x24a   : > { %v2451_v61 = vadd.f32 1.0, %v3961_v58  ;;  %v2097_v62 = vpop.f32.mrf.mxu0 }
 0x24b   : > { %3974 = vpow2.f32 %v3430_v2  ;;  %v5749_v63 = vadd.f32 %v5532_v13, %v2097_v62  ;;  %3624 = vmatmul.mubr.f32.gmra.mxu1 %v2639_v36 }
 0x24c   : > { %v3963_v1 = vpop.eup %3962  ;;  %3976 = vrcp.f32 %v2451_v61  ;;  %v2099_v5 = vpop.f32.mrf.mxu0 }
 0x24d   : > { %v3965_v6 = vpop.eup %3964  ;;  %v2640_v31 = vmul.f32 %v3963_v1, %v5701_v24  ;;  %v3431_v7 = vmul.f32 -1.442695, %v5749_v63  ;;  %v5753_v37 = vpop.f32.mrf.mxu1 }
 0x24e   : > { %v2452_v8 = vadd.f32 1.0, %v3965_v6  ;;  %v2102_v9 = vpop.f32.mrf.mxu0 }
 0x24f   : > { %3978 = vpow2.f32 %v3431_v7  ;;  %v5756_v47 = vadd.f32 %v5532_v13, %v2102_v9  ;;  %3626 = vmatprep.mubr.f32.mxu1 %v2640_v31  ;;  %v2184_v21 = vpop.f32.mrf.mxu1 }
 0x250   : > { %v3967_v20 = vpop.eup %3966  ;;  %3980 = vrcp.f32 %v2452_v8  ;;  %v2104_v12 = vpop.f32.mrf.mxu0 }
 0x251   : > { %v3969_v18 = vpop.eup %3968  ;;  %v2453_v57 = vadd.f32 1.0, %v3967_v20  ;;  %v3432_v28 = vmul.f32 -1.442695, %v5756_v47 }
 0x252   : > { %v2641_v24 = vmul.f32 %v3969_v18, %v5708_v55 }
 0x253   : > { %3982 = vrcp.f32 %v2453_v57  ;;  %v2107_v23 = vpop.f32.mrf.mxu0 }
 0x254   : > { %v3971_v25 = vpop.eup %3970  ;;  %3984 = vpow2.f32 %v3432_v28  ;;  %v5763_v13 = vadd.f32 %v5760_v26, %v2107_v23  ;;  %3627 = vmatmul.mubr.f32.gmra.mxu1 %v2641_v24 }
 0x255   : > { %v3973_v16 = vpop.eup %3972  ;;  %v2454_v27 = vadd.f32 1.0, %v3971_v25  ;;  %v2109_v29 = vpop.f32.mrf.mxu0 }
 0x256   : > { %v2642_v30 = vmul.f32 %v3973_v16, %v5713_v15  ;;  %v3433_v54 = vmul.f32 -1.442695, %v5763_v13  ;;  %v5767_v32 = vpop.f32.mrf.mxu1 }
 0x257   : > { %3986 = vrcp.f32 %v2454_v27 }
 0x258   : > { %v3975_v55 = vpop.eup %3974  ;;  %3988 = vpow2.f32 %v3433_v54  ;;  %v2189_v34 = vpop.f32.mrf.mxu1  ;;  %3629 = vmatprep.mubr.f32.mxu1 %v2642_v30 }
 0x259   : > { %v3977_v35 = vpop.eup %3976  ;;  %v2455_v38 = vadd.f32 1.0, %v3975_v55 }
 0x25a   : > { %v2643_v39 = vmul.f32 %v3977_v35, %v5720_v42 }
 0x25b   : > { %3990 = vrcp.f32 %v2455_v38  ;;  %v2112_v41 = vpop.f32.mrf.mxu0  ;;  %v5806_v38 = vadd.f32 %v5760_v26, %v5669_v60  ;;  %v5819_v60 = vadd.f32 %v5760_v26, %v5693_v10 }
 0x25c   : > { %v3979_v43 = vpop.eup %3978  ;;  %v5771_v49 = vadd.f32 %v5760_v26, %v2112_v41  ;;  %3630 = vmatmul.mubr.f32.gmra.mxu1 %v2643_v39 }
 0x25d   : > { %v3981_v15 = vpop.eup %3980  ;;  %v2456_v22 = vadd.f32 1.0, %v3979_v43  ;;  %v2114_v44 = vpop.f32.mrf.mxu0 }
 0x25e   : > { %v2644_v45 = vmul.f32 %v3981_v15, %v5725_v40  ;;  %v3434_v46 = vmul.f32 -1.442695, %v5771_v49  ;;  %v5775_v0 = vpop.f32.mrf.mxu1 }
 0x25f   : > { %3992 = vrcp.f32 %v2456_v22  ;;  %v5814_v22 = vadd.f32 %v5760_v26, %v5681_v14 }
 0x260   : > { %v3983_v48 = vpop.eup %3982  ;;  %3994 = vpow2.f32 %v3434_v46  ;;  %v2194_v42 = vpop.f32.mrf.mxu1  ;;  %3632 = vmatprep.mubr.f32.mxu1 %v2644_v45  ;;  %v3441_v46 = vmul.f32 -1.442695, %v5806_v38 }
 0x261   : > { %v3985_v50 = vpop.eup %3984  ;;  %v2645_v51 = vmul.f32 %v3983_v48, %v5732_v4 }
 0x262   : > { %v2457_v53 = vadd.f32 1.0, %v3985_v50 }
 0x263   : > { %3633 = vmatmul.mubr.f32.gmra.mxu1 %v2645_v51 }
 0x264   : > { %v2117_v56 = vpop.f32.mrf.mxu0  ;;  %v3987_v19 = vpop.eup %3986  ;;  %3996 = vrcp.f32 %v2457_v53  ;;  %v3443_v53 = vmul.f32 -1.442695, %v5819_v60 }
 0x265   : > { %v5779_v58 = vadd.f32 %v5760_v26, %v2117_v56  ;;  %v3989_v40 = vpop.eup %3988  ;;  %v2646_v36 = vmul.f32 %v3987_v19, %v5737_v17  ;;  %v5828_v56 = vadd.f32 %v5760_v26, %v5705_v3 }
 0x266   : > { %v2119_v2 = vpop.f32.mrf.mxu0  ;;  %v2458_v61 = vadd.f32 1.0, %v3989_v40  ;;  %v5783_v1 = vpop.f32.mrf.mxu1 }
 0x267   : > { %v3435_v62 = vmul.f32 -1.442695, %v5779_v58  ;;  %3635 = vmatprep.mubr.f32.mxu1 %v2646_v36  ;;  %v5835_v36 = vadd.f32 %v5760_v26, %v5717_v11  ;;  %v3444_v3 = vmul.f32 -1.442695, %v5828_v56  ;;  %v5845_v11 = vadd.f32 %v5760_v26, %v5729_v33 }
 0x268   : > { %v3991_v5 = vpop.eup %3990  ;;  %3998 = vrcp.f32 %v2458_v61  ;;  %v2199_v4 = vpop.f32.mrf.mxu1  ;;  %v5856_v33 = vadd.f32 %v5760_v26, %v5753_v37  ;;  %v5867_v37 = vadd.f32 %v5760_v26, %v5775_v0 }
 0x269   : > { %v2647_v6 = vmul.f32 %v3991_v5, %v5744_v52  ;;  %4000 = vpow2.f32 %v3435_v62  ;;  %v3445_v62 = vmul.f32 -1.442695, %v5835_v36 }
 0x26b   : > { %v2122_v31 = vpop.f32.mrf.mxu0  ;;  %3636 = vmatmul.mubr.f32.gmra.mxu1 %v2647_v6 }
 0x26c   : > { %v3993_v7 = vpop.eup %3992  ;;  %v5787_v8 = vadd.f32 %v5760_v26, %v2122_v31 }
 0x26d   : > { %v3995_v17 = vpop.eup %3994  ;;  %v2648_v9 = vmul.f32 %v3993_v7, %v5749_v63  ;;  %v2124_v20 = vpop.f32.mrf.mxu0 }
 0x26e   : > { %v2459_v12 = vadd.f32 1.0, %v3995_v17  ;;  %v3436_v21 = vmul.f32 -1.442695, %v5787_v8 }
 0x26f   : > { %v5791_v18 = vpop.f32.mrf.mxu1  ;;  %3638 = vmatprep.mubr.f32.mxu1 %v2648_v9 }
 0x270   : > { %4002 = vrcp.f32 %v2459_v12  ;;  %v5851_v12 = vadd.f32 %v5760_v26, %v5741_v59  ;;  %v5877_v0 = vadd.f32 %v5760_v26, %v5791_v18 }
 0x271   : > { %v2204_v57 = vpop.f32.mrf.mxu1  ;;  %v3997_v52 = vpop.eup %3996  ;;  %4004 = vpow2.f32 %v3436_v21 }
 0x272   : > { %v2649_v28 = vmul.f32 %v3997_v52, %v5756_v47  ;;  %v3446_v52 = vmul.f32 -1.442695, %v5845_v11  ;;  %v3452_v18 = vmul.f32 -1.442695, %v5877_v0 }
 0x274   : > { %v2127_v24 = vpop.f32.mrf.mxu0  ;;  %3639 = vmatmul.mubr.f32.gmra.mxu1 %v2649_v28 }
 0x275   : > { %v5795_v23 = vadd.f32 %v5760_v26, %v2127_v24  ;;  %v3999_v25 = vpop.eup %3998  ;;  %v3447_v24 = vmul.f32 -1.442695, %v5851_v12 }
 0x276   : > { %v2129_v63 = vpop.f32.mrf.mxu0  ;;  %v4001_v16 = vpop.eup %4000  ;;  %v2650_v27 = vmul.f32 %v3999_v25, %v5763_v13 }
 0x277   : > { %v3437_v29 = vmul.f32 -1.442695, %v5795_v23  ;;  %v5799_v30 = vpop.f32.mrf.mxu1  ;;  %v2460_v54 = vadd.f32 1.0, %v4001_v16 }
 0x278   : > { %3641 = vmatprep.mubr.f32.mxu1 %v2650_v27 }
 0x279   : > { %4006 = vpow2.f32 %v3437_v29  ;;  %v2209_v55 = vpop.f32.mrf.mxu1  ;;  %v3448_v29 = vmul.f32 -1.442695, %v5856_v33 }
 0x27a   : > { %4008 = vrcp.f32 %v2460_v54 }
 0x27b   : > { %v2132_v47 = vpop.f32.mrf.mxu0 }
 0x27c   : > { %v5802_v34 = vadd.f32 %v5760_v26, %v2132_v47 }
 0x27d   : > { %v4003_v35 = vpop.eup %4002  ;;  %v2134_v39 = vpop.f32.mrf.mxu0 }
 0x27e   : > { %v4005_v13 = vpop.eup %4004  ;;  %v2651_v41 = vmul.f32 %v4003_v35, %v5771_v49  ;;  %v3438_v43 = vmul.f32 -1.442695, %v5802_v34  ;;  %v3442_v49 = vmul.f32 -1.442695, %v5814_v22  ;;  %v3450_v39 = vmul.f32 -1.442695, %v5867_v37 }
 0x27f   : > { %v5810_v15 = vpop.f32.mrf.mxu1  ;;  %v2461_v44 = vadd.f32 1.0, %v4005_v13 }
 0x280   : > { %4010 = vpow2.f32 %v3438_v43  ;;  %3642 = vmatmul.mubr.f32.gmra.mxu1 %v2651_v41 }
 0x281   : > { %v2214_v45 = vpop.f32.mrf.mxu1  ;;  %4012 = vrcp.f32 %v2461_v44 }
 0x282   : > { %4014 = vpow2.f32 %v3441_v46 }
 0x283   : > { %4016 = vpow2.f32 %v3442_v49  ;;  %v5887_v49 = vadd.f32 %v5760_v26, %v5810_v15 }
 0x284   : > { %v2137_v48 = vpop.f32.mrf.mxu0 }
 0x285   : > { %v5823_v42 = vadd.f32 %v5760_v26, %v2137_v48  ;;  %v3454_v15 = vmul.f32 -1.442695, %v5887_v49 }
 0x286   : > { %v4007_v50 = vpop.eup %4006  ;;  %v2139_v14 = vpop.f32.mrf.mxu0 }
 0x287   : > { %v4009_v51 = vpop.eup %4008  ;;  %v2462_v19 = vadd.f32 1.0, %v4007_v50  ;;  %v3439_v10 = vmul.f32 -1.442695, %v5823_v42  ;;  %v5831_v40 = vpop.f32.mrf.mxu1  ;;  %v5895_v14 = vld [vmem:[#allocation11] ss:$0 sm:$0xff] }
 0x288   : > { %v2652_v2 = vmul.f32 %v4009_v51, %v5779_v58 }
 0x289   : > { %4018 = vrcp.f32 %v2462_v19  ;;  %v2219_v61 = vpop.f32.mrf.mxu1 }
 0x28a   : > { %4020 = vpow2.f32 %v3439_v10  ;;  %3644 = vmatprep.mubr.f32.mxu1 %v2652_v2 }
 0x28b   : > { %4022 = vpow2.f32 %v3443_v53  ;;  %v2142_v5 = vpop.f32.mrf.mxu0 }
 0x28c   : > { %v5841_v4 = vadd.f32 %v5760_v26, %v2142_v5  ;;  %4024 = vpow2.f32 %v3444_v3  ;;  %v4091_v3 = vld [vmem:[%s4657_s29 + $0x8] sm:$0xff] }
 0x28d   : > { %v4011_v6 = vpop.eup %4010  ;;  %v2144_v31 = vpop.f32.mrf.mxu0  ;;  %4026 = vpow2.f32 %v3445_v62 }
 0x28e   : > { %v4013_v7 = vpop.eup %4012  ;;  %v2463_v58 = vadd.f32 1.0, %v4011_v6  ;;  %v3440_v17 = vmul.f32 -1.442695, %v5841_v4 }
 0x28f   : > { %v2222_v9 = vpop.f32.mrf.mxu1  ;;  %v2653_v20 = vmul.f32 %v4013_v7, %v5787_v8  ;;  %v4015_v57 = vpop.eup %4014  ;;  %v5861_v8 = vadd.f32 %v5760_v26, %v5767_v32  ;;  %v5872_v32 = vadd.f32 %v5760_v26, %v5783_v1  ;;  %v5882_v1 = vadd.f32 %v5760_v26, %v5799_v30 }
 0x290   : > { %4028 = vrcp.f32 %v2463_v58  ;;  %v4017_v28 = vpop.eup %4016  ;;  %v2466_v63 = vadd.f32 1.0, %v4015_v57  ;;  %v5893_v30 = vadd.f32 %v5760_v26, %v5831_v40  ;;  %v5899_v19 = vadd.f32 %v5760_v26, %v2222_v9  ;;  %v4092_v9 = vld [vmem:[%s4657_s29] sm:$0xff] }
 0x291   : > { %v2224_v21 = vpop.f32.mrf.mxu1  ;;  %4030 = vpow2.f32 %v3440_v17  ;;  %3645 = vmatmul.mubr.f32.gmra.mxu1 %v2653_v20  ;;  %v3449_v55 = vmul.f32 -1.442695, %v5861_v8  ;;  %v2467_v47 = vadd.f32 1.0, %v4017_v28  ;;  %v3451_v41 = vmul.f32 -1.442695, %v5872_v32 }
 0x292   : > { %4032 = vpow2.f32 %v3446_v52  ;;  %v3453_v50 = vmul.f32 -1.442695, %v5882_v1  ;;  %v3455_v40 = vmul.f32 -1.442695, %v5893_v30  ;;  %v3456_v17 = vmul.f32 -1.442695, %v5899_v19 }
 0x293   : > { %4034 = vpow2.f32 %v3447_v24 }
 0x296   : > { %v4019_v59 = vpop.eup %4018 }
 0x297   : > { %v4021_v25 = vpop.eup %4020  ;;  %v2654_v16 = vmul.f32 %v4019_v59, %v5795_v23 }
 0x298   : > { %v4023_v27 = vpop.eup %4022  ;;  %v2464_v54 = vadd.f32 1.0, %v4021_v25 }
 0x299   : > { %3647 = vmatprep.mubr.f32.mxu1 %v2654_v16  ;;  %v2468_v23 = vadd.f32 1.0, %v4023_v27  ;;  %v4025_v35 = vpop.eup %4024 }
 0x29a   : > { %4036 = vrcp.f32 %v2464_v54  ;;  %v4027_v13 = vpop.eup %4026  ;;  %v2469_v45 = vadd.f32 1.0, %v4025_v35 }
 0x29b   : > { %4038 = vrcp.f32 %v2466_v63 }
 0x29c   : > { %4040 = vpow2.f32 %v3448_v29  ;;  %v4094_v29 = vld [vmem:[%s4657_s29 + $0x10] sm:$0xff] }
 0x29d   : > { %4042 = vpow2.f32 %v3449_v55  ;;  %v4029_v43 = vpop.eup %4028 }
 0x29e   : > { %4044 = vrcp.f32 %v2467_v47  ;;  %v4031_v44 = vpop.eup %4030  ;;  %v2655_v46 = vmul.f32 %v4029_v43, %v5802_v34  ;;  %v2470_v34 = vadd.f32 1.0, %v4027_v13  ;;  %v4095_v43 = vld [vmem:[%s4657_s29 + $0x28] sm:$0xff] }
 0x29f   : > { %4046 = vrcp.f32 %v2468_v23  ;;  %v2465_v48 = vadd.f32 1.0, %v4031_v44  ;;  %v4033_v53 = vpop.eup %4032 }
 0x2a0   : > { %4048 = vpow2.f32 %v3450_v39  ;;  %3648 = vmatmul.mubr.f32.gmra.mxu1 %v2655_v46  ;;  %v4035_v61 = vpop.eup %4034  ;;  %v2471_v31 = vadd.f32 1.0, %v4033_v53 }
 0x2a1   : > { %4050 = vpow2.f32 %v3451_v41  ;;  %v3583_v51 = vpop.f32.mrf.mxu1  ;;  %v2472_v52 = vadd.f32 1.0, %v4035_v61 }
 0x2a2   : > { %4052 = vrcp.f32 %v2465_v48  ;;  %v2769_v10 = vadd.f32 %v3583_v51, %v5895_v14  ;;  %v4096_v51 = vld [vmem:[%s4657_s29 + $0x20] sm:$0xff] }
 0x2a3   : > { %4054 = vrcp.f32 %v2469_v45  ;;  %v2763_v2 = vpop.f32.mrf.mxu1 }
 0x2a4   : > { %4056 = vpow2.f32 %v3452_v18  ;;  %v3083_v62 = vadd.f32 %v4091_v3, %v2769_v10  ;;  %v2764_v5 = vadd.f32 %v5895_v14, %v2763_v2 }
 0x2a5   : > { %4058 = vpow2.f32 %v3453_v50  ;;  %v3586_v7 = vpop.f32.mrf.mxu1 }
 0x2a6   : > { %4060 = vrcp.f32 %v2470_v34  ;;  %3147 = vst [vmem:[%s5909_s8 + $0x8] sm:$0xff] %v3083_v62  ;;  %v3082_v20 = vadd.f32 %v4092_v9, %v2764_v5  ;;  %v2779_v21 = vadd.f32 %v3586_v7, %v5895_v14  ;;  %v4097_v9 = vld [vmem:[%s4657_s29 + $0x38] sm:$0xff] }
 0x2a7   : > { %v4037_v6 = vpop.eup %4036  ;;  %4062 = vpow2.f32 %v3454_v15  ;;  %v2773_v28 = vpop.f32.mrf.mxu1 }
 0x2a8   : > { %v4039_v26 = vpop.eup %4038  ;;  %v2656_v58 = vmul.f32 %v4037_v6, %v5823_v42  ;;  %4064 = vpow2.f32 %v3455_v40  ;;  %3146 = vst [vmem:[%s5909_s8] sm:$0xff] %v3082_v20  ;;  %v4093_v42 = vld [vmem:[%s4657_s29 + $0x18] sm:$0xff]  ;;  %v2774_v25 = vadd.f32 %v5895_v14, %v2773_v28 }
 0x2a9   : > { %v4041_v57 = vpop.eup %4040  ;;  %v3085_v59 = vadd.f32 %v4093_v42, %v2779_v21  ;;  %4066 = vrcp.f32 %v2471_v31  ;;  %v2658_v34 = vmul.f32 %v4039_v26, %v5806_v38 }
 0x2aa   : > { %v4043_v24 = vpop.eup %4042  ;;  %3650 = vmatprep.mubr.f32.mxu1 %v2656_v58  ;;  %v2473_v27 = vadd.f32 1.0, %v4041_v57  ;;  %4068 = vpow2.f32 %v3456_v17  ;;  %v3084_v54 = vadd.f32 %v4094_v29, %v2774_v25 }
 0x2ab   : > { %v4045_v63 = vpop.eup %4044  ;;  %3149 = vst [vmem:[%s5909_s8 + $0x18] sm:$0xff] %v3085_v59  ;;  %v3589_v55 = vpop.f32.mrf.mxu1  ;;  %4070 = vrcp.f32 %v2472_v52  ;;  %v2474_v23 = vadd.f32 1.0, %v4043_v24  ;;  %v4098_v52 = vld [vmem:[%s4657_s29 + $0x30] sm:$0xff] }
 0x2ac   : > { %v4047_v16 = vpop.eup %4046  ;;  %v2789_v35 = vadd.f32 %v3589_v55, %v5895_v14  ;;  %3148 = vst [vmem:[%s5909_s8 + $0x10] sm:$0xff] %v3084_v54  ;;  %4072 = vrcp.f32 %v2473_v27  ;;  %v2659_v61 = vmul.f32 %v4045_v63, %v5814_v22 }
 0x2ad   : > { %v4049_v47 = vpop.eup %4048  ;;  %v2783_v13 = vpop.f32.mrf.mxu1  ;;  %4074 = vrcp.f32 %v2474_v23  ;;  %v4100_v23 = vld [vmem:[%s4657_s29 + $0x40] sm:$0xff] }
 0x2ae   : > { %v4051_v39 = vpop.eup %4050  ;;  %v3087_v44 = vadd.f32 %v4095_v43, %v2789_v35  ;;  %v2784_v45 = vadd.f32 %v5895_v14, %v2783_v13  ;;  %v2475_v18 = vadd.f32 1.0, %v4049_v47 }
 0x2af   : > { %v4053_v41 = vpop.eup %4052  ;;  %v2476_v15 = vadd.f32 1.0, %v4051_v39 }
 0x2b0   : > { %v4055_v46 = vpop.eup %4054  ;;  %v2657_v48 = vmul.f32 %v4053_v41, %v5841_v4  ;;  %3151 = vst [vmem:[%s5909_s8 + $0x28] sm:$0xff] %v3087_v44  ;;  %v3086_v53 = vadd.f32 %v4096_v51, %v2784_v45  ;;  %4076 = vrcp.f32 %v2475_v18  ;;  %v2660_v4 = vmul.f32 %v4047_v16, %v5819_v60  ;;  %v4101_v45 = vld [vmem:[%s4657_s29 + $0x58] sm:$0xff] }
 0x2b1   : > { %v4057_v50 = vpop.eup %4056  ;;  %4078 = vrcp.f32 %v2476_v15  ;;  %v2661_v7 = vmul.f32 %v4055_v46, %v5828_v56 }
 0x2b2   : > { %v4059_v10 = vpop.eup %4058  ;;  %3651 = vmatmul.mubr.f32.gmra.mxu1 %v2657_v48  ;;  %3150 = vst [vmem:[%s5909_s8 + $0x20] sm:$0xff] %v3086_v53  ;;  %v2477_v3 = vadd.f32 1.0, %v4057_v50 }
 0x2b3   : > { %v4061_v40 = vpop.eup %4060  ;;  %3653 = vmatprep.mubr.f32.mxu1 %v2658_v34  ;;  %v2478_v38 = vadd.f32 1.0, %v4059_v10  ;;  %v4102_v34 = vld [vmem:[%s4657_s29 + $0x50] sm:$0xff] }
 0x2b4   : > { %v4063_v2 = vpop.eup %4062  ;;  %v3592_v5 = vpop.f32.mrf.mxu1  ;;  %v2662_v22 = vmul.f32 %v4061_v40, %v5835_v36  ;;  %4080 = vrcp.f32 %v2477_v3 }
 0x2b5   : > { %v4065_v62 = vpop.eup %4064  ;;  %v2799_v6 = vadd.f32 %v3592_v5, %v5895_v14  ;;  %v2479_v26 = vadd.f32 1.0, %v4063_v2  ;;  %4082 = vrcp.f32 %v2478_v38  ;;  %v4103_v2 = vld [vmem:[%s4657_s29 + $0x68] sm:$0xff] }
 0x2b6   : > { %3654 = vmatmul.mubr.f32.gmra.mxu1 %v2659_v61  ;;  %v4067_v31 = vpop.eup %4066  ;;  %v2793_v58 = vpop.f32.mrf.mxu1  ;;  %v2480_v17 = vadd.f32 1.0, %v4065_v62 }
 0x2b7   : > { %3656 = vmatprep.mubr.f32.mxu1 %v2660_v4  ;;  %v4069_v60 = vpop.eup %4068  ;;  %v3089_v20 = vadd.f32 %v4097_v9, %v2799_v6  ;;  %v2794_v21 = vadd.f32 %v5895_v14, %v2793_v58  ;;  %v2663_v56 = vmul.f32 %v4067_v31, %v5845_v11  ;;  %4084 = vrcp.f32 %v2479_v26  ;;  %v4099_v11 = vld [vmem:[%s4657_s29 + $0x48] sm:$0xff]  ;;  %v4104_v4 = vld [vmem:[%s4657_s29 + $0x60] sm:$0xff]  ;;  %v4105_v6 = vld [vmem:[%s4657_s29 + $0x78] sm:$0xff] }
 0x2b8   : > { %v4071_v57 = vpop.eup %4070  ;;  %v2481_v36 = vadd.f32 1.0, %v4069_v60  ;;  %4086 = vrcp.f32 %v2480_v17  ;;  %v4107_v17 = vld [vmem:[%s4657_s29 + $0x88] sm:$0xff] }
 0x2b9   : > { %3153 = vst [vmem:[%s5909_s8 + $0x38] sm:$0xff] %v3089_v20  ;;  %v3088_v28 = vadd.f32 %v4098_v52, %v2794_v21  ;;  %v4073_v24 = vpop.eup %4072  ;;  %v2664_v42 = vmul.f32 %v4071_v57, %v5851_v12  ;;  %v4108_v21 = vld [vmem:[%s4657_s29 + $0x80] sm:$0xff] }
 0x2ba   : > { %3657 = vmatmul.mubr.f32.gmra.mxu1 %v2661_v7  ;;  %v4075_v25 = vpop.eup %4074  ;;  %v2665_v27 = vmul.f32 %v4073_v24, %v5856_v33  ;;  %4088 = vrcp.f32 %v2481_v36  ;;  %v4109_v36 = vld [vmem:[%s4657_s29 + $0x98] sm:$0xff] }
 0x2bb   : > { %3659 = vmatprep.mubr.f32.mxu1 %v2662_v22  ;;  %3152 = vst [vmem:[%s5909_s8 + $0x30] sm:$0xff] %v3088_v28  ;;  %v2666_v55 = vmul.f32 %v4075_v25, %v5861_v8  ;;  %v4106_v22 = vld [vmem:[%s4657_s29 + $0x70] sm:$0xff] }
 0x2bc   : > { %v3595_v59 = vpop.f32.mrf.mxu1 }
 0x2bd   : > { %v2809_v63 = vadd.f32 %v3595_v59, %v5895_v14  ;;  %v4077_v12 = vpop.eup %4076  ;;  %v4110_v59 = vld [vmem:[%s4657_s29 + $0x90] sm:$0xff] }
 0x2be   : > { %3660 = vmatmul.mubr.f32.gmra.mxu1 %v2663_v56  ;;  %v2803_v16 = vpop.f32.mrf.mxu1  ;;  %v4079_v47 = vpop.eup %4078  ;;  %v2667_v39 = vmul.f32 %v4077_v12, %v5867_v37  ;;  %v4112_v12 = vld [vmem:[%s4657_s29 + $0xa0] sm:$0xff] }
 0x2bf   : > { %3662 = vmatprep.mubr.f32.mxu1 %v2664_v42  ;;  %v3091_v29 = vadd.f32 %v4099_v11, %v2809_v63  ;;  %v2804_v54 = vadd.f32 %v5895_v14, %v2803_v16  ;;  %v2668_v41 = vmul.f32 %v4079_v47, %v5872_v32  ;;  %v4111_v11 = vld [vmem:[%s4657_s29 + $0xa8] sm:$0xff] }
 0x2c1   : > { %3155 = vst [vmem:[%s5909_s8 + $0x48] sm:$0xff] %v3091_v29  ;;  %v3090_v35 = vadd.f32 %v4100_v23, %v2804_v54  ;;  %v4081_v13 = vpop.eup %4080 }
 0x2c2   : > { %3663 = vmatmul.mubr.f32.gmra.mxu1 %v2665_v27  ;;  %v4083_v44 = vpop.eup %4082  ;;  %v2669_v37 = vmul.f32 %v4081_v13, %v5877_v0 }
 0x2c3   : > { %3665 = vmatprep.mubr.f32.mxu1 %v2666_v55  ;;  %3154 = vst [vmem:[%s5909_s8 + $0x40] sm:$0xff] %v3090_v35  ;;  %v3598_v33 = vpop.f32.mrf.mxu1  ;;  %v2670_v50 = vmul.f32 %v4083_v44, %v5882_v1 }
 0x2c4   : > { %v2819_v43 = vadd.f32 %v3598_v33, %v5895_v14  ;;  %v4085_v48 = vpop.eup %4084 }
 0x2c5   : > { %v2813_v8 = vpop.f32.mrf.mxu1  ;;  %v4087_v15 = vpop.eup %4086  ;;  %v2671_v51 = vmul.f32 %v4085_v48, %v5887_v49  ;;  %v4116_v48 = vld [vmem:[%s4657_s29 + $0xc0] sm:$0xff] }
 0x2c6   : > { %3666 = vmatmul.mubr.f32.gmra.mxu1 %v2667_v39  ;;  %v3093_v46 = vadd.f32 %v4101_v45, %v2819_v43  ;;  %v2814_v18 = vadd.f32 %v5895_v14, %v2813_v8  ;;  %v2672_v0 = vmul.f32 %v4087_v15, %v5893_v30  ;;  %v4113_v39 = vld [vmem:[%s4657_s29 + $0xb8] sm:$0xff] }
 0x2c7   : > { %3668 = vmatprep.mubr.f32.mxu1 %v2668_v41  ;;  %v4089_v10 = vpop.eup %4088  ;;  %v4114_v41 = vld [vmem:[%s4657_s29 + $0xb0] sm:$0xff] }
 0x2c8   : > { %3157 = vst [vmem:[%s5909_s8 + $0x58] sm:$0xff] %v3093_v46  ;;  %v3092_v32 = vadd.f32 %v4102_v34, %v2814_v18  ;;  %v2673_v49 = vmul.f32 %v4089_v10, %v5899_v19  ;;  %v4115_v46 = vld [vmem:[%s4657_s29 + $0xc8] sm:$0xff] }
 0x2ca   : > { %3669 = vmatmul.mubr.f32.gmra.mxu1 %v2669_v37  ;;  %3156 = vst [vmem:[%s5909_s8 + $0x50] sm:$0xff] %v3092_v32 }
 0x2cb   : > { %3671 = vmatprep.mubr.f32.mxu1 %v2670_v50  ;;  %v3601_v53 = vpop.f32.mrf.mxu1 }
 0x2cc   : > { %v2829_v40 = vadd.f32 %v3601_v53, %v5895_v14 }
 0x2cd   : > { %v2823_v1 = vpop.f32.mrf.mxu1 }
 0x2ce   : > { %3672 = vmatmul.mubr.f32.gmra.mxu1 %v2671_v51  ;;  %v3095_v61 = vadd.f32 %v4103_v2, %v2829_v40  ;;  %v2824_v3 = vadd.f32 %v5895_v14, %v2823_v1  ;;  %v4117_v51 = vld [vmem:[%s4657_s29 + $0xd8] sm:$0xff] }
 0x2cf   : > { %3674 = vmatprep.mubr.f32.mxu1 %v2672_v0  ;;  %v4118_v0 = vld [vmem:[%s4657_s29 + $0xd0] sm:$0xff] }
 0x2d0   : > { %3159 = vst [vmem:[%s5909_s8 + $0x68] sm:$0xff] %v3095_v61  ;;  %v3094_v38 = vadd.f32 %v4104_v4, %v2824_v3  ;;  %v4119_v3 = vld [vmem:[%s4657_s29 + $0xe8] sm:$0xff] }
 0x2d2   : > { %3675 = vmatmul.mubr.f32.gmra.mxu1 %v2673_v49  ;;  %3158 = vst [vmem:[%s5909_s8 + $0x60] sm:$0xff] %v3094_v38  ;;  %v4120_v38 = vld [vmem:[%s4657_s29 + $0xe0] sm:$0xff] }
 0x2d4   : > { %v3604_v30 = vpop.f32.mrf.mxu1 }
 0x2d5   : > { %v2839_v62 = vadd.f32 %v3604_v30, %v5895_v14 }
 0x2d6   : > { %v2833_v5 = vpop.f32.mrf.mxu1 }
 0x2d7   : > { %v3097_v31 = vadd.f32 %v4105_v6, %v2839_v62  ;;  %v2834_v7 = vadd.f32 %v5895_v14, %v2833_v5 }
 0x2d9   : > { %3161 = vst [vmem:[%s5909_s8 + $0x78] sm:$0xff] %v3097_v31  ;;  %v3096_v19 = vadd.f32 %v4106_v22, %v2834_v7  ;;  %v4121_v31 = vld [vmem:[%s4657_s29 + $0xf8] sm:$0xff] }
 0x2db   : > { %3160 = vst [vmem:[%s5909_s8 + $0x70] sm:$0xff] %v3096_v19  ;;  %v4122_v19 = vld [vmem:[%s4657_s29 + $0xf0] sm:$0xff] }
 0x2dc   : > { %v3607_v26 = vpop.f32.mrf.mxu1 }
 0x2dd   : > { %v2849_v58 = vadd.f32 %v3607_v26, %v5895_v14 }
 0x2de   : > { %v2843_v60 = vpop.f32.mrf.mxu1 }
 0x2df   : > { %v3099_v9 = vadd.f32 %v4107_v17, %v2849_v58  ;;  %v2844_v20 = vadd.f32 %v5895_v14, %v2843_v60 }
 0x2e1   : > { %3163 = vst [vmem:[%s5909_s8 + $0x88] sm:$0xff] %v3099_v9  ;;  %v3098_v57 = vadd.f32 %v4108_v21, %v2844_v20  ;;  %v4123_v9 = vld [vmem:[%s4657_s29 + $0x108] sm:$0xff] }
 0x2e3   : > { %3162 = vst [vmem:[%s5909_s8 + $0x80] sm:$0xff] %v3098_v57  ;;  %v3610_v52 = vpop.f32.mrf.mxu1  ;;  %v4124_v57 = vld [vmem:[%s4657_s29 + $0x100] sm:$0xff] }
 0x2e4   : > { %v2859_v28 = vadd.f32 %v3610_v52, %v5895_v14 }
 0x2e5   : > { %v2853_v56 = vpop.f32.mrf.mxu1 }
 0x2e6   : > { %v3101_v24 = vadd.f32 %v4109_v36, %v2859_v28  ;;  %v2854_v42 = vadd.f32 %v5895_v14, %v2853_v56 }
 0x2e8   : > { %3165 = vst [vmem:[%s5909_s8 + $0x98] sm:$0xff] %v3101_v24  ;;  %v3100_v25 = vadd.f32 %v4110_v59, %v2854_v42  ;;  %v4125_v24 = vld [vmem:[%s4657_s29 + $0x118] sm:$0xff] }
 0x2ea   : > { %3164 = vst [vmem:[%s5909_s8 + $0x90] sm:$0xff] %v3100_v25  ;;  %v4126_v25 = vld [vmem:[%s4657_s29 + $0x110] sm:$0xff] }
 0x2eb   : > { %v3613_v63 = vpop.f32.mrf.mxu1 }
 0x2ec   : > { %v2869_v16 = vadd.f32 %v3613_v63, %v5895_v14 }
 0x2ed   : > { %v2863_v27 = vpop.f32.mrf.mxu1 }
 0x2ee   : > { %v3103_v29 = vadd.f32 %v4111_v11, %v2869_v16  ;;  %v2864_v54 = vadd.f32 %v5895_v14, %v2863_v27 }
 0x2f0   : > { %3167 = vst [vmem:[%s5909_s8 + $0xa8] sm:$0xff] %v3103_v29  ;;  %v3102_v55 = vadd.f32 %v4112_v12, %v2864_v54  ;;  %v4127_v29 = vld [vmem:[%s4657_s29 + $0x128] sm:$0xff] }
 0x2f2   : > { %3166 = vst [vmem:[%s5909_s8 + $0xa0] sm:$0xff] %v3102_v55  ;;  %v4128_v55 = vld [vmem:[%s4657_s29 + $0x120] sm:$0xff] }
 0x2f4   : > { %v3616_v47 = vpop.f32.mrf.mxu1 }
 0x2f5   : > { %v2879_v23 = vadd.f32 %v3616_v47, %v5895_v14 }
 0x2f6   : > { %v2873_v35 = vpop.f32.mrf.mxu1 }
 0x2f7   : > { %v3105_v33 = vadd.f32 %v4113_v39, %v2879_v23  ;;  %v2874_v13 = vadd.f32 %v5895_v14, %v2873_v35 }
 0x2f9   : > { %3169 = vst [vmem:[%s5909_s8 + $0xb8] sm:$0xff] %v3105_v33  ;;  %v3104_v43 = vadd.f32 %v4114_v41, %v2874_v13  ;;  %v4129_v33 = vld [vmem:[%s4657_s29 + $0x138] sm:$0xff] }
 0x2fb   : > { %3168 = vst [vmem:[%s5909_s8 + $0xb0] sm:$0xff] %v3104_v43  ;;  %v4130_v43 = vld [vmem:[%s4657_s29 + $0x130] sm:$0xff] }
 0x2fc   : > { %v3619_v44 = vpop.f32.mrf.mxu1 }
 0x2fd   : > { %v2889_v8 = vadd.f32 %v3619_v44, %v5895_v14 }
 0x2fe   : > { %v2883_v45 = vpop.f32.mrf.mxu1 }
 0x2ff   : > { %v3107_v18 = vadd.f32 %v4115_v46, %v2889_v8  ;;  %v2884_v37 = vadd.f32 %v5895_v14, %v2883_v45 }
 0x301   : > { %3171 = vst [vmem:[%s5909_s8 + $0xc8] sm:$0xff] %v3107_v18  ;;  %v3106_v50 = vadd.f32 %v4116_v48, %v2884_v37  ;;  %v4131_v18 = vld [vmem:[%s4657_s29 + $0x148] sm:$0xff] }
 0x303   : > { %3170 = vst [vmem:[%s5909_s8 + $0xc0] sm:$0xff] %v3106_v50  ;;  %v3622_v34 = vpop.f32.mrf.mxu1  ;;  %v4132_v50 = vld [vmem:[%s4657_s29 + $0x140] sm:$0xff] }
 0x304   : > { %v2899_v32 = vadd.f32 %v3622_v34, %v5895_v14 }
 0x305   : > { %v2893_v15 = vpop.f32.mrf.mxu1 }
 0x306   : > { %v3109_v53 = vadd.f32 %v4117_v51, %v2899_v32  ;;  %v2894_v10 = vadd.f32 %v5895_v14, %v2893_v15 }
 0x308   : > { %3173 = vst [vmem:[%s5909_s8 + $0xd8] sm:$0xff] %v3109_v53  ;;  %v3108_v40 = vadd.f32 %v4118_v0, %v2894_v10  ;;  %v4133_v53 = vld [vmem:[%s4657_s29 + $0x158] sm:$0xff] }
 0x30a   : > { %3172 = vst [vmem:[%s5909_s8 + $0xd0] sm:$0xff] %v3108_v40  ;;  %v4134_v40 = vld [vmem:[%s4657_s29 + $0x150] sm:$0xff] }
 0x30b   : > { %v3625_v1 = vpop.f32.mrf.mxu1 }
 0x30c   : > { %v2909_v2 = vadd.f32 %v3625_v1, %v5895_v14 }
 0x30d   : > { %v2903_v61 = vpop.f32.mrf.mxu1 }
 0x30e   : > { %v3111_v49 = vadd.f32 %v4119_v3, %v2909_v2  ;;  %v2904_v4 = vadd.f32 %v5895_v14, %v2903_v61 }
 0x310   : > { %3175 = vst [vmem:[%s5909_s8 + $0xe8] sm:$0xff] %v3111_v49  ;;  %v3110_v30 = vadd.f32 %v4120_v38, %v2904_v4  ;;  %v4135_v49 = vld [vmem:[%s4657_s29 + $0x168] sm:$0xff] }
 0x312   : > { %3174 = vst [vmem:[%s5909_s8 + $0xe0] sm:$0xff] %v3110_v30  ;;  %v4136_v30 = vld [vmem:[%s4657_s29 + $0x160] sm:$0xff] }
 0x314   : > { %v3628_v62 = vpop.f32.mrf.mxu1 }
 0x315   : > { %v2919_v5 = vadd.f32 %v3628_v62, %v5895_v14 }
 0x316   : > { %v2913_v6 = vpop.f32.mrf.mxu1 }
 0x317   : > { %v3113_v7 = vadd.f32 %v4121_v31, %v2919_v5  ;;  %v2914_v22 = vadd.f32 %v5895_v14, %v2913_v6 }
 0x319   : > { %3177 = vst [vmem:[%s5909_s8 + $0xf8] sm:$0xff] %v3113_v7  ;;  %v3112_v26 = vadd.f32 %v4122_v19, %v2914_v22  ;;  %v4137_v7 = vld [vmem:[%s4657_s29 + $0x178] sm:$0xff] }
 0x31b   : > { %3176 = vst [vmem:[%s5909_s8 + $0xf0] sm:$0xff] %v3112_v26 }
 0x31c   : > { %v3631_v58 = vpop.f32.mrf.mxu1 }
 0x31d   : > { %v2929_v60 = vadd.f32 %v3631_v58, %v5895_v14  ;;  %v4138_v58 = vld [vmem:[%s4657_s29 + $0x170] sm:$0xff] }
 0x31e   : > { %v2923_v17 = vpop.f32.mrf.mxu1 }
 0x31f   : > { %v3115_v20 = vadd.f32 %v4123_v9, %v2929_v60  ;;  %v2924_v21 = vadd.f32 %v5895_v14, %v2923_v17 }
 0x321   : > { %3179 = vst [vmem:[%s5909_s8 + $0x108] sm:$0xff] %v3115_v20  ;;  %v3114_v52 = vadd.f32 %v4124_v57, %v2924_v21  ;;  %v4139_v20 = vld [vmem:[%s4657_s29 + $0x188] sm:$0xff] }
 0x323   : > { %3178 = vst [vmem:[%s5909_s8 + $0x100] sm:$0xff] %v3114_v52  ;;  %v3634_v28 = vpop.f32.mrf.mxu1 }
 0x324   : > { %v2939_v56 = vadd.f32 %v3634_v28, %v5895_v14  ;;  %v4140_v28 = vld [vmem:[%s4657_s29 + $0x180] sm:$0xff] }
 0x325   : > { %v2933_v36 = vpop.f32.mrf.mxu1 }
 0x326   : > { %v3117_v42 = vadd.f32 %v4125_v24, %v2939_v56  ;;  %v2934_v59 = vadd.f32 %v5895_v14, %v2933_v36 }
 0x328   : > { %3181 = vst [vmem:[%s5909_s8 + $0x118] sm:$0xff] %v3117_v42  ;;  %v3116_v63 = vadd.f32 %v4126_v25, %v2934_v59  ;;  %v4141_v42 = vld [vmem:[%s4657_s29 + $0x198] sm:$0xff] }
 0x32a   : > { %3180 = vst [vmem:[%s5909_s8 + $0x110] sm:$0xff] %v3116_v63 }
 0x32b   : > { %v3637_v16 = vpop.f32.mrf.mxu1 }
 0x32c   : > { %v2949_v27 = vadd.f32 %v3637_v16, %v5895_v14  ;;  %v4142_v16 = vld [vmem:[%s4657_s29 + $0x190] sm:$0xff] }
 0x32d   : > { %v2943_v11 = vpop.f32.mrf.mxu1 }
 0x32e   : > { %v3119_v54 = vadd.f32 %v4127_v29, %v2949_v27  ;;  %v2944_v12 = vadd.f32 %v5895_v14, %v2943_v11 }
 0x330   : > { %3183 = vst [vmem:[%s5909_s8 + $0x128] sm:$0xff] %v3119_v54  ;;  %v3118_v47 = vadd.f32 %v4128_v55, %v2944_v12  ;;  %v4143_v54 = vld [vmem:[%s4657_s29 + $0x1a8] sm:$0xff] }
 0x332   : > { %3182 = vst [vmem:[%s5909_s8 + $0x120] sm:$0xff] %v3118_v47 }
 0x334   : > { %v3640_v23 = vpop.f32.mrf.mxu1 }
 0x335   : > { %v2959_v35 = vadd.f32 %v3640_v23, %v5895_v14  ;;  %v4144_v23 = vld [vmem:[%s4657_s29 + $0x1a0] sm:$0xff] }
 0x336   : > { %v2953_v39 = vpop.f32.mrf.mxu1 }
 0x337   : > { %v3121_v13 = vadd.f32 %v4129_v33, %v2959_v35  ;;  %v2954_v41 = vadd.f32 %v5895_v14, %v2953_v39 }
 0x339   : > { %3185 = vst [vmem:[%s5909_s8 + $0x138] sm:$0xff] %v3121_v13  ;;  %v3120_v44 = vadd.f32 %v4130_v43, %v2954_v41  ;;  %v4145_v13 = vld [vmem:[%s4657_s29 + $0x1b8] sm:$0xff] }
 0x33b   : > { %3184 = vst [vmem:[%s5909_s8 + $0x130] sm:$0xff] %v3120_v44 }
 0x340   : > { %v3643_v8 = vpop.f32.mrf.mxu1 }
 0x341   : > { %v2969_v45 = vadd.f32 %v3643_v8, %v5895_v14  ;;  %v4146_v8 = vld [vmem:[%s4657_s29 + $0x1b0] sm:$0xff] }
 0x342   : > { %v2963_v46 = vpop.f32.mrf.mxu1 }
 0x343   : > { %v3123_v37 = vadd.f32 %v4131_v18, %v2969_v45  ;;  %v2964_v48 = vadd.f32 %v5895_v14, %v2963_v46 }
 0x345   : > { %3187 = vst [vmem:[%s5909_s8 + $0x148] sm:$0xff] %v3123_v37  ;;  %v3122_v34 = vadd.f32 %v4132_v50, %v2964_v48  ;;  %v4147_v37 = vld [vmem:[%s4657_s29 + $0x1c8] sm:$0xff] }
 0x347   : > { %3186 = vst [vmem:[%s5909_s8 + $0x140] sm:$0xff] %v3122_v34 }
 0x351   : > { %v3646_v32 = vpop.f32.mrf.mxu1 }
 0x352   : > { %v2979_v15 = vadd.f32 %v3646_v32, %v5895_v14  ;;  %v4148_v32 = vld [vmem:[%s4657_s29 + $0x1c0] sm:$0xff] }
 0x353   : > { %v2973_v51 = vpop.f32.mrf.mxu1 }
 0x354   : > { %v3125_v10 = vadd.f32 %v4133_v53, %v2979_v15  ;;  %v2974_v0 = vadd.f32 %v5895_v14, %v2973_v51 }
 0x356   : > { %3189 = vst [vmem:[%s5909_s8 + $0x158] sm:$0xff] %v3125_v10  ;;  %v3124_v1 = vadd.f32 %v4134_v40, %v2974_v0  ;;  %v4149_v10 = vld [vmem:[%s4657_s29 + $0x1d8] sm:$0xff] }
 0x358   : > { %3188 = vst [vmem:[%s5909_s8 + $0x150] sm:$0xff] %v3124_v1 }
 0x360   : > { %v3649_v2 = vpop.f32.mrf.mxu1 }
 0x361   : > { %v2989_v61 = vadd.f32 %v3649_v2, %v5895_v14  ;;  %v4150_v2 = vld [vmem:[%s4657_s29 + $0x1d0] sm:$0xff] }
 0x362   : > { %v2983_v3 = vpop.f32.mrf.mxu1 }
 0x363   : > { %v3127_v4 = vadd.f32 %v4135_v49, %v2989_v61  ;;  %v2984_v38 = vadd.f32 %v5895_v14, %v2983_v3 }
 0x365   : > { %3191 = vst [vmem:[%s5909_s8 + $0x168] sm:$0xff] %v3127_v4  ;;  %v3126_v62 = vadd.f32 %v4136_v30, %v2984_v38  ;;  %v4151_v4 = vld [vmem:[%s4657_s29 + $0x1e8] sm:$0xff] }
 0x367   : > { %3190 = vst [vmem:[%s5909_s8 + $0x160] sm:$0xff] %v3126_v62 }
 0x372   : > { %v3652_v5 = vpop.f32.mrf.mxu1 }
 0x373   : > { %v2999_v6 = vadd.f32 %v3652_v5, %v5895_v14  ;;  %v4152_v5 = vld [vmem:[%s4657_s29 + $0x1e0] sm:$0xff] }
 0x374   : > { %v2993_v31 = vpop.f32.mrf.mxu1 }
 0x375   : > { %v3129_v22 = vadd.f32 %v4137_v7, %v2999_v6  ;;  %v2994_v19 = vadd.f32 %v5895_v14, %v2993_v31 }
 0x376   : > { %v3655_v26 = vpop.f32.mrf.mxu1 }
 0x377   : > { %3193 = vst [vmem:[%s5909_s8 + $0x178] sm:$0xff] %v3129_v22  ;;  %v3128_v60 = vadd.f32 %v4138_v58, %v2994_v19  ;;  %v3009_v17 = vadd.f32 %v3655_v26, %v5895_v14  ;;  %v4153_v22 = vld [vmem:[%s4657_s29 + $0x1f8] sm:$0xff]  ;;  %v4154_v58 = vld [vmem:[%s4657_s29 + $0x1f0] sm:$0xff] }
 0x378   : > { %v3003_v9 = vpop.f32.mrf.mxu1 }
 0x379   : > { %3192 = vst [vmem:[%s5909_s8 + $0x170] sm:$0xff] %v3128_v60  ;;  %v3131_v21 = vadd.f32 %v4139_v20, %v3009_v17  ;;  %v3004_v57 = vadd.f32 %v5895_v14, %v3003_v9 }
 0x37a   : > { %v3658_v52 = vpop.f32.mrf.mxu1 }
 0x37b   : > { %3195 = vst [vmem:[%s5909_s8 + $0x188] sm:$0xff] %v3131_v21  ;;  %v3130_v56 = vadd.f32 %v4140_v28, %v3004_v57  ;;  %v3019_v36 = vadd.f32 %v3658_v52, %v5895_v14 }
 0x37c   : > { %v3013_v24 = vpop.f32.mrf.mxu1 }
 0x37d   : > { %3194 = vst [vmem:[%s5909_s8 + $0x180] sm:$0xff] %v3130_v56  ;;  %v3133_v59 = vadd.f32 %v4141_v42, %v3019_v36  ;;  %v3014_v25 = vadd.f32 %v5895_v14, %v3013_v24 }
 0x37e   : > { %v3661_v63 = vpop.f32.mrf.mxu1 }
 0x37f   : > { %3197 = vst [vmem:[%s5909_s8 + $0x198] sm:$0xff] %v3133_v59  ;;  %v3132_v27 = vadd.f32 %v4142_v16, %v3014_v25  ;;  %v3029_v11 = vadd.f32 %v3661_v63, %v5895_v14 }
 0x380   : > { %v3023_v29 = vpop.f32.mrf.mxu1 }
 0x381   : > { %3196 = vst [vmem:[%s5909_s8 + $0x190] sm:$0xff] %v3132_v27  ;;  %v3135_v12 = vadd.f32 %v4143_v54, %v3029_v11  ;;  %v3024_v55 = vadd.f32 %v5895_v14, %v3023_v29 }
 0x382   : > { %v3664_v47 = vpop.f32.mrf.mxu1 }
 0x383   : > { %3199 = vst [vmem:[%s5909_s8 + $0x1a8] sm:$0xff] %v3135_v12  ;;  %v3134_v35 = vadd.f32 %v4144_v23, %v3024_v55  ;;  %v3039_v39 = vadd.f32 %v3664_v47, %v5895_v14 }
 0x384   : > { %v3033_v33 = vpop.f32.mrf.mxu1 }
 0x385   : > { %3198 = vst [vmem:[%s5909_s8 + $0x1a0] sm:$0xff] %v3134_v35  ;;  %v3137_v41 = vadd.f32 %v4145_v13, %v3039_v39  ;;  %v3034_v43 = vadd.f32 %v5895_v14, %v3033_v33 }
 0x386   : > { %v3667_v44 = vpop.f32.mrf.mxu1 }
 0x387   : > { %3201 = vst [vmem:[%s5909_s8 + $0x1b8] sm:$0xff] %v3137_v41  ;;  %v3136_v45 = vadd.f32 %v4146_v8, %v3034_v43  ;;  %v3049_v46 = vadd.f32 %v3667_v44, %v5895_v14 }
 0x388   : > { %v3043_v18 = vpop.f32.mrf.mxu1 }
 0x389   : > { %3200 = vst [vmem:[%s5909_s8 + $0x1b0] sm:$0xff] %v3136_v45  ;;  %v3139_v48 = vadd.f32 %v4147_v37, %v3049_v46  ;;  %v3044_v50 = vadd.f32 %v5895_v14, %v3043_v18 }
 0x38a   : > { %v3670_v34 = vpop.f32.mrf.mxu1 }
 0x38b   : > { %3203 = vst [vmem:[%s5909_s8 + $0x1c8] sm:$0xff] %v3139_v48  ;;  %v3138_v15 = vadd.f32 %v4148_v32, %v3044_v50  ;;  %v3059_v51 = vadd.f32 %v3670_v34, %v5895_v14 }
 0x38c   : > { %v3053_v53 = vpop.f32.mrf.mxu1 }
 0x38d   : > { %3202 = vst [vmem:[%s5909_s8 + $0x1c0] sm:$0xff] %v3138_v15  ;;  %v3141_v0 = vadd.f32 %v4149_v10, %v3059_v51  ;;  %v3054_v40 = vadd.f32 %v5895_v14, %v3053_v53 }
 0x38e   : > { %v3673_v1 = vpop.f32.mrf.mxu1 }
 0x38f   : > { %3205 = vst [vmem:[%s5909_s8 + $0x1d8] sm:$0xff] %v3141_v0  ;;  %v3140_v61 = vadd.f32 %v4150_v2, %v3054_v40  ;;  %v3069_v3 = vadd.f32 %v3673_v1, %v5895_v14 }
 0x390   : > { %v3063_v49 = vpop.f32.mrf.mxu1 }
 0x391   : > { %3204 = vst [vmem:[%s5909_s8 + $0x1d0] sm:$0xff] %v3140_v61  ;;  %v3143_v38 = vadd.f32 %v4151_v4, %v3069_v3  ;;  %v3064_v30 = vadd.f32 %v5895_v14, %v3063_v49 }
 0x392   : > { %v3676_v62 = vpop.f32.mrf.mxu1 }
 0x393   : > { %3207 = vst [vmem:[%s5909_s8 + $0x1e8] sm:$0xff] %v3143_v38  ;;  %v3142_v6 = vadd.f32 %v4152_v5, %v3064_v30  ;;  %v3079_v31 = vadd.f32 %v3676_v62, %v5895_v14 }
 0x394   : > { %v3073_v7 = vpop.f32.mrf.mxu1 }
 0x395   : > { %3206 = vst [vmem:[%s5909_s8 + $0x1e0] sm:$0xff] %v3142_v6  ;;  %v3145_v19 = vadd.f32 %v4153_v22, %v3079_v31  ;;  %v3074_v26 = vadd.f32 %v5895_v14, %v3073_v7  ;;  %3217 = sbr.rel (!%p6209_p13) target bundleno = 949 (0x3b5), region = 72 }
 0x397   : > { %3209 = vst [vmem:[%s5909_s8 + $0x1f8] sm:$0xff] %v3145_v19  ;;  %v3144_v60 = vadd.f32 %v4154_v58, %v3074_v26 }
 0x399   : > { %3208 = vst [vmem:[%s5909_s8 + $0x1f0] sm:$0xff] %v3144_v60 }
 0x39a   : > { %s6220_s17 = smov (!%p3220_p8, %s3219_s17), 64 }
 0x39b   : > { %s6121_s16 = sshll.u32 %s6220_s17, 7 }
 0x39c   : > { %s3224_s7 = ssub.s32 8192, %s6121_s16 }
 0x39d   : > { %3225 = vsyncadd %s3211_s2, %s3224_s7  ;;  %p3461_p9 = scmp.ne.s32.totalorder %s6121_s16, 0  ;;  %s3468_s9 = sshll.u32 %s4465_s25, 13 }
 0x39e   : > { %s6131_s28 = scalar_lea.hbm %s6185_s6, %s3468_s9  ;;  %s3230_s19 = sshll.u32 %s5909_s8, 4  ;;  %s6134_s19 = int_to_ptr.vmem [resolvable:$true] %s3230_s19 }
 0x39f   : > { %s4311_s15 = scalar_lea.vmem %s6134_s19, %s6121_s16  ;;  %s4406_s12 = smov [#allocation13]  }
 0x3a0   : > { %p4312_p10 = scmp.ne.s32.totalorder %s6134_s19, %s4311_s15  ;;  %s4315_s0 = sshll.u32 %s4406_s12, 4  ;;  %s4316_s0 = int_to_ptr.vmem [resolvable:$false] %s4315_s0 }
 0x3a1   : > { %s4317_s25 = scalar_lea.vmem %s4316_s0, 16384  ;;  %p4318_p7 = scmp.lt.s32.totalorder %s6134_s19, %s4316_s0 }
 0x3a2   : > { %p4313_p1 = pnand %p4312_p10, %p3461_p9  ;;  %p4319_p0 = scmp.lt.s32.totalorder %s4317_s25, %s4311_s15 }
 0x3a4   : > { %p4314_p3 = pneg %p4313_p1  ;;  %p4320_p4 = por %p4319_p0, %p4318_p7 }
 0x3a6   : > { %p4321_p6 = pnand %p4320_p4, %p4314_p3 }
 0x3a8   : > { %4324 = shalt.err (!%p4321_p6)
}
 0x3a9   : > { %s4325_s11 = scalar_lea.hbm %s6131_s28, %s6121_s16  ;;  %s4329_s8 = scalar_lea.hbm %s6185_s6, 16000 }
 0x3aa   : > { %p4326_p2 = scmp.ne.s32.totalorder %s6131_s28, %s4325_s11  ;;  %p4330_p13 = scmp.lt.s32.totalorder %s6131_s28, %s6185_s6 }
 0x3ab   : > { %p4331_p8 = scmp.lt.s32.totalorder %s4329_s8, %s4325_s11 }
 0x3ac   : > { %p4327_p11 = pnand %p4326_p2, %p3461_p9 }
 0x3ad   : > { %p4332_p10 = por %p4331_p8, %p4330_p13 }
 0x3ae   : > { %p4328_p12 = pneg %p4327_p11 }
 0x3b0   : > { %p4333_p1 = pnand %p4332_p10, %p4328_p12 }
 0x3b2   : > { %4336 = shalt.err (!%p4333_p1)
}
 0x3b3   : > { %s4407_s7 = smov 128   ;;  %s4408_s9 = smov 8  }
 0x3b4   : > { %3236 = dma.vmem_to_hbm [thread:$0]  (%p3461_p9), %s6134_s19, %s6121_s16, %s6131_s28, %s3211_s2, %s4407_s7, %s4407_s7, %s4408_s9  }
 0x3b5 PF: > { %s3245_s26 = sand.u32 1, %s4379_s21   ;;  %p6210_p3 = scmp.ne.s32.totalorder %s6194_s10, 0 }
 0x3b6   : > { %s3246_s14 = scalar_lea.sflag [#allocation4], %s3245_s26 }
 0x3b7   : > { %p3777_p7 = pnand %p3370_p5, %p6210_p3 }
 0x3b9   : > { %p3778_p0 = pneg %p3777_p7 }
 0x3bb   : > { %4374 = dma.done.wait (%p3778_p0), %s3246_s14, 8192  }
 0x3bc   : > { %4376 = vsyncadd (%p3778_p0), %s3246_s14, 4294959104  ;;  %p24_p4 = scmp.ge.s32.totalorder %s4469_s27, 4   ;;  %s6211_s21 = smov %s4383_s22 }
 0x3bd   : > { %s6212_s22 = smov %s4387_s23  ;;  %s6213_s23 = smov %s4481_s30 }
 0x3be   : > { %s6214_s24 = smov %s4469_s27  ;;  %26 = sbr.rel (!%p24_p4) target bundleno = 12 (0xc), region = 118 }
 0x3c3   :  { %3251 = vsyncpa [#allocation3], 1 }
 0x3c4   :  { %3253 = vsyncpa [#allocation3 + $0x1], 1 }
 0x3c5   :  { %3254 = vsyncpa [#allocation6], 1 }
 0x3c6   :  { %3256 = vsyncpa [#allocation6 + $0x1], 1 }
 0x3c7   :  { %3257 = vsyncpa [#allocation9], 1 }
 0x3c8   :  { %3258 = vsyncpa [#allocation12], 1 }
 0x3c9   :  { %3259 = vsyncpa [#allocation4], 1 }
 0x3ca   :  { %3261 = vsyncpa [#allocation4 + $0x1], 1 }

</bundles_post_ra>
